<compile_context>
chip_gen: v6e
topology: v6e:2x2x1
jax: 0.10.0
libtpu: 0.0.40
codegen_flags: <defaults>
</compile_context>

<pallas_src>
import functools

import jax
import jax.numpy as jnp
from jax import lax
from jax.experimental import pallas as pl
from jax.experimental.pallas import tpu as pltpu


def _round_up(x, m):
    return (x + m - 1) // m * m


def _choose_bt(bp):
    """Batch tile: multiple of 8, <=128, and >=2 batch groups when possible so
    the leading 'parallel' grid axis can split across v7x's 2 TensorCores."""
    if bp >= 256 and bp % 128 == 0:
        return 128
    if bp >= 16 and bp % 16 == 0:
        return min(128, bp // 2)
    return bp


def _vmem_estimate(tc, bt, ip0, dims, single_buffer_weights):
    """Rough VMEM bytes for one grid step (used to cap tc; v7x has 64 MiB)."""
    nl = len(dims)
    wbuf = 1 if single_buffer_weights else 2
    b = 0
    b += 2 * tc * bt * ip0 * 2                       # x block, double-buffered, bf16
    b += 2 * tc * bt * dims[-1][1] * 2               # out block, double-buffered, bf16
    for (ip_l, hp_l) in dims:                        # weights + bias (resident)
        b += wbuf * ((ip_l + hp_l) * 4 * hp_l * 2 + 4 * hp_l * 4)
    for i, (_, hp_l) in enumerate(dims):
        b += 2 * bt * hp_l * 4                       # h, c state (f32)
        b += tc * bt * 4 * hp_l * 4                  # hoisted x @ W_ih (f32)
        if i < nl - 1:
            b += tc * bt * hp_l * 2                  # inter-layer activation (bf16)
    return b


# ----------------------------------------------------------------------------
# One-time weight packing (hoisted out of the per-forward path).
# ----------------------------------------------------------------------------
def _pack_layer(w_ih, w_hh, b_ih, b_hh):
    """PyTorch [4H, in] weights -> transposed, gate-lane-padded bf16 operands."""
    four_h, in_dim = w_ih.shape
    h = four_h // 4
    hp = _round_up(h, 128)
    ip = _round_up(in_dim, 128)

    def pad_gates(w_t, real_in, pad_in):
        out = jnp.zeros((pad_in, 4 * hp), jnp.float32)
        for g in range(4):
            out = out.at[:real_in, g * hp:g * hp + h].set(w_t[:, g * h:(g + 1) * h])
        return out.astype(jnp.bfloat16)

    wih_p = pad_gates(jnp.transpose(w_ih).astype(jnp.float32), in_dim, ip)
    whh_p = pad_gates(jnp.transpose(w_hh).astype(jnp.float32), h, hp)

    b = (b_ih + b_hh).astype(jnp.float32)
    b_p = jnp.zeros((1, 4 * hp), jnp.float32)
    for g in range(4):
        b_p = b_p.at[0, g * hp:g * hp + h].set(b[g * h:(g + 1) * h])
    return (wih_p, whh_p, b_p)


def prepare_lstm_ae(params):
    """Pack all encoder+decoder layers once. Returns (packed_layers, relu_flags)."""
    packed, relu_flags = [], []
    n_enc = len(params["enc"])
    for l, p in enumerate(params["enc"]):
        packed.append(_pack_layer(*p))
        relu_flags.append(l == n_enc - 1)        # ReLU fused onto last encoder layer
    for p in params["dec"]:
        packed.append(_pack_layer(*p))
        relu_flags.append(False)
    return tuple(packed), tuple(relu_flags)


# ----------------------------------------------------------------------------
# Fused multi-layer LSTM kernel: one (batch-group, time-chunk) grid step runs
# every layer over the chunk; per-layer h/c state and the inter-layer chunk
# activation live in VMEM scratch.
# ----------------------------------------------------------------------------
def _make_fused_kernel(n_layers, dims, relu_flags, tc):
    def kernel(*refs):
        x_ref = refs[0]
        w_refs = refs[1:1 + 3 * n_layers]
        out_ref = refs[1 + 3 * n_layers]
        sc = refs[2 + 3 * n_layers:]
        h_scs = sc[0:n_layers]
        c_scs = sc[n_layers:2 * n_layers]
        xw_scs = sc[2 * n_layers:3 * n_layers]
        act_scs = sc[3 * n_layers:]
        bt = x_ref.shape[1]

        # CORRECTNESS NOTE: the recurrent h/c state is carried in VMEM scratch
        # across the time axis. This relies on (a) time being the LAST grid
        # axis and marked "arbitrary" (sequential per core) and (b) this reset
        # at time chunk 0 of each batch group. Do not reorder the grid.
        @pl.when(pl.program_id(1) == 0)
        def _init():
            for l in range(n_layers):
                h_scs[l][...] = jnp.zeros_like(h_scs[l])
                c_scs[l][...] = jnp.zeros_like(c_scs[l])

        for l in range(n_layers):
            ip_l, hp = dims[l]
            wih = w_refs[3 * l][...]                 # [Ip_l, 4*Hp] bf16, resident
            whh = w_refs[3 * l + 1][...]             # [Hp, 4*Hp]   bf16, resident
            bias = w_refs[3 * l + 2][...]            # [1, 4*Hp]    f32
            in_ref = x_ref if l == 0 else act_scs[l - 1]
            h_sc, c_sc, xw_sc = h_scs[l], c_scs[l], xw_scs[l]
            is_last = l == n_layers - 1
            relu = relu_flags[l]

            # Phase 1: hoisted input projection + bias for the whole chunk.
            x_flat = in_ref[...].reshape(tc * bt, ip_l)
            xw = jnp.dot(x_flat, wih, preferred_element_type=jnp.float32)
            xw_sc[...] = (xw + bias).reshape(tc, bt, 4 * hp)

            # Phase 2: serial recurrence; only h @ W_hh on the critical path.
            def step(t, carry, *, whh=whh, h_sc=h_sc, c_sc=c_sc, xw_sc=xw_sc,
                     hp=hp, is_last=is_last, relu=relu, l=l):
                h = h_sc[...]
                c = c_sc[...]
                gates = xw_sc[t] + jnp.dot(h.astype(whh.dtype), whh,
                                           preferred_element_type=jnp.float32)
                # Gate order i, f, g, o; each slice is a 128-lane-aligned slab.
                i_g = jax.nn.sigmoid(gates[:, 0 * hp:1 * hp])
                f_g = jax.nn.sigmoid(gates[:, 1 * hp:2 * hp])
                g_g = jnp.tanh(gates[:, 2 * hp:3 * hp])
                o_g = jax.nn.sigmoid(gates[:, 3 * hp:4 * hp])
                c_new = f_g * c + i_g * g_g
                h_new = o_g * jnp.tanh(c_new)
                h_sc[...] = h_new
                c_sc[...] = c_new
                y = jnp.maximum(h_new, 0.0) if relu else h_new
                if is_last:
                    out_ref[t] = y.astype(out_ref.dtype)       # bf16 writeback
                else:
                    act_scs[l][t] = y.astype(act_scs[l].dtype)  # bf16, stays in VMEM
                return carry

            lax.fori_loop(0, tc, step, 0, unroll=(tc <= 8))

    return kernel


# ----------------------------------------------------------------------------
# Fused LSTMAE forward.
# ----------------------------------------------------------------------------
@functools.partial(jax.jit, static_argnames=("relu_flags", "time_chunk_target"))
def lstm_ae_forward(packed_layers, x, *, relu_flags, time_chunk_target=16):
    """x: [B, T, input_size] batch-first -> [B, T, input_size] float32."""
    B, T, I = x.shape
    n_layers = len(packed_layers)
    assert len(relu_flags) == n_layers

    # (padded input dim, padded hidden dim) per layer; both static under jit.
    dims = tuple((w[0].shape[0], w[1].shape[0]) for w in packed_layers)
    for l in range(1, n_layers):
        assert dims[l][0] == dims[l - 1][1], "layer chaining mismatch"
    ip0 = dims[0][0]
    hp_last = dims[-1][1]

    Bp = _round_up(B, 8)
    Bt = _choose_bt(Bp)

    # Time chunk: amortizes per-grid-step overhead and the hoisted input
    # projection, capped by a v7x-safe (~40 MiB) VMEM budget. T is padded up
    # to a multiple of tc (padded tail steps are sliced off; safe because the
    # LSTM runs forward in time).
    budget = 40 * 1024 * 1024
    tc = max(1, min(T, time_chunk_target))
    while tc > 1 and _vmem_estimate(tc, Bt, ip0, dims, True) > budget:
        tc = max(1, tc // 2)
    Tp = _round_up(T, tc)

    x_tm = jnp.transpose(x, (1, 0, 2)).astype(jnp.float32)      # [T, B, I]
    x_p = jnp.pad(x_tm, ((0, Tp - T), (0, Bp - B), (0, ip0 - I))
                  ).astype(jnp.bfloat16)

    grid = (Bp // Bt, Tp // tc)       # (batch groups "parallel", time "arbitrary")
    kernel = _make_fused_kernel(n_layers, dims, relu_flags, tc)

    est = _vmem_estimate(tc, Bt, ip0, dims, True)
    vmem_limit = int(min(60 * 1024 * 1024, max(32 * 1024 * 1024, est * 3 // 2)))

    def build_in_specs(single_buffer):
        specs = [pl.BlockSpec((tc, Bt, ip0), lambda bg, ti: (ti, bg, 0))]
        for (ip_l, hp_l) in dims:
            for shape in ((ip_l, 4 * hp_l), (hp_l, 4 * hp_l), (1, 4 * hp_l)):
                if single_buffer:
                    # Constant index map -> single-buffer resident weights.
                    specs.append(pl.BlockSpec(shape, lambda bg, ti: (0, 0),
                                              pipeline_mode=pl.Buffered(1)))
                else:
                    specs.append(pl.BlockSpec(shape, lambda bg, ti: (0, 0)))
        return specs

    scratch = []
    scratch += [pltpu.VMEM((Bt, hp_l), jnp.float32) for (_, hp_l) in dims]    # h
    scratch += [pltpu.VMEM((Bt, hp_l), jnp.float32) for (_, hp_l) in dims]    # c
    scratch += [pltpu.VMEM((tc, Bt, 4 * hp_l), jnp.float32)
                for (_, hp_l) in dims]                                        # x @ W_ih
    scratch += [pltpu.VMEM((tc, Bt, hp_l), jnp.bfloat16)
                for (_, hp_l) in dims[:-1]]                                   # inter-layer act

    flat_weights = [a for layer in packed_layers for a in layer]

    def call(single_buffer):
        return pl.pallas_call(
            kernel,
            out_shape=jax.ShapeDtypeStruct((Tp, Bp, hp_last), jnp.bfloat16),
            grid_spec=pltpu.PrefetchScalarGridSpec(
                num_scalar_prefetch=0,
                grid=grid,
                in_specs=build_in_specs(single_buffer),
                out_specs=pl.BlockSpec((tc, Bt, hp_last),
                                       lambda bg, ti: (ti, bg, 0)),
                scratch_shapes=scratch,
            ),
            compiler_params=pltpu.CompilerParams(
                dimension_semantics=("parallel", "arbitrary"),
                vmem_limit_bytes=vmem_limit),
        )(x_p, *flat_weights)

    try:
        out_p = call(True)
    except Exception:   # fall back to default double-buffering if Buffered(1) rejected
        out_p = call(False)

    out = out_p[:T, :B, :I]                         # unpad once, at the very end
    return jnp.transpose(out, (1, 0, 2)).astype(jnp.float32)


# ----------------------------------------------------------------------------
# Parameter construction (mirrors the module: Xavier-uniform gain sqrt(2) on
# LSTM weights, default uniform(-1/sqrt(H), 1/sqrt(H)) on biases).
# ----------------------------------------------------------------------------
def _xavier_uniform(key, shape, gain):
    fan_out, fan_in = shape
    bound = gain * jnp.sqrt(6.0 / (fan_in + fan_out))
    return jax.random.uniform(key, shape, jnp.float32, -bound, bound)


def _make_lstm_params(key, in_size, hid_size, num_layers):
    layers = []
    gain = float(jnp.sqrt(2.0))
    k = 1.0 / jnp.sqrt(hid_size)
    for l in range(num_layers):
        layer_in = in_size if l == 0 else hid_size
        key, k1, k2, k3, k4 = jax.random.split(key, 5)
        w_ih = _xavier_uniform(k1, (4 * hid_size, layer_in), gain)
        w_hh = _xavier_uniform(k2, (4 * hid_size, hid_size), gain)
        b_ih = jax.random.uniform(k3, (4 * hid_size,), jnp.float32, -k, k)
        b_hh = jax.random.uniform(k4, (4 * hid_size,), jnp.float32, -k, k)
        layers.append((w_ih, w_hh, b_ih, b_hh))
    return layers


def init_lstm_ae_params(key, input_size, hidden_size, num_layers):
    k_enc, k_dec = jax.random.split(key)
    return {
        "enc": _make_lstm_params(k_enc, input_size, hidden_size, num_layers),
        "dec": _make_lstm_params(k_dec, hidden_size, input_size, num_layers),
    }


# ----------------------------------------------------------------------------
# Pure-JAX reference (f32) for correctness checking.
# ----------------------------------------------------------------------------
def _lstm_layer_ref(x_tm, w_ih, w_hh, b_ih, b_hh, apply_relu):
    B = x_tm.shape[1]
    H = w_hh.shape[1]
    wih_t, whh_t = w_ih.T, w_hh.T
    bias = (b_ih + b_hh)[None, :]

    def step(carry, x_t):
        h, c = carry
        gates = x_t @ wih_t + h @ whh_t + bias
        i = jax.nn.sigmoid(gates[:, 0 * H:1 * H])
        f = jax.nn.sigmoid(gates[:, 1 * H:2 * H])
        g = jnp.tanh(gates[:, 2 * H:3 * H])
        o = jax.nn.sigmoid(gates[:, 3 * H:4 * H])
        c = f * c + i * g
        h = o * jnp.tanh(c)
        y = jnp.maximum(h, 0.0) if apply_relu else h
        return (h, c), y

    init = (jnp.zeros((B, H), jnp.float32), jnp.zeros((B, H), jnp.float32))
    _, ys = lax.scan(step, init, x_tm)
    return ys


def lstm_ae_ref(params, x):
    h = jnp.transpose(x, (1, 0, 2))
    n_enc = len(params["enc"])
    for l, p in enumerate(params["enc"]):
        h = _lstm_layer_ref(h, *p, apply_relu=(l == n_enc - 1))
    for p in params["dec"]:
        h = _lstm_layer_ref(h, *p, apply_relu=False)
    return jnp.transpose(h, (1, 0, 2))


if __name__ == "__main__":
    # Small shapes consistent with the module: batch=2, seq_len=8,
    # input_size=4, hidden_size=32, num_layers=1.
    B, T, INPUT, HIDDEN, LAYERS = 2, 8, 4, 32, 1

    key = jax.random.PRNGKey(0)
    k_x, k_p = jax.random.split(key)
    x = jax.random.normal(k_x, (B, T, INPUT), dtype=jnp.float32)
    params = init_lstm_ae_params(k_p, INPUT, HIDDEN, LAYERS)

    packed, relu_flags = prepare_lstm_ae(params)   # one-time weight packing

    out = lstm_ae_forward(packed, x, relu_flags=relu_flags)
    out = jax.block_until_ready(out)
    assert out.shape == (B, T, INPUT), out.shape
    assert out.dtype == jnp.float32

    ref = lstm_ae_ref(params, x)
    err = float(jnp.max(jnp.abs(out - ref)))
    assert err < 5e-2, f"max abs err vs f32 reference: {err}"
    print("KERNEL_OK")
</pallas_src>

<mosaic_0001>
module attributes {stable_mosaic.version = 11 : i64} {
  func.func @kernel(%arg0: i32, %arg1: i32, %arg2: memref<8x8x128xbf16, #tpu.memory_space<vmem>>, %arg3: memref<128x512xbf16, #tpu.memory_space<vmem>>, %arg4: memref<128x512xbf16, #tpu.memory_space<vmem>>, %arg5: memref<1x512xf32, #tpu.memory_space<vmem>>, %arg6: memref<128x512xbf16, #tpu.memory_space<vmem>>, %arg7: memref<128x512xbf16, #tpu.memory_space<vmem>>, %arg8: memref<1x512xf32, #tpu.memory_space<vmem>>, %arg9: memref<8x8x128xbf16, #tpu.memory_space<vmem>>, %arg10: memref<8x128xf32, #tpu.memory_space<vmem>>, %arg11: memref<8x128xf32, #tpu.memory_space<vmem>>, %arg12: memref<8x128xf32, #tpu.memory_space<vmem>>, %arg13: memref<8x128xf32, #tpu.memory_space<vmem>>, %arg14: memref<8x8x512xf32, #tpu.memory_space<vmem>>, %arg15: memref<8x8x512xf32, #tpu.memory_space<vmem>>, %arg16: memref<8x8x128xbf16, #tpu.memory_space<vmem>>) attributes {dimension_semantics = [#tpu.dimension_semantics<parallel>, #tpu.dimension_semantics<arbitrary>], iteration_bounds = array<i64: 1, 1>, scalar_prefetch = 0 : i64, scratch_operands = 7 : i64, tpu.core_type = #tpu.core_type<tc>, window_params = [{transform_indices = @transform_0, window_bounds = array<i64: 8, 8, 128>}, {pipeline_mode = #tpu.pipeline_mode<synchronous>, transform_indices = @transform_1, window_bounds = array<i64: 128, 512>}, {pipeline_mode = #tpu.pipeline_mode<synchronous>, transform_indices = @transform_2, window_bounds = array<i64: 128, 512>}, {pipeline_mode = #tpu.pipeline_mode<synchronous>, transform_indices = @transform_3, window_bounds = array<i64: 1, 512>}, {pipeline_mode = #tpu.pipeline_mode<synchronous>, transform_indices = @transform_4, window_bounds = array<i64: 128, 512>}, {pipeline_mode = #tpu.pipeline_mode<synchronous>, transform_indices = @transform_5, window_bounds = array<i64: 128, 512>}, {pipeline_mode = #tpu.pipeline_mode<synchronous>, transform_indices = @transform_6, window_bounds = array<i64: 1, 512>}, {transform_indices = @transform_7, window_bounds = array<i64: 8, 8, 128>}]} {
    %c0_i32 = arith.constant 0 : i32
    %0 = arith.cmpi eq, %arg1, %c0_i32 : i32
    %1 = arith.extui %0 : i1 to i32
    %c0_i32_0 = arith.constant 0 : i32
    %2 = arith.cmpi ne, %1, %c0_i32_0 : i32
    scf.if %2 {
      %cst_299 = arith.constant 0.000000e+00 : f32
      %679 = vector.broadcast %cst_299 : f32 to vector<8x128xf32>
      %c0_300 = arith.constant 0 : index
      %c0_301 = arith.constant 0 : index
      %680 = vector.load %arg10[%c0_300, %c0_301] : memref<8x128xf32, #tpu.memory_space<vmem>>, vector<8x128xf32>
      tpu.vector_store %arg10[%c0_300, %c0_301], %679 {strides = array<i32>} : memref<8x128xf32, #tpu.memory_space<vmem>>, vector<8x128xf32>,
      %cst_302 = arith.constant 0.000000e+00 : f32
      %681 = vector.broadcast %cst_302 : f32 to vector<8x128xf32>
      %c0_303 = arith.constant 0 : index
      %c0_304 = arith.constant 0 : index
      %682 = vector.load %arg12[%c0_303, %c0_304] : memref<8x128xf32, #tpu.memory_space<vmem>>, vector<8x128xf32>
      tpu.vector_store %arg12[%c0_303, %c0_304], %681 {strides = array<i32>} : memref<8x128xf32, #tpu.memory_space<vmem>>, vector<8x128xf32>,
      %cst_305 = arith.constant 0.000000e+00 : f32
      %683 = vector.broadcast %cst_305 : f32 to vector<8x128xf32>
      %c0_306 = arith.constant 0 : index
      %c0_307 = arith.constant 0 : index
      %684 = vector.load %arg11[%c0_306, %c0_307] : memref<8x128xf32, #tpu.memory_space<vmem>>, vector<8x128xf32>
      tpu.vector_store %arg11[%c0_306, %c0_307], %683 {strides = array<i32>} : memref<8x128xf32, #tpu.memory_space<vmem>>, vector<8x128xf32>,
      %cst_308 = arith.constant 0.000000e+00 : f32
      %685 = vector.broadcast %cst_308 : f32 to vector<8x128xf32>
      %c0_309 = arith.constant 0 : index
      %c0_310 = arith.constant 0 : index
      %686 = vector.load %arg13[%c0_309, %c0_310] : memref<8x128xf32, #tpu.memory_space<vmem>>, vector<8x128xf32>
      tpu.vector_store %arg13[%c0_309, %c0_310], %685 {strides = array<i32>} : memref<8x128xf32, #tpu.memory_space<vmem>>, vector<8x128xf32>,
    } else {
    }
    %c0 = arith.constant 0 : index
    %c0_1 = arith.constant 0 : index
    %3 = vector.load %arg3[%c0, %c0_1] : memref<128x512xbf16, #tpu.memory_space<vmem>>, vector<128x512xbf16>
    %c0_2 = arith.constant 0 : index
    %c0_3 = arith.constant 0 : index
    %4 = vector.load %arg4[%c0_2, %c0_3] : memref<128x512xbf16, #tpu.memory_space<vmem>>, vector<128x512xbf16>
    %c0_4 = arith.constant 0 : index
    %c0_5 = arith.constant 0 : index
    %5 = vector.load %arg5[%c0_4, %c0_5] : memref<1x512xf32, #tpu.memory_space<vmem>>, vector<1x512xf32>
    %c0_6 = arith.constant 0 : index
    %c0_7 = arith.constant 0 : index
    %c0_8 = arith.constant 0 : index
    %6 = vector.load %arg2[%c0_6, %c0_7, %c0_8] : memref<8x8x128xbf16, #tpu.memory_space<vmem>>, vector<8x8x128xbf16>
    %7 = vector.shape_cast %6 : vector<8x8x128xbf16> to vector<64x128xbf16>
    %cst = arith.constant dense<0.000000e+00> : vector<64x512xf32>
    %8 = tpu.matmul %7, %3, %cst {dimension_numbers = #tpu.dot_dimension_numbers<[1], [0], [0], [1], [0, 0, 1, 1], [], []>} : vector<64x128xbf16>, vector<128x512xbf16>, vector<64x512xf32> -> vector<64x512xf32>
    %9 = vector.broadcast %5 : vector<1x512xf32> to vector<64x512xf32>
    %10 = arith.addf %8, %9 : vector<64x512xf32>
    %11 = vector.shape_cast %10 : vector<64x512xf32> to vector<8x8x512xf32>
    %c0_9 = arith.constant 0 : index
    %c0_10 = arith.constant 0 : index
    %c0_11 = arith.constant 0 : index
    %12 = vector.load %arg14[%c0_9, %c0_10, %c0_11] : memref<8x8x512xf32, #tpu.memory_space<vmem>>, vector<8x8x512xf32>
    tpu.vector_store %arg14[%c0_9, %c0_10, %c0_11], %11 {strides = array<i32>} : memref<8x8x512xf32, #tpu.memory_space<vmem>>, vector<8x8x512xf32>,
    %c0_i32_12 = arith.constant 0 : i32
    %c0_13 = arith.constant 0 : index
    %c0_14 = arith.constant 0 : index
    %13 = vector.load %arg10[%c0_13, %c0_14] : memref<8x128xf32, #tpu.memory_space<vmem>>, vector<8x128xf32>
    %c0_15 = arith.constant 0 : index
    %c0_16 = arith.constant 0 : index
    %14 = vector.load %arg12[%c0_15, %c0_16] : memref<8x128xf32, #tpu.memory_space<vmem>>, vector<8x128xf32>
    %15 = arith.index_cast %c0_i32_12 : i32 to index
    %c0_17 = arith.constant 0 : index
    %c0_18 = arith.constant 0 : index
    %16 = vector.load %arg14[%15, %c0_17, %c0_18] : memref<8x8x512xf32, #tpu.memory_space<vmem>>, vector<1x8x512xf32>
    %17 = vector.shape_cast %16 : vector<1x8x512xf32> to vector<8x512xf32>
    %18 = arith.truncf %13 : vector<8x128xf32> to vector<8x128xbf16>
    %cst_19 = arith.constant dense<0.000000e+00> : vector<8x512xf32>
    %19 = tpu.matmul %18, %4, %cst_19 {dimension_numbers = #tpu.dot_dimension_numbers<[1], [0], [0], [1], [0, 0, 1, 1], [], []>} : vector<8x128xbf16>, vector<128x512xbf16>, vector<8x512xf32> -> vector<8x512xf32>
    %20 = arith.addf %17, %19 : vector<8x512xf32>
    %21 = vector.extract_strided_slice %20 {offsets = [0, 0], sizes = [8, 128], strides = [1, 1]} : vector<8x512xf32> to vector<8x128xf32>
    %22 = arith.negf %21 : vector<8x128xf32>
    %23 = math.exp %22 : vector<8x128xf32>
    %cst_20 = arith.constant 1.000000e+00 : f32
    %24 = vector.broadcast %cst_20 : f32 to vector<8x128xf32>
    %25 = arith.addf %24, %23 : vector<8x128xf32>
    %26 = arith.divf %24, %25 : vector<8x128xf32>
    %27 = vector.extract_strided_slice %20 {offsets = [0, 128], sizes = [8, 128], strides = [1, 1]} : vector<8x512xf32> to vector<8x128xf32>
    %28 = arith.negf %27 : vector<8x128xf32>
    %29 = math.exp %28 : vector<8x128xf32>
    %cst_21 = arith.constant 1.000000e+00 : f32
    %30 = vector.broadcast %cst_21 : f32 to vector<8x128xf32>
    %31 = arith.addf %30, %29 : vector<8x128xf32>
    %32 = arith.divf %30, %31 : vector<8x128xf32>
    %33 = vector.extract_strided_slice %20 {offsets = [0, 256], sizes = [8, 128], strides = [1, 1]} : vector<8x512xf32> to vector<8x128xf32>
    %34 = math.tanh %33 : vector<8x128xf32>
    %35 = vector.extract_strided_slice %20 {offsets = [0, 384], sizes = [8, 128], strides = [1, 1]} : vector<8x512xf32> to vector<8x128xf32>
    %36 = arith.negf %35 : vector<8x128xf32>
    %37 = math.exp %36 : vector<8x128xf32>
    %cst_22 = arith.constant 1.000000e+00 : f32
    %38 = vector.broadcast %cst_22 : f32 to vector<8x128xf32>
    %39 = arith.addf %38, %37 : vector<8x128xf32>
    %40 = arith.divf %38, %39 : vector<8x128xf32>
    %41 = arith.mulf %32, %14 : vector<8x128xf32>
    %42 = arith.mulf %26, %34 : vector<8x128xf32>
    %43 = arith.addf %41, %42 : vector<8x128xf32>
    %44 = math.tanh %43 : vector<8x128xf32>
    %45 = arith.mulf %40, %44 : vector<8x128xf32>
    %c0_23 = arith.constant 0 : index
    %c0_24 = arith.constant 0 : index
    %46 = vector.load %arg10[%c0_23, %c0_24] : memref<8x128xf32, #tpu.memory_space<vmem>>, vector<8x128xf32>
    tpu.vector_store %arg10[%c0_23, %c0_24], %45 {strides = array<i32>} : memref<8x128xf32, #tpu.memory_space<vmem>>, vector<8x128xf32>,
    %c0_25 = arith.constant 0 : index
    %c0_26 = arith.constant 0 : index
    %47 = vector.load %arg12[%c0_25, %c0_26] : memref<8x128xf32, #tpu.memory_space<vmem>>, vector<8x128xf32>
    tpu.vector_store %arg12[%c0_25, %c0_26], %43 {strides = array<i32>} : memref<8x128xf32, #tpu.memory_space<vmem>>, vector<8x128xf32>,
    %cst_27 = arith.constant 0.000000e+00 : f32
    %48 = vector.broadcast %cst_27 : f32 to vector<8x128xf32>
    %49 = arith.maximumf %45, %48 : vector<8x128xf32>
    %50 = arith.truncf %49 : vector<8x128xf32> to vector<8x128xbf16>
    %51 = arith.index_cast %c0_i32_12 : i32 to index
    %c0_28 = arith.constant 0 : index
    %c0_29 = arith.constant 0 : index
    %52 = vector.load %arg16[%51, %c0_28, %c0_29] : memref<8x8x128xbf16, #tpu.memory_space<vmem>>, vector<1x8x128xbf16>
    %53 = vector.shape_cast %52 : vector<1x8x128xbf16> to vector<8x128xbf16>
    %54 = vector.shape_cast %50 : vector<8x128xbf16> to vector<1x8x128xbf16>
    tpu.vector_store %arg16[%51, %c0_28, %c0_29], %54 {strides = array<i32>} : memref<8x8x128xbf16, #tpu.memory_space<vmem>>, vector<1x8x128xbf16>,
    %c1_i32 = arith.constant 1 : i32
    %c0_30 = arith.constant 0 : index
    %c0_31 = arith.constant 0 : index
    %55 = vector.load %arg10[%c0_30, %c0_31] : memref<8x128xf32, #tpu.memory_space<vmem>>, vector<8x128xf32>
    %c0_32 = arith.constant 0 : index
    %c0_33 = arith.constant 0 : index
    %56 = vector.load %arg12[%c0_32, %c0_33] : memref<8x128xf32, #tpu.memory_space<vmem>>, vector<8x128xf32>
    %57 = arith.index_cast %c1_i32 : i32 to index
    %c0_34 = arith.constant 0 : index
    %c0_35 = arith.constant 0 : index
    %58 = vector.load %arg14[%57, %c0_34, %c0_35] : memref<8x8x512xf32, #tpu.memory_space<vmem>>, vector<1x8x512xf32>
    %59 = vector.shape_cast %58 : vector<1x8x512xf32> to vector<8x512xf32>
    %60 = arith.truncf %55 : vector<8x128xf32> to vector<8x128xbf16>
    %cst_36 = arith.constant dense<0.000000e+00> : vector<8x512xf32>
    %61 = tpu.matmul %60, %4, %cst_36 {dimension_numbers = #tpu.dot_dimension_numbers<[1], [0], [0], [1], [0, 0, 1, 1], [], []>} : vector<8x128xbf16>, vector<128x512xbf16>, vector<8x512xf32> -> vector<8x512xf32>
    %62 = arith.addf %59, %61 : vector<8x512xf32>
    %63 = vector.extract_strided_slice %62 {offsets = [0, 0], sizes = [8, 128], strides = [1, 1]} : vector<8x512xf32> to vector<8x128xf32>
    %64 = arith.negf %63 : vector<8x128xf32>
    %65 = math.exp %64 : vector<8x128xf32>
    %cst_37 = arith.constant 1.000000e+00 : f32
    %66 = vector.broadcast %cst_37 : f32 to vector<8x128xf32>
    %67 = arith.addf %66, %65 : vector<8x128xf32>
    %68 = arith.divf %66, %67 : vector<8x128xf32>
    %69 = vector.extract_strided_slice %62 {offsets = [0, 128], sizes = [8, 128], strides = [1, 1]} : vector<8x512xf32> to vector<8x128xf32>
    %70 = arith.negf %69 : vector<8x128xf32>
    %71 = math.exp %70 : vector<8x128xf32>
    %cst_38 = arith.constant 1.000000e+00 : f32
    %72 = vector.broadcast %cst_38 : f32 to vector<8x128xf32>
    %73 = arith.addf %72, %71 : vector<8x128xf32>
    %74 = arith.divf %72, %73 : vector<8x128xf32>
    %75 = vector.extract_strided_slice %62 {offsets = [0, 256], sizes = [8, 128], strides = [1, 1]} : vector<8x512xf32> to vector<8x128xf32>
    %76 = math.tanh %75 : vector<8x128xf32>
    %77 = vector.extract_strided_slice %62 {offsets = [0, 384], sizes = [8, 128], strides = [1, 1]} : vector<8x512xf32> to vector<8x128xf32>
    %78 = arith.negf %77 : vector<8x128xf32>
    %79 = math.exp %78 : vector<8x128xf32>
    %cst_39 = arith.constant 1.000000e+00 : f32
    %80 = vector.broadcast %cst_39 : f32 to vector<8x128xf32>
    %81 = arith.addf %80, %79 : vector<8x128xf32>
    %82 = arith.divf %80, %81 : vector<8x128xf32>
    %83 = arith.mulf %74, %56 : vector<8x128xf32>
    %84 = arith.mulf %68, %76 : vector<8x128xf32>
    %85 = arith.addf %83, %84 : vector<8x128xf32>
    %86 = math.tanh %85 : vector<8x128xf32>
    %87 = arith.mulf %82, %86 : vector<8x128xf32>
    %c0_40 = arith.constant 0 : index
    %c0_41 = arith.constant 0 : index
    %88 = vector.load %arg10[%c0_40, %c0_41] : memref<8x128xf32, #tpu.memory_space<vmem>>, vector<8x128xf32>
    tpu.vector_store %arg10[%c0_40, %c0_41], %87 {strides = array<i32>} : memref<8x128xf32, #tpu.memory_space<vmem>>, vector<8x128xf32>,
    %c0_42 = arith.constant 0 : index
    %c0_43 = arith.constant 0 : index
    %89 = vector.load %arg12[%c0_42, %c0_43] : memref<8x128xf32, #tpu.memory_space<vmem>>, vector<8x128xf32>
    tpu.vector_store %arg12[%c0_42, %c0_43], %85 {strides = array<i32>} : memref<8x128xf32, #tpu.memory_space<vmem>>, vector<8x128xf32>,
    %cst_44 = arith.constant 0.000000e+00 : f32
    %90 = vector.broadcast %cst_44 : f32 to vector<8x128xf32>
    %91 = arith.maximumf %87, %90 : vector<8x128xf32>
    %92 = arith.truncf %91 : vector<8x128xf32> to vector<8x128xbf16>
    %93 = arith.index_cast %c1_i32 : i32 to index
    %c0_45 = arith.constant 0 : index
    %c0_46 = arith.constant 0 : index
    %94 = vector.load %arg16[%93, %c0_45, %c0_46] : memref<8x8x128xbf16, #tpu.memory_space<vmem>>, vector<1x8x128xbf16>
    %95 = vector.shape_cast %94 : vector<1x8x128xbf16> to vector<8x128xbf16>
    %96 = vector.shape_cast %92 : vector<8x128xbf16> to vector<1x8x128xbf16>
    tpu.vector_store %arg16[%93, %c0_45, %c0_46], %96 {strides = array<i32>} : memref<8x8x128xbf16, #tpu.memory_space<vmem>>, vector<1x8x128xbf16>,
    %c2_i32 = arith.constant 2 : i32
    %c0_47 = arith.constant 0 : index
    %c0_48 = arith.constant 0 : index
    %97 = vector.load %arg10[%c0_47, %c0_48] : memref<8x128xf32, #tpu.memory_space<vmem>>, vector<8x128xf32>
    %c0_49 = arith.constant 0 : index
    %c0_50 = arith.constant 0 : index
    %98 = vector.load %arg12[%c0_49, %c0_50] : memref<8x128xf32, #tpu.memory_space<vmem>>, vector<8x128xf32>
    %99 = arith.index_cast %c2_i32 : i32 to index
    %c0_51 = arith.constant 0 : index
    %c0_52 = arith.constant 0 : index
    %100 = vector.load %arg14[%99, %c0_51, %c0_52] : memref<8x8x512xf32, #tpu.memory_space<vmem>>, vector<1x8x512xf32>
    %101 = vector.shape_cast %100 : vector<1x8x512xf32> to vector<8x512xf32>
    %102 = arith.truncf %97 : vector<8x128xf32> to vector<8x128xbf16>
    %cst_53 = arith.constant dense<0.000000e+00> : vector<8x512xf32>
    %103 = tpu.matmul %102, %4, %cst_53 {dimension_numbers = #tpu.dot_dimension_numbers<[1], [0], [0], [1], [0, 0, 1, 1], [], []>} : vector<8x128xbf16>, vector<128x512xbf16>, vector<8x512xf32> -> vector<8x512xf32>
    %104 = arith.addf %101, %103 : vector<8x512xf32>
    %105 = vector.extract_strided_slice %104 {offsets = [0, 0], sizes = [8, 128], strides = [1, 1]} : vector<8x512xf32> to vector<8x128xf32>
    %106 = arith.negf %105 : vector<8x128xf32>
    %107 = math.exp %106 : vector<8x128xf32>
    %cst_54 = arith.constant 1.000000e+00 : f32
    %108 = vector.broadcast %cst_54 : f32 to vector<8x128xf32>
    %109 = arith.addf %108, %107 : vector<8x128xf32>
    %110 = arith.divf %108, %109 : vector<8x128xf32>
    %111 = vector.extract_strided_slice %104 {offsets = [0, 128], sizes = [8, 128], strides = [1, 1]} : vector<8x512xf32> to vector<8x128xf32>
    %112 = arith.negf %111 : vector<8x128xf32>
    %113 = math.exp %112 : vector<8x128xf32>
    %cst_55 = arith.constant 1.000000e+00 : f32
    %114 = vector.broadcast %cst_55 : f32 to vector<8x128xf32>
    %115 = arith.addf %114, %113 : vector<8x128xf32>
    %116 = arith.divf %114, %115 : vector<8x128xf32>
    %117 = vector.extract_strided_slice %104 {offsets = [0, 256], sizes = [8, 128], strides = [1, 1]} : vector<8x512xf32> to vector<8x128xf32>
    %118 = math.tanh %117 : vector<8x128xf32>
    %119 = vector.extract_strided_slice %104 {offsets = [0, 384], sizes = [8, 128], strides = [1, 1]} : vector<8x512xf32> to vector<8x128xf32>
    %120 = arith.negf %119 : vector<8x128xf32>
    %121 = math.exp %120 : vector<8x128xf32>
    %cst_56 = arith.constant 1.000000e+00 : f32
    %122 = vector.broadcast %cst_56 : f32 to vector<8x128xf32>
    %123 = arith.addf %122, %121 : vector<8x128xf32>
    %124 = arith.divf %122, %123 : vector<8x128xf32>
    %125 = arith.mulf %116, %98 : vector<8x128xf32>
    %126 = arith.mulf %110, %118 : vector<8x128xf32>
    %127 = arith.addf %125, %126 : vector<8x128xf32>
    %128 = math.tanh %127 : vector<8x128xf32>
    %129 = arith.mulf %124, %128 : vector<8x128xf32>
    %c0_57 = arith.constant 0 : index
    %c0_58 = arith.constant 0 : index
    %130 = vector.load %arg10[%c0_57, %c0_58] : memref<8x128xf32, #tpu.memory_space<vmem>>, vector<8x128xf32>
    tpu.vector_store %arg10[%c0_57, %c0_58], %129 {strides = array<i32>} : memref<8x128xf32, #tpu.memory_space<vmem>>, vector<8x128xf32>,
    %c0_59 = arith.constant 0 : index
    %c0_60 = arith.constant 0 : index
    %131 = vector.load %arg12[%c0_59, %c0_60] : memref<8x128xf32, #tpu.memory_space<vmem>>, vector<8x128xf32>
    tpu.vector_store %arg12[%c0_59, %c0_60], %127 {strides = array<i32>} : memref<8x128xf32, #tpu.memory_space<vmem>>, vector<8x128xf32>,
    %cst_61 = arith.constant 0.000000e+00 : f32
    %132 = vector.broadcast %cst_61 : f32 to vector<8x128xf32>
    %133 = arith.maximumf %129, %132 : vector<8x128xf32>
    %134 = arith.truncf %133 : vector<8x128xf32> to vector<8x128xbf16>
    %135 = arith.index_cast %c2_i32 : i32 to index
    %c0_62 = arith.constant 0 : index
    %c0_63 = arith.constant 0 : index
    %136 = vector.load %arg16[%135, %c0_62, %c0_63] : memref<8x8x128xbf16, #tpu.memory_space<vmem>>, vector<1x8x128xbf16>
    %137 = vector.shape_cast %136 : vector<1x8x128xbf16> to vector<8x128xbf16>
    %138 = vector.shape_cast %134 : vector<8x128xbf16> to vector<1x8x128xbf16>
    tpu.vector_store %arg16[%135, %c0_62, %c0_63], %138 {strides = array<i32>} : memref<8x8x128xbf16, #tpu.memory_space<vmem>>, vector<1x8x128xbf16>,
    %c3_i32 = arith.constant 3 : i32
    %c0_64 = arith.constant 0 : index
    %c0_65 = arith.constant 0 : index
    %139 = vector.load %arg10[%c0_64, %c0_65] : memref<8x128xf32, #tpu.memory_space<vmem>>, vector<8x128xf32>
    %c0_66 = arith.constant 0 : index
    %c0_67 = arith.constant 0 : index
    %140 = vector.load %arg12[%c0_66, %c0_67] : memref<8x128xf32, #tpu.memory_space<vmem>>, vector<8x128xf32>
    %141 = arith.index_cast %c3_i32 : i32 to index
    %c0_68 = arith.constant 0 : index
    %c0_69 = arith.constant 0 : index
    %142 = vector.load %arg14[%141, %c0_68, %c0_69] : memref<8x8x512xf32, #tpu.memory_space<vmem>>, vector<1x8x512xf32>
    %143 = vector.shape_cast %142 : vector<1x8x512xf32> to vector<8x512xf32>
    %144 = arith.truncf %139 : vector<8x128xf32> to vector<8x128xbf16>
    %cst_70 = arith.constant dense<0.000000e+00> : vector<8x512xf32>
    %145 = tpu.matmul %144, %4, %cst_70 {dimension_numbers = #tpu.dot_dimension_numbers<[1], [0], [0], [1], [0, 0, 1, 1], [], []>} : vector<8x128xbf16>, vector<128x512xbf16>, vector<8x512xf32> -> vector<8x512xf32>
    %146 = arith.addf %143, %145 : vector<8x512xf32>
    %147 = vector.extract_strided_slice %146 {offsets = [0, 0], sizes = [8, 128], strides = [1, 1]} : vector<8x512xf32> to vector<8x128xf32>
    %148 = arith.negf %147 : vector<8x128xf32>
    %149 = math.exp %148 : vector<8x128xf32>
    %cst_71 = arith.constant 1.000000e+00 : f32
    %150 = vector.broadcast %cst_71 : f32 to vector<8x128xf32>
    %151 = arith.addf %150, %149 : vector<8x128xf32>
    %152 = arith.divf %150, %151 : vector<8x128xf32>
    %153 = vector.extract_strided_slice %146 {offsets = [0, 128], sizes = [8, 128], strides = [1, 1]} : vector<8x512xf32> to vector<8x128xf32>
    %154 = arith.negf %153 : vector<8x128xf32>
    %155 = math.exp %154 : vector<8x128xf32>
    %cst_72 = arith.constant 1.000000e+00 : f32
    %156 = vector.broadcast %cst_72 : f32 to vector<8x128xf32>
    %157 = arith.addf %156, %155 : vector<8x128xf32>
    %158 = arith.divf %156, %157 : vector<8x128xf32>
    %159 = vector.extract_strided_slice %146 {offsets = [0, 256], sizes = [8, 128], strides = [1, 1]} : vector<8x512xf32> to vector<8x128xf32>
    %160 = math.tanh %159 : vector<8x128xf32>
    %161 = vector.extract_strided_slice %146 {offsets = [0, 384], sizes = [8, 128], strides = [1, 1]} : vector<8x512xf32> to vector<8x128xf32>
    %162 = arith.negf %161 : vector<8x128xf32>
    %163 = math.exp %162 : vector<8x128xf32>
    %cst_73 = arith.constant 1.000000e+00 : f32
    %164 = vector.broadcast %cst_73 : f32 to vector<8x128xf32>
    %165 = arith.addf %164, %163 : vector<8x128xf32>
    %166 = arith.divf %164, %165 : vector<8x128xf32>
    %167 = arith.mulf %158, %140 : vector<8x128xf32>
    %168 = arith.mulf %152, %160 : vector<8x128xf32>
    %169 = arith.addf %167, %168 : vector<8x128xf32>
    %170 = math.tanh %169 : vector<8x128xf32>
    %171 = arith.mulf %166, %170 : vector<8x128xf32>
    %c0_74 = arith.constant 0 : index
    %c0_75 = arith.constant 0 : index
    %172 = vector.load %arg10[%c0_74, %c0_75] : memref<8x128xf32, #tpu.memory_space<vmem>>, vector<8x128xf32>
    tpu.vector_store %arg10[%c0_74, %c0_75], %171 {strides = array<i32>} : memref<8x128xf32, #tpu.memory_space<vmem>>, vector<8x128xf32>,
    %c0_76 = arith.constant 0 : index
    %c0_77 = arith.constant 0 : index
    %173 = vector.load %arg12[%c0_76, %c0_77] : memref<8x128xf32, #tpu.memory_space<vmem>>, vector<8x128xf32>
    tpu.vector_store %arg12[%c0_76, %c0_77], %169 {strides = array<i32>} : memref<8x128xf32, #tpu.memory_space<vmem>>, vector<8x128xf32>,
    %cst_78 = arith.constant 0.000000e+00 : f32
    %174 = vector.broadcast %cst_78 : f32 to vector<8x128xf32>
    %175 = arith.maximumf %171, %174 : vector<8x128xf32>
    %176 = arith.truncf %175 : vector<8x128xf32> to vector<8x128xbf16>
    %177 = arith.index_cast %c3_i32 : i32 to index
    %c0_79 = arith.constant 0 : index
    %c0_80 = arith.constant 0 : index
    %178 = vector.load %arg16[%177, %c0_79, %c0_80] : memref<8x8x128xbf16, #tpu.memory_space<vmem>>, vector<1x8x128xbf16>
    %179 = vector.shape_cast %178 : vector<1x8x128xbf16> to vector<8x128xbf16>
    %180 = vector.shape_cast %176 : vector<8x128xbf16> to vector<1x8x128xbf16>
    tpu.vector_store %arg16[%177, %c0_79, %c0_80], %180 {strides = array<i32>} : memref<8x8x128xbf16, #tpu.memory_space<vmem>>, vector<1x8x128xbf16>,
    %c4_i32 = arith.constant 4 : i32
    %c0_81 = arith.constant 0 : index
    %c0_82 = arith.constant 0 : index
    %181 = vector.load %arg10[%c0_81, %c0_82] : memref<8x128xf32, #tpu.memory_space<vmem>>, vector<8x128xf32>
    %c0_83 = arith.constant 0 : index
    %c0_84 = arith.constant 0 : index
    %182 = vector.load %arg12[%c0_83, %c0_84] : memref<8x128xf32, #tpu.memory_space<vmem>>, vector<8x128xf32>
    %183 = arith.index_cast %c4_i32 : i32 to index
    %c0_85 = arith.constant 0 : index
    %c0_86 = arith.constant 0 : index
    %184 = vector.load %arg14[%183, %c0_85, %c0_86] : memref<8x8x512xf32, #tpu.memory_space<vmem>>, vector<1x8x512xf32>
    %185 = vector.shape_cast %184 : vector<1x8x512xf32> to vector<8x512xf32>
    %186 = arith.truncf %181 : vector<8x128xf32> to vector<8x128xbf16>
    %cst_87 = arith.constant dense<0.000000e+00> : vector<8x512xf32>
    %187 = tpu.matmul %186, %4, %cst_87 {dimension_numbers = #tpu.dot_dimension_numbers<[1], [0], [0], [1], [0, 0, 1, 1], [], []>} : vector<8x128xbf16>, vector<128x512xbf16>, vector<8x512xf32> -> vector<8x512xf32>
    %188 = arith.addf %185, %187 : vector<8x512xf32>
    %189 = vector.extract_strided_slice %188 {offsets = [0, 0], sizes = [8, 128], strides = [1, 1]} : vector<8x512xf32> to vector<8x128xf32>
    %190 = arith.negf %189 : vector<8x128xf32>
    %191 = math.exp %190 : vector<8x128xf32>
    %cst_88 = arith.constant 1.000000e+00 : f32
    %192 = vector.broadcast %cst_88 : f32 to vector<8x128xf32>
    %193 = arith.addf %192, %191 : vector<8x128xf32>
    %194 = arith.divf %192, %193 : vector<8x128xf32>
    %195 = vector.extract_strided_slice %188 {offsets = [0, 128], sizes = [8, 128], strides = [1, 1]} : vector<8x512xf32> to vector<8x128xf32>
    %196 = arith.negf %195 : vector<8x128xf32>
    %197 = math.exp %196 : vector<8x128xf32>
    %cst_89 = arith.constant 1.000000e+00 : f32
    %198 = vector.broadcast %cst_89 : f32 to vector<8x128xf32>
    %199 = arith.addf %198, %197 : vector<8x128xf32>
    %200 = arith.divf %198, %199 : vector<8x128xf32>
    %201 = vector.extract_strided_slice %188 {offsets = [0, 256], sizes = [8, 128], strides = [1, 1]} : vector<8x512xf32> to vector<8x128xf32>
    %202 = math.tanh %201 : vector<8x128xf32>
    %203 = vector.extract_strided_slice %188 {offsets = [0, 384], sizes = [8, 128], strides = [1, 1]} : vector<8x512xf32> to vector<8x128xf32>
    %204 = arith.negf %203 : vector<8x128xf32>
    %205 = math.exp %204 : vector<8x128xf32>
    %cst_90 = arith.constant 1.000000e+00 : f32
    %206 = vector.broadcast %cst_90 : f32 to vector<8x128xf32>
    %207 = arith.addf %206, %205 : vector<8x128xf32>
    %208 = arith.divf %206, %207 : vector<8x128xf32>
    %209 = arith.mulf %200, %182 : vector<8x128xf32>
    %210 = arith.mulf %194, %202 : vector<8x128xf32>
    %211 = arith.addf %209, %210 : vector<8x128xf32>
    %212 = math.tanh %211 : vector<8x128xf32>
    %213 = arith.mulf %208, %212 : vector<8x128xf32>
    %c0_91 = arith.constant 0 : index
    %c0_92 = arith.constant 0 : index
    %214 = vector.load %arg10[%c0_91, %c0_92] : memref<8x128xf32, #tpu.memory_space<vmem>>, vector<8x128xf32>
    tpu.vector_store %arg10[%c0_91, %c0_92], %213 {strides = array<i32>} : memref<8x128xf32, #tpu.memory_space<vmem>>, vector<8x128xf32>,
    %c0_93 = arith.constant 0 : index
    %c0_94 = arith.constant 0 : index
    %215 = vector.load %arg12[%c0_93, %c0_94] : memref<8x128xf32, #tpu.memory_space<vmem>>, vector<8x128xf32>
    tpu.vector_store %arg12[%c0_93, %c0_94], %211 {strides = array<i32>} : memref<8x128xf32, #tpu.memory_space<vmem>>, vector<8x128xf32>,
    %cst_95 = arith.constant 0.000000e+00 : f32
    %216 = vector.broadcast %cst_95 : f32 to vector<8x128xf32>
    %217 = arith.maximumf %213, %216 : vector<8x128xf32>
    %218 = arith.truncf %217 : vector<8x128xf32> to vector<8x128xbf16>
    %219 = arith.index_cast %c4_i32 : i32 to index
    %c0_96 = arith.constant 0 : index
    %c0_97 = arith.constant 0 : index
    %220 = vector.load %arg16[%219, %c0_96, %c0_97] : memref<8x8x128xbf16, #tpu.memory_space<vmem>>, vector<1x8x128xbf16>
    %221 = vector.shape_cast %220 : vector<1x8x128xbf16> to vector<8x128xbf16>
    %222 = vector.shape_cast %218 : vector<8x128xbf16> to vector<1x8x128xbf16>
    tpu.vector_store %arg16[%219, %c0_96, %c0_97], %222 {strides = array<i32>} : memref<8x8x128xbf16, #tpu.memory_space<vmem>>, vector<1x8x128xbf16>,
    %c5_i32 = arith.constant 5 : i32
    %c0_98 = arith.constant 0 : index
    %c0_99 = arith.constant 0 : index
    %223 = vector.load %arg10[%c0_98, %c0_99] : memref<8x128xf32, #tpu.memory_space<vmem>>, vector<8x128xf32>
    %c0_100 = arith.constant 0 : index
    %c0_101 = arith.constant 0 : index
    %224 = vector.load %arg12[%c0_100, %c0_101] : memref<8x128xf32, #tpu.memory_space<vmem>>, vector<8x128xf32>
    %225 = arith.index_cast %c5_i32 : i32 to index
    %c0_102 = arith.constant 0 : index
    %c0_103 = arith.constant 0 : index
    %226 = vector.load %arg14[%225, %c0_102, %c0_103] : memref<8x8x512xf32, #tpu.memory_space<vmem>>, vector<1x8x512xf32>
    %227 = vector.shape_cast %226 : vector<1x8x512xf32> to vector<8x512xf32>
    %228 = arith.truncf %223 : vector<8x128xf32> to vector<8x128xbf16>
    %cst_104 = arith.constant dense<0.000000e+00> : vector<8x512xf32>
    %229 = tpu.matmul %228, %4, %cst_104 {dimension_numbers = #tpu.dot_dimension_numbers<[1], [0], [0], [1], [0, 0, 1, 1], [], []>} : vector<8x128xbf16>, vector<128x512xbf16>, vector<8x512xf32> -> vector<8x512xf32>
    %230 = arith.addf %227, %229 : vector<8x512xf32>
    %231 = vector.extract_strided_slice %230 {offsets = [0, 0], sizes = [8, 128], strides = [1, 1]} : vector<8x512xf32> to vector<8x128xf32>
    %232 = arith.negf %231 : vector<8x128xf32>
    %233 = math.exp %232 : vector<8x128xf32>
    %cst_105 = arith.constant 1.000000e+00 : f32
    %234 = vector.broadcast %cst_105 : f32 to vector<8x128xf32>
    %235 = arith.addf %234, %233 : vector<8x128xf32>
    %236 = arith.divf %234, %235 : vector<8x128xf32>
    %237 = vector.extract_strided_slice %230 {offsets = [0, 128], sizes = [8, 128], strides = [1, 1]} : vector<8x512xf32> to vector<8x128xf32>
    %238 = arith.negf %237 : vector<8x128xf32>
    %239 = math.exp %238 : vector<8x128xf32>
    %cst_106 = arith.constant 1.000000e+00 : f32
    %240 = vector.broadcast %cst_106 : f32 to vector<8x128xf32>
    %241 = arith.addf %240, %239 : vector<8x128xf32>
    %242 = arith.divf %240, %241 : vector<8x128xf32>
    %243 = vector.extract_strided_slice %230 {offsets = [0, 256], sizes = [8, 128], strides = [1, 1]} : vector<8x512xf32> to vector<8x128xf32>
    %244 = math.tanh %243 : vector<8x128xf32>
    %245 = vector.extract_strided_slice %230 {offsets = [0, 384], sizes = [8, 128], strides = [1, 1]} : vector<8x512xf32> to vector<8x128xf32>
    %246 = arith.negf %245 : vector<8x128xf32>
    %247 = math.exp %246 : vector<8x128xf32>
    %cst_107 = arith.constant 1.000000e+00 : f32
    %248 = vector.broadcast %cst_107 : f32 to vector<8x128xf32>
    %249 = arith.addf %248, %247 : vector<8x128xf32>
    %250 = arith.divf %248, %249 : vector<8x128xf32>
    %251 = arith.mulf %242, %224 : vector<8x128xf32>
    %252 = arith.mulf %236, %244 : vector<8x128xf32>
    %253 = arith.addf %251, %252 : vector<8x128xf32>
    %254 = math.tanh %253 : vector<8x128xf32>
    %255 = arith.mulf %250, %254 : vector<8x128xf32>
    %c0_108 = arith.constant 0 : index
    %c0_109 = arith.constant 0 : index
    %256 = vector.load %arg10[%c0_108, %c0_109] : memref<8x128xf32, #tpu.memory_space<vmem>>, vector<8x128xf32>
    tpu.vector_store %arg10[%c0_108, %c0_109], %255 {strides = array<i32>} : memref<8x128xf32, #tpu.memory_space<vmem>>, vector<8x128xf32>,
    %c0_110 = arith.constant 0 : index
    %c0_111 = arith.constant 0 : index
    %257 = vector.load %arg12[%c0_110, %c0_111] : memref<8x128xf32, #tpu.memory_space<vmem>>, vector<8x128xf32>
    tpu.vector_store %arg12[%c0_110, %c0_111], %253 {strides = array<i32>} : memref<8x128xf32, #tpu.memory_space<vmem>>, vector<8x128xf32>,
    %cst_112 = arith.constant 0.000000e+00 : f32
    %258 = vector.broadcast %cst_112 : f32 to vector<8x128xf32>
    %259 = arith.maximumf %255, %258 : vector<8x128xf32>
    %260 = arith.truncf %259 : vector<8x128xf32> to vector<8x128xbf16>
    %261 = arith.index_cast %c5_i32 : i32 to index
    %c0_113 = arith.constant 0 : index
    %c0_114 = arith.constant 0 : index
    %262 = vector.load %arg16[%261, %c0_113, %c0_114] : memref<8x8x128xbf16, #tpu.memory_space<vmem>>, vector<1x8x128xbf16>
    %263 = vector.shape_cast %262 : vector<1x8x128xbf16> to vector<8x128xbf16>
    %264 = vector.shape_cast %260 : vector<8x128xbf16> to vector<1x8x128xbf16>
    tpu.vector_store %arg16[%261, %c0_113, %c0_114], %264 {strides = array<i32>} : memref<8x8x128xbf16, #tpu.memory_space<vmem>>, vector<1x8x128xbf16>,
    %c6_i32 = arith.constant 6 : i32
    %c0_115 = arith.constant 0 : index
    %c0_116 = arith.constant 0 : index
    %265 = vector.load %arg10[%c0_115, %c0_116] : memref<8x128xf32, #tpu.memory_space<vmem>>, vector<8x128xf32>
    %c0_117 = arith.constant 0 : index
    %c0_118 = arith.constant 0 : index
    %266 = vector.load %arg12[%c0_117, %c0_118] : memref<8x128xf32, #tpu.memory_space<vmem>>, vector<8x128xf32>
    %267 = arith.index_cast %c6_i32 : i32 to index
    %c0_119 = arith.constant 0 : index
    %c0_120 = arith.constant 0 : index
    %268 = vector.load %arg14[%267, %c0_119, %c0_120] : memref<8x8x512xf32, #tpu.memory_space<vmem>>, vector<1x8x512xf32>
    %269 = vector.shape_cast %268 : vector<1x8x512xf32> to vector<8x512xf32>
    %270 = arith.truncf %265 : vector<8x128xf32> to vector<8x128xbf16>
    %cst_121 = arith.constant dense<0.000000e+00> : vector<8x512xf32>
    %271 = tpu.matmul %270, %4, %cst_121 {dimension_numbers = #tpu.dot_dimension_numbers<[1], [0], [0], [1], [0, 0, 1, 1], [], []>} : vector<8x128xbf16>, vector<128x512xbf16>, vector<8x512xf32> -> vector<8x512xf32>
    %272 = arith.addf %269, %271 : vector<8x512xf32>
    %273 = vector.extract_strided_slice %272 {offsets = [0, 0], sizes = [8, 128], strides = [1, 1]} : vector<8x512xf32> to vector<8x128xf32>
    %274 = arith.negf %273 : vector<8x128xf32>
    %275 = math.exp %274 : vector<8x128xf32>
    %cst_122 = arith.constant 1.000000e+00 : f32
    %276 = vector.broadcast %cst_122 : f32 to vector<8x128xf32>
    %277 = arith.addf %276, %275 : vector<8x128xf32>
    %278 = arith.divf %276, %277 : vector<8x128xf32>
    %279 = vector.extract_strided_slice %272 {offsets = [0, 128], sizes = [8, 128], strides = [1, 1]} : vector<8x512xf32> to vector<8x128xf32>
    %280 = arith.negf %279 : vector<8x128xf32>
    %281 = math.exp %280 : vector<8x128xf32>
    %cst_123 = arith.constant 1.000000e+00 : f32
    %282 = vector.broadcast %cst_123 : f32 to vector<8x128xf32>
    %283 = arith.addf %282, %281 : vector<8x128xf32>
    %284 = arith.divf %282, %283 : vector<8x128xf32>
    %285 = vector.extract_strided_slice %272 {offsets = [0, 256], sizes = [8, 128], strides = [1, 1]} : vector<8x512xf32> to vector<8x128xf32>
    %286 = math.tanh %285 : vector<8x128xf32>
    %287 = vector.extract_strided_slice %272 {offsets = [0, 384], sizes = [8, 128], strides = [1, 1]} : vector<8x512xf32> to vector<8x128xf32>
    %288 = arith.negf %287 : vector<8x128xf32>
    %289 = math.exp %288 : vector<8x128xf32>
    %cst_124 = arith.constant 1.000000e+00 : f32
    %290 = vector.broadcast %cst_124 : f32 to vector<8x128xf32>
    %291 = arith.addf %290, %289 : vector<8x128xf32>
    %292 = arith.divf %290, %291 : vector<8x128xf32>
    %293 = arith.mulf %284, %266 : vector<8x128xf32>
    %294 = arith.mulf %278, %286 : vector<8x128xf32>
    %295 = arith.addf %293, %294 : vector<8x128xf32>
    %296 = math.tanh %295 : vector<8x128xf32>
    %297 = arith.mulf %292, %296 : vector<8x128xf32>
    %c0_125 = arith.constant 0 : index
    %c0_126 = arith.constant 0 : index
    %298 = vector.load %arg10[%c0_125, %c0_126] : memref<8x128xf32, #tpu.memory_space<vmem>>, vector<8x128xf32>
    tpu.vector_store %arg10[%c0_125, %c0_126], %297 {strides = array<i32>} : memref<8x128xf32, #tpu.memory_space<vmem>>, vector<8x128xf32>,
    %c0_127 = arith.constant 0 : index
    %c0_128 = arith.constant 0 : index
    %299 = vector.load %arg12[%c0_127, %c0_128] : memref<8x128xf32, #tpu.memory_space<vmem>>, vector<8x128xf32>
    tpu.vector_store %arg12[%c0_127, %c0_128], %295 {strides = array<i32>} : memref<8x128xf32, #tpu.memory_space<vmem>>, vector<8x128xf32>,
    %cst_129 = arith.constant 0.000000e+00 : f32
    %300 = vector.broadcast %cst_129 : f32 to vector<8x128xf32>
    %301 = arith.maximumf %297, %300 : vector<8x128xf32>
    %302 = arith.truncf %301 : vector<8x128xf32> to vector<8x128xbf16>
    %303 = arith.index_cast %c6_i32 : i32 to index
    %c0_130 = arith.constant 0 : index
    %c0_131 = arith.constant 0 : index
    %304 = vector.load %arg16[%303, %c0_130, %c0_131] : memref<8x8x128xbf16, #tpu.memory_space<vmem>>, vector<1x8x128xbf16>
    %305 = vector.shape_cast %304 : vector<1x8x128xbf16> to vector<8x128xbf16>
    %306 = vector.shape_cast %302 : vector<8x128xbf16> to vector<1x8x128xbf16>
    tpu.vector_store %arg16[%303, %c0_130, %c0_131], %306 {strides = array<i32>} : memref<8x8x128xbf16, #tpu.memory_space<vmem>>, vector<1x8x128xbf16>,
    %c7_i32 = arith.constant 7 : i32
    %c0_132 = arith.constant 0 : index
    %c0_133 = arith.constant 0 : index
    %307 = vector.load %arg10[%c0_132, %c0_133] : memref<8x128xf32, #tpu.memory_space<vmem>>, vector<8x128xf32>
    %c0_134 = arith.constant 0 : index
    %c0_135 = arith.constant 0 : index
    %308 = vector.load %arg12[%c0_134, %c0_135] : memref<8x128xf32, #tpu.memory_space<vmem>>, vector<8x128xf32>
    %309 = arith.index_cast %c7_i32 : i32 to index
    %c0_136 = arith.constant 0 : index
    %c0_137 = arith.constant 0 : index
    %310 = vector.load %arg14[%309, %c0_136, %c0_137] : memref<8x8x512xf32, #tpu.memory_space<vmem>>, vector<1x8x512xf32>
    %311 = vector.shape_cast %310 : vector<1x8x512xf32> to vector<8x512xf32>
    %312 = arith.truncf %307 : vector<8x128xf32> to vector<8x128xbf16>
    %cst_138 = arith.constant dense<0.000000e+00> : vector<8x512xf32>
    %313 = tpu.matmul %312, %4, %cst_138 {dimension_numbers = #tpu.dot_dimension_numbers<[1], [0], [0], [1], [0, 0, 1, 1], [], []>} : vector<8x128xbf16>, vector<128x512xbf16>, vector<8x512xf32> -> vector<8x512xf32>
    %314 = arith.addf %311, %313 : vector<8x512xf32>
    %315 = vector.extract_strided_slice %314 {offsets = [0, 0], sizes = [8, 128], strides = [1, 1]} : vector<8x512xf32> to vector<8x128xf32>
    %316 = arith.negf %315 : vector<8x128xf32>
    %317 = math.exp %316 : vector<8x128xf32>
    %cst_139 = arith.constant 1.000000e+00 : f32
    %318 = vector.broadcast %cst_139 : f32 to vector<8x128xf32>
    %319 = arith.addf %318, %317 : vector<8x128xf32>
    %320 = arith.divf %318, %319 : vector<8x128xf32>
    %321 = vector.extract_strided_slice %314 {offsets = [0, 128], sizes = [8, 128], strides = [1, 1]} : vector<8x512xf32> to vector<8x128xf32>
    %322 = arith.negf %321 : vector<8x128xf32>
    %323 = math.exp %322 : vector<8x128xf32>
    %cst_140 = arith.constant 1.000000e+00 : f32
    %324 = vector.broadcast %cst_140 : f32 to vector<8x128xf32>
    %325 = arith.addf %324, %323 : vector<8x128xf32>
    %326 = arith.divf %324, %325 : vector<8x128xf32>
    %327 = vector.extract_strided_slice %314 {offsets = [0, 256], sizes = [8, 128], strides = [1, 1]} : vector<8x512xf32> to vector<8x128xf32>
    %328 = math.tanh %327 : vector<8x128xf32>
    %329 = vector.extract_strided_slice %314 {offsets = [0, 384], sizes = [8, 128], strides = [1, 1]} : vector<8x512xf32> to vector<8x128xf32>
    %330 = arith.negf %329 : vector<8x128xf32>
    %331 = math.exp %330 : vector<8x128xf32>
    %cst_141 = arith.constant 1.000000e+00 : f32
    %332 = vector.broadcast %cst_141 : f32 to vector<8x128xf32>
    %333 = arith.addf %332, %331 : vector<8x128xf32>
    %334 = arith.divf %332, %333 : vector<8x128xf32>
    %335 = arith.mulf %326, %308 : vector<8x128xf32>
    %336 = arith.mulf %320, %328 : vector<8x128xf32>
    %337 = arith.addf %335, %336 : vector<8x128xf32>
    %338 = math.tanh %337 : vector<8x128xf32>
    %339 = arith.mulf %334, %338 : vector<8x128xf32>
    %c0_142 = arith.constant 0 : index
    %c0_143 = arith.constant 0 : index
    %340 = vector.load %arg10[%c0_142, %c0_143] : memref<8x128xf32, #tpu.memory_space<vmem>>, vector<8x128xf32>
    tpu.vector_store %arg10[%c0_142, %c0_143], %339 {strides = array<i32>} : memref<8x128xf32, #tpu.memory_space<vmem>>, vector<8x128xf32>,
    %c0_144 = arith.constant 0 : index
    %c0_145 = arith.constant 0 : index
    %341 = vector.load %arg12[%c0_144, %c0_145] : memref<8x128xf32, #tpu.memory_space<vmem>>, vector<8x128xf32>
    tpu.vector_store %arg12[%c0_144, %c0_145], %337 {strides = array<i32>} : memref<8x128xf32, #tpu.memory_space<vmem>>, vector<8x128xf32>,
    %cst_146 = arith.constant 0.000000e+00 : f32
    %342 = vector.broadcast %cst_146 : f32 to vector<8x128xf32>
    %343 = arith.maximumf %339, %342 : vector<8x128xf32>
    %344 = arith.truncf %343 : vector<8x128xf32> to vector<8x128xbf16>
    %345 = arith.index_cast %c7_i32 : i32 to index
    %c0_147 = arith.constant 0 : index
    %c0_148 = arith.constant 0 : index
    %346 = vector.load %arg16[%345, %c0_147, %c0_148] : memref<8x8x128xbf16, #tpu.memory_space<vmem>>, vector<1x8x128xbf16>
    %347 = vector.shape_cast %346 : vector<1x8x128xbf16> to vector<8x128xbf16>
    %348 = vector.shape_cast %344 : vector<8x128xbf16> to vector<1x8x128xbf16>
    tpu.vector_store %arg16[%345, %c0_147, %c0_148], %348 {strides = array<i32>} : memref<8x8x128xbf16, #tpu.memory_space<vmem>>, vector<1x8x128xbf16>,
    %c8_i32 = arith.constant 8 : i32
    %c0_149 = arith.constant 0 : index
    %c0_150 = arith.constant 0 : index
    %349 = vector.load %arg6[%c0_149, %c0_150] : memref<128x512xbf16, #tpu.memory_space<vmem>>, vector<128x512xbf16>
    %c0_151 = arith.constant 0 : index
    %c0_152 = arith.constant 0 : index
    %350 = vector.load %arg7[%c0_151, %c0_152] : memref<128x512xbf16, #tpu.memory_space<vmem>>, vector<128x512xbf16>
    %c0_153 = arith.constant 0 : index
    %c0_154 = arith.constant 0 : index
    %351 = vector.load %arg8[%c0_153, %c0_154] : memref<1x512xf32, #tpu.memory_space<vmem>>, vector<1x512xf32>
    %c0_155 = arith.constant 0 : index
    %c0_156 = arith.constant 0 : index
    %c0_157 = arith.constant 0 : index
    %352 = vector.load %arg16[%c0_155, %c0_156, %c0_157] : memref<8x8x128xbf16, #tpu.memory_space<vmem>>, vector<8x8x128xbf16>
    %353 = vector.shape_cast %352 : vector<8x8x128xbf16> to vector<64x128xbf16>
    %cst_158 = arith.constant dense<0.000000e+00> : vector<64x512xf32>
    %354 = tpu.matmul %353, %349, %cst_158 {dimension_numbers = #tpu.dot_dimension_numbers<[1], [0], [0], [1], [0, 0, 1, 1], [], []>} : vector<64x128xbf16>, vector<128x512xbf16>, vector<64x512xf32> -> vector<64x512xf32>
    %355 = vector.broadcast %351 : vector<1x512xf32> to vector<64x512xf32>
    %356 = arith.addf %354, %355 : vector<64x512xf32>
    %357 = vector.shape_cast %356 : vector<64x512xf32> to vector<8x8x512xf32>
    %c0_159 = arith.constant 0 : index
    %c0_160 = arith.constant 0 : index
    %c0_161 = arith.constant 0 : index
    %358 = vector.load %arg15[%c0_159, %c0_160, %c0_161] : memref<8x8x512xf32, #tpu.memory_space<vmem>>, vector<8x8x512xf32>
    tpu.vector_store %arg15[%c0_159, %c0_160, %c0_161], %357 {strides = array<i32>} : memref<8x8x512xf32, #tpu.memory_space<vmem>>, vector<8x8x512xf32>,
    %c0_i32_162 = arith.constant 0 : i32
    %c0_163 = arith.constant 0 : index
    %c0_164 = arith.constant 0 : index
    %359 = vector.load %arg11[%c0_163, %c0_164] : memref<8x128xf32, #tpu.memory_space<vmem>>, vector<8x128xf32>
    %c0_165 = arith.constant 0 : index
    %c0_166 = arith.constant 0 : index
    %360 = vector.load %arg13[%c0_165, %c0_166] : memref<8x128xf32, #tpu.memory_space<vmem>>, vector<8x128xf32>
    %361 = arith.index_cast %c0_i32_162 : i32 to index
    %c0_167 = arith.constant 0 : index
    %c0_168 = arith.constant 0 : index
    %362 = vector.load %arg15[%361, %c0_167, %c0_168] : memref<8x8x512xf32, #tpu.memory_space<vmem>>, vector<1x8x512xf32>
    %363 = vector.shape_cast %362 : vector<1x8x512xf32> to vector<8x512xf32>
    %364 = arith.truncf %359 : vector<8x128xf32> to vector<8x128xbf16>
    %cst_169 = arith.constant dense<0.000000e+00> : vector<8x512xf32>
    %365 = tpu.matmul %364, %350, %cst_169 {dimension_numbers = #tpu.dot_dimension_numbers<[1], [0], [0], [1], [0, 0, 1, 1], [], []>} : vector<8x128xbf16>, vector<128x512xbf16>, vector<8x512xf32> -> vector<8x512xf32>
    %366 = arith.addf %363, %365 : vector<8x512xf32>
    %367 = vector.extract_strided_slice %366 {offsets = [0, 0], sizes = [8, 128], strides = [1, 1]} : vector<8x512xf32> to vector<8x128xf32>
    %368 = arith.negf %367 : vector<8x128xf32>
    %369 = math.exp %368 : vector<8x128xf32>
    %cst_170 = arith.constant 1.000000e+00 : f32
    %370 = vector.broadcast %cst_170 : f32 to vector<8x128xf32>
    %371 = arith.addf %370, %369 : vector<8x128xf32>
    %372 = arith.divf %370, %371 : vector<8x128xf32>
    %373 = vector.extract_strided_slice %366 {offsets = [0, 128], sizes = [8, 128], strides = [1, 1]} : vector<8x512xf32> to vector<8x128xf32>
    %374 = arith.negf %373 : vector<8x128xf32>
    %375 = math.exp %374 : vector<8x128xf32>
    %cst_171 = arith.constant 1.000000e+00 : f32
    %376 = vector.broadcast %cst_171 : f32 to vector<8x128xf32>
    %377 = arith.addf %376, %375 : vector<8x128xf32>
    %378 = arith.divf %376, %377 : vector<8x128xf32>
    %379 = vector.extract_strided_slice %366 {offsets = [0, 256], sizes = [8, 128], strides = [1, 1]} : vector<8x512xf32> to vector<8x128xf32>
    %380 = math.tanh %379 : vector<8x128xf32>
    %381 = vector.extract_strided_slice %366 {offsets = [0, 384], sizes = [8, 128], strides = [1, 1]} : vector<8x512xf32> to vector<8x128xf32>
    %382 = arith.negf %381 : vector<8x128xf32>
    %383 = math.exp %382 : vector<8x128xf32>
    %cst_172 = arith.constant 1.000000e+00 : f32
    %384 = vector.broadcast %cst_172 : f32 to vector<8x128xf32>
    %385 = arith.addf %384, %383 : vector<8x128xf32>
    %386 = arith.divf %384, %385 : vector<8x128xf32>
    %387 = arith.mulf %378, %360 : vector<8x128xf32>
    %388 = arith.mulf %372, %380 : vector<8x128xf32>
    %389 = arith.addf %387, %388 : vector<8x128xf32>
    %390 = math.tanh %389 : vector<8x128xf32>
    %391 = arith.mulf %386, %390 : vector<8x128xf32>
    %c0_173 = arith.constant 0 : index
    %c0_174 = arith.constant 0 : index
    %392 = vector.load %arg11[%c0_173, %c0_174] : memref<8x128xf32, #tpu.memory_space<vmem>>, vector<8x128xf32>
    tpu.vector_store %arg11[%c0_173, %c0_174], %391 {strides = array<i32>} : memref<8x128xf32, #tpu.memory_space<vmem>>, vector<8x128xf32>,
    %c0_175 = arith.constant 0 : index
    %c0_176 = arith.constant 0 : index
    %393 = vector.load %arg13[%c0_175, %c0_176] : memref<8x128xf32, #tpu.memory_space<vmem>>, vector<8x128xf32>
    tpu.vector_store %arg13[%c0_175, %c0_176], %389 {strides = array<i32>} : memref<8x128xf32, #tpu.memory_space<vmem>>, vector<8x128xf32>,
    %394 = arith.truncf %391 : vector<8x128xf32> to vector<8x128xbf16>
    %395 = arith.index_cast %c0_i32_162 : i32 to index
    %c0_177 = arith.constant 0 : index
    %c0_178 = arith.constant 0 : index
    %396 = vector.load %arg9[%395, %c0_177, %c0_178] : memref<8x8x128xbf16, #tpu.memory_space<vmem>>, vector<1x8x128xbf16>
    %397 = vector.shape_cast %396 : vector<1x8x128xbf16> to vector<8x128xbf16>
    %398 = vector.shape_cast %394 : vector<8x128xbf16> to vector<1x8x128xbf16>
    tpu.vector_store %arg9[%395, %c0_177, %c0_178], %398 {strides = array<i32>} : memref<8x8x128xbf16, #tpu.memory_space<vmem>>, vector<1x8x128xbf16>,
    %c1_i32_179 = arith.constant 1 : i32
    %c0_180 = arith.constant 0 : index
    %c0_181 = arith.constant 0 : index
    %399 = vector.load %arg11[%c0_180, %c0_181] : memref<8x128xf32, #tpu.memory_space<vmem>>, vector<8x128xf32>
    %c0_182 = arith.constant 0 : index
    %c0_183 = arith.constant 0 : index
    %400 = vector.load %arg13[%c0_182, %c0_183] : memref<8x128xf32, #tpu.memory_space<vmem>>, vector<8x128xf32>
    %401 = arith.index_cast %c1_i32_179 : i32 to index
    %c0_184 = arith.constant 0 : index
    %c0_185 = arith.constant 0 : index
    %402 = vector.load %arg15[%401, %c0_184, %c0_185] : memref<8x8x512xf32, #tpu.memory_space<vmem>>, vector<1x8x512xf32>
    %403 = vector.shape_cast %402 : vector<1x8x512xf32> to vector<8x512xf32>
    %404 = arith.truncf %399 : vector<8x128xf32> to vector<8x128xbf16>
    %cst_186 = arith.constant dense<0.000000e+00> : vector<8x512xf32>
    %405 = tpu.matmul %404, %350, %cst_186 {dimension_numbers = #tpu.dot_dimension_numbers<[1], [0], [0], [1], [0, 0, 1, 1], [], []>} : vector<8x128xbf16>, vector<128x512xbf16>, vector<8x512xf32> -> vector<8x512xf32>
    %406 = arith.addf %403, %405 : vector<8x512xf32>
    %407 = vector.extract_strided_slice %406 {offsets = [0, 0], sizes = [8, 128], strides = [1, 1]} : vector<8x512xf32> to vector<8x128xf32>
    %408 = arith.negf %407 : vector<8x128xf32>
    %409 = math.exp %408 : vector<8x128xf32>
    %cst_187 = arith.constant 1.000000e+00 : f32
    %410 = vector.broadcast %cst_187 : f32 to vector<8x128xf32>
    %411 = arith.addf %410, %409 : vector<8x128xf32>
    %412 = arith.divf %410, %411 : vector<8x128xf32>
    %413 = vector.extract_strided_slice %406 {offsets = [0, 128], sizes = [8, 128], strides = [1, 1]} : vector<8x512xf32> to vector<8x128xf32>
    %414 = arith.negf %413 : vector<8x128xf32>
    %415 = math.exp %414 : vector<8x128xf32>
    %cst_188 = arith.constant 1.000000e+00 : f32
    %416 = vector.broadcast %cst_188 : f32 to vector<8x128xf32>
    %417 = arith.addf %416, %415 : vector<8x128xf32>
    %418 = arith.divf %416, %417 : vector<8x128xf32>
    %419 = vector.extract_strided_slice %406 {offsets = [0, 256], sizes = [8, 128], strides = [1, 1]} : vector<8x512xf32> to vector<8x128xf32>
    %420 = math.tanh %419 : vector<8x128xf32>
    %421 = vector.extract_strided_slice %406 {offsets = [0, 384], sizes = [8, 128], strides = [1, 1]} : vector<8x512xf32> to vector<8x128xf32>
    %422 = arith.negf %421 : vector<8x128xf32>
    %423 = math.exp %422 : vector<8x128xf32>
    %cst_189 = arith.constant 1.000000e+00 : f32
    %424 = vector.broadcast %cst_189 : f32 to vector<8x128xf32>
    %425 = arith.addf %424, %423 : vector<8x128xf32>
    %426 = arith.divf %424, %425 : vector<8x128xf32>
    %427 = arith.mulf %418, %400 : vector<8x128xf32>
    %428 = arith.mulf %412, %420 : vector<8x128xf32>
    %429 = arith.addf %427, %428 : vector<8x128xf32>
    %430 = math.tanh %429 : vector<8x128xf32>
    %431 = arith.mulf %426, %430 : vector<8x128xf32>
    %c0_190 = arith.constant 0 : index
    %c0_191 = arith.constant 0 : index
    %432 = vector.load %arg11[%c0_190, %c0_191] : memref<8x128xf32, #tpu.memory_space<vmem>>, vector<8x128xf32>
    tpu.vector_store %arg11[%c0_190, %c0_191], %431 {strides = array<i32>} : memref<8x128xf32, #tpu.memory_space<vmem>>, vector<8x128xf32>,
    %c0_192 = arith.constant 0 : index
    %c0_193 = arith.constant 0 : index
    %433 = vector.load %arg13[%c0_192, %c0_193] : memref<8x128xf32, #tpu.memory_space<vmem>>, vector<8x128xf32>
    tpu.vector_store %arg13[%c0_192, %c0_193], %429 {strides = array<i32>} : memref<8x128xf32, #tpu.memory_space<vmem>>, vector<8x128xf32>,
    %434 = arith.truncf %431 : vector<8x128xf32> to vector<8x128xbf16>
    %435 = arith.index_cast %c1_i32_179 : i32 to index
    %c0_194 = arith.constant 0 : index
    %c0_195 = arith.constant 0 : index
    %436 = vector.load %arg9[%435, %c0_194, %c0_195] : memref<8x8x128xbf16, #tpu.memory_space<vmem>>, vector<1x8x128xbf16>
    %437 = vector.shape_cast %436 : vector<1x8x128xbf16> to vector<8x128xbf16>
    %438 = vector.shape_cast %434 : vector<8x128xbf16> to vector<1x8x128xbf16>
    tpu.vector_store %arg9[%435, %c0_194, %c0_195], %438 {strides = array<i32>} : memref<8x8x128xbf16, #tpu.memory_space<vmem>>, vector<1x8x128xbf16>,
    %c2_i32_196 = arith.constant 2 : i32
    %c0_197 = arith.constant 0 : index
    %c0_198 = arith.constant 0 : index
    %439 = vector.load %arg11[%c0_197, %c0_198] : memref<8x128xf32, #tpu.memory_space<vmem>>, vector<8x128xf32>
    %c0_199 = arith.constant 0 : index
    %c0_200 = arith.constant 0 : index
    %440 = vector.load %arg13[%c0_199, %c0_200] : memref<8x128xf32, #tpu.memory_space<vmem>>, vector<8x128xf32>
    %441 = arith.index_cast %c2_i32_196 : i32 to index
    %c0_201 = arith.constant 0 : index
    %c0_202 = arith.constant 0 : index
    %442 = vector.load %arg15[%441, %c0_201, %c0_202] : memref<8x8x512xf32, #tpu.memory_space<vmem>>, vector<1x8x512xf32>
    %443 = vector.shape_cast %442 : vector<1x8x512xf32> to vector<8x512xf32>
    %444 = arith.truncf %439 : vector<8x128xf32> to vector<8x128xbf16>
    %cst_203 = arith.constant dense<0.000000e+00> : vector<8x512xf32>
    %445 = tpu.matmul %444, %350, %cst_203 {dimension_numbers = #tpu.dot_dimension_numbers<[1], [0], [0], [1], [0, 0, 1, 1], [], []>} : vector<8x128xbf16>, vector<128x512xbf16>, vector<8x512xf32> -> vector<8x512xf32>
    %446 = arith.addf %443, %445 : vector<8x512xf32>
    %447 = vector.extract_strided_slice %446 {offsets = [0, 0], sizes = [8, 128], strides = [1, 1]} : vector<8x512xf32> to vector<8x128xf32>
    %448 = arith.negf %447 : vector<8x128xf32>
    %449 = math.exp %448 : vector<8x128xf32>
    %cst_204 = arith.constant 1.000000e+00 : f32
    %450 = vector.broadcast %cst_204 : f32 to vector<8x128xf32>
    %451 = arith.addf %450, %449 : vector<8x128xf32>
    %452 = arith.divf %450, %451 : vector<8x128xf32>
    %453 = vector.extract_strided_slice %446 {offsets = [0, 128], sizes = [8, 128], strides = [1, 1]} : vector<8x512xf32> to vector<8x128xf32>
    %454 = arith.negf %453 : vector<8x128xf32>
    %455 = math.exp %454 : vector<8x128xf32>
    %cst_205 = arith.constant 1.000000e+00 : f32
    %456 = vector.broadcast %cst_205 : f32 to vector<8x128xf32>
    %457 = arith.addf %456, %455 : vector<8x128xf32>
    %458 = arith.divf %456, %457 : vector<8x128xf32>
    %459 = vector.extract_strided_slice %446 {offsets = [0, 256], sizes = [8, 128], strides = [1, 1]} : vector<8x512xf32> to vector<8x128xf32>
    %460 = math.tanh %459 : vector<8x128xf32>
    %461 = vector.extract_strided_slice %446 {offsets = [0, 384], sizes = [8, 128], strides = [1, 1]} : vector<8x512xf32> to vector<8x128xf32>
    %462 = arith.negf %461 : vector<8x128xf32>
    %463 = math.exp %462 : vector<8x128xf32>
    %cst_206 = arith.constant 1.000000e+00 : f32
    %464 = vector.broadcast %cst_206 : f32 to vector<8x128xf32>
    %465 = arith.addf %464, %463 : vector<8x128xf32>
    %466 = arith.divf %464, %465 : vector<8x128xf32>
    %467 = arith.mulf %458, %440 : vector<8x128xf32>
    %468 = arith.mulf %452, %460 : vector<8x128xf32>
    %469 = arith.addf %467, %468 : vector<8x128xf32>
    %470 = math.tanh %469 : vector<8x128xf32>
    %471 = arith.mulf %466, %470 : vector<8x128xf32>
    %c0_207 = arith.constant 0 : index
    %c0_208 = arith.constant 0 : index
    %472 = vector.load %arg11[%c0_207, %c0_208] : memref<8x128xf32, #tpu.memory_space<vmem>>, vector<8x128xf32>
    tpu.vector_store %arg11[%c0_207, %c0_208], %471 {strides = array<i32>} : memref<8x128xf32, #tpu.memory_space<vmem>>, vector<8x128xf32>,
    %c0_209 = arith.constant 0 : index
    %c0_210 = arith.constant 0 : index
    %473 = vector.load %arg13[%c0_209, %c0_210] : memref<8x128xf32, #tpu.memory_space<vmem>>, vector<8x128xf32>
    tpu.vector_store %arg13[%c0_209, %c0_210], %469 {strides = array<i32>} : memref<8x128xf32, #tpu.memory_space<vmem>>, vector<8x128xf32>,
    %474 = arith.truncf %471 : vector<8x128xf32> to vector<8x128xbf16>
    %475 = arith.index_cast %c2_i32_196 : i32 to index
    %c0_211 = arith.constant 0 : index
    %c0_212 = arith.constant 0 : index
    %476 = vector.load %arg9[%475, %c0_211, %c0_212] : memref<8x8x128xbf16, #tpu.memory_space<vmem>>, vector<1x8x128xbf16>
    %477 = vector.shape_cast %476 : vector<1x8x128xbf16> to vector<8x128xbf16>
    %478 = vector.shape_cast %474 : vector<8x128xbf16> to vector<1x8x128xbf16>
    tpu.vector_store %arg9[%475, %c0_211, %c0_212], %478 {strides = array<i32>} : memref<8x8x128xbf16, #tpu.memory_space<vmem>>, vector<1x8x128xbf16>,
    %c3_i32_213 = arith.constant 3 : i32
    %c0_214 = arith.constant 0 : index
    %c0_215 = arith.constant 0 : index
    %479 = vector.load %arg11[%c0_214, %c0_215] : memref<8x128xf32, #tpu.memory_space<vmem>>, vector<8x128xf32>
    %c0_216 = arith.constant 0 : index
    %c0_217 = arith.constant 0 : index
    %480 = vector.load %arg13[%c0_216, %c0_217] : memref<8x128xf32, #tpu.memory_space<vmem>>, vector<8x128xf32>
    %481 = arith.index_cast %c3_i32_213 : i32 to index
    %c0_218 = arith.constant 0 : index
    %c0_219 = arith.constant 0 : index
    %482 = vector.load %arg15[%481, %c0_218, %c0_219] : memref<8x8x512xf32, #tpu.memory_space<vmem>>, vector<1x8x512xf32>
    %483 = vector.shape_cast %482 : vector<1x8x512xf32> to vector<8x512xf32>
    %484 = arith.truncf %479 : vector<8x128xf32> to vector<8x128xbf16>
    %cst_220 = arith.constant dense<0.000000e+00> : vector<8x512xf32>
    %485 = tpu.matmul %484, %350, %cst_220 {dimension_numbers = #tpu.dot_dimension_numbers<[1], [0], [0], [1], [0, 0, 1, 1], [], []>} : vector<8x128xbf16>, vector<128x512xbf16>, vector<8x512xf32> -> vector<8x512xf32>
    %486 = arith.addf %483, %485 : vector<8x512xf32>
    %487 = vector.extract_strided_slice %486 {offsets = [0, 0], sizes = [8, 128], strides = [1, 1]} : vector<8x512xf32> to vector<8x128xf32>
    %488 = arith.negf %487 : vector<8x128xf32>
    %489 = math.exp %488 : vector<8x128xf32>
    %cst_221 = arith.constant 1.000000e+00 : f32
    %490 = vector.broadcast %cst_221 : f32 to vector<8x128xf32>
    %491 = arith.addf %490, %489 : vector<8x128xf32>
    %492 = arith.divf %490, %491 : vector<8x128xf32>
    %493 = vector.extract_strided_slice %486 {offsets = [0, 128], sizes = [8, 128], strides = [1, 1]} : vector<8x512xf32> to vector<8x128xf32>
    %494 = arith.negf %493 : vector<8x128xf32>
    %495 = math.exp %494 : vector<8x128xf32>
    %cst_222 = arith.constant 1.000000e+00 : f32
    %496 = vector.broadcast %cst_222 : f32 to vector<8x128xf32>
    %497 = arith.addf %496, %495 : vector<8x128xf32>
    %498 = arith.divf %496, %497 : vector<8x128xf32>
    %499 = vector.extract_strided_slice %486 {offsets = [0, 256], sizes = [8, 128], strides = [1, 1]} : vector<8x512xf32> to vector<8x128xf32>
    %500 = math.tanh %499 : vector<8x128xf32>
    %501 = vector.extract_strided_slice %486 {offsets = [0, 384], sizes = [8, 128], strides = [1, 1]} : vector<8x512xf32> to vector<8x128xf32>
    %502 = arith.negf %501 : vector<8x128xf32>
    %503 = math.exp %502 : vector<8x128xf32>
    %cst_223 = arith.constant 1.000000e+00 : f32
    %504 = vector.broadcast %cst_223 : f32 to vector<8x128xf32>
    %505 = arith.addf %504, %503 : vector<8x128xf32>
    %506 = arith.divf %504, %505 : vector<8x128xf32>
    %507 = arith.mulf %498, %480 : vector<8x128xf32>
    %508 = arith.mulf %492, %500 : vector<8x128xf32>
    %509 = arith.addf %507, %508 : vector<8x128xf32>
    %510 = math.tanh %509 : vector<8x128xf32>
    %511 = arith.mulf %506, %510 : vector<8x128xf32>
    %c0_224 = arith.constant 0 : index
    %c0_225 = arith.constant 0 : index
    %512 = vector.load %arg11[%c0_224, %c0_225] : memref<8x128xf32, #tpu.memory_space<vmem>>, vector<8x128xf32>
    tpu.vector_store %arg11[%c0_224, %c0_225], %511 {strides = array<i32>} : memref<8x128xf32, #tpu.memory_space<vmem>>, vector<8x128xf32>,
    %c0_226 = arith.constant 0 : index
    %c0_227 = arith.constant 0 : index
    %513 = vector.load %arg13[%c0_226, %c0_227] : memref<8x128xf32, #tpu.memory_space<vmem>>, vector<8x128xf32>
    tpu.vector_store %arg13[%c0_226, %c0_227], %509 {strides = array<i32>} : memref<8x128xf32, #tpu.memory_space<vmem>>, vector<8x128xf32>,
    %514 = arith.truncf %511 : vector<8x128xf32> to vector<8x128xbf16>
    %515 = arith.index_cast %c3_i32_213 : i32 to index
    %c0_228 = arith.constant 0 : index
    %c0_229 = arith.constant 0 : index
    %516 = vector.load %arg9[%515, %c0_228, %c0_229] : memref<8x8x128xbf16, #tpu.memory_space<vmem>>, vector<1x8x128xbf16>
    %517 = vector.shape_cast %516 : vector<1x8x128xbf16> to vector<8x128xbf16>
    %518 = vector.shape_cast %514 : vector<8x128xbf16> to vector<1x8x128xbf16>
    tpu.vector_store %arg9[%515, %c0_228, %c0_229], %518 {strides = array<i32>} : memref<8x8x128xbf16, #tpu.memory_space<vmem>>, vector<1x8x128xbf16>,
    %c4_i32_230 = arith.constant 4 : i32
    %c0_231 = arith.constant 0 : index
    %c0_232 = arith.constant 0 : index
    %519 = vector.load %arg11[%c0_231, %c0_232] : memref<8x128xf32, #tpu.memory_space<vmem>>, vector<8x128xf32>
    %c0_233 = arith.constant 0 : index
    %c0_234 = arith.constant 0 : index
    %520 = vector.load %arg13[%c0_233, %c0_234] : memref<8x128xf32, #tpu.memory_space<vmem>>, vector<8x128xf32>
    %521 = arith.index_cast %c4_i32_230 : i32 to index
    %c0_235 = arith.constant 0 : index
    %c0_236 = arith.constant 0 : index
    %522 = vector.load %arg15[%521, %c0_235, %c0_236] : memref<8x8x512xf32, #tpu.memory_space<vmem>>, vector<1x8x512xf32>
    %523 = vector.shape_cast %522 : vector<1x8x512xf32> to vector<8x512xf32>
    %524 = arith.truncf %519 : vector<8x128xf32> to vector<8x128xbf16>
    %cst_237 = arith.constant dense<0.000000e+00> : vector<8x512xf32>
    %525 = tpu.matmul %524, %350, %cst_237 {dimension_numbers = #tpu.dot_dimension_numbers<[1], [0], [0], [1], [0, 0, 1, 1], [], []>} : vector<8x128xbf16>, vector<128x512xbf16>, vector<8x512xf32> -> vector<8x512xf32>
    %526 = arith.addf %523, %525 : vector<8x512xf32>
    %527 = vector.extract_strided_slice %526 {offsets = [0, 0], sizes = [8, 128], strides = [1, 1]} : vector<8x512xf32> to vector<8x128xf32>
    %528 = arith.negf %527 : vector<8x128xf32>
    %529 = math.exp %528 : vector<8x128xf32>
    %cst_238 = arith.constant 1.000000e+00 : f32
    %530 = vector.broadcast %cst_238 : f32 to vector<8x128xf32>
    %531 = arith.addf %530, %529 : vector<8x128xf32>
    %532 = arith.divf %530, %531 : vector<8x128xf32>
    %533 = vector.extract_strided_slice %526 {offsets = [0, 128], sizes = [8, 128], strides = [1, 1]} : vector<8x512xf32> to vector<8x128xf32>
    %534 = arith.negf %533 : vector<8x128xf32>
    %535 = math.exp %534 : vector<8x128xf32>
    %cst_239 = arith.constant 1.000000e+00 : f32
    %536 = vector.broadcast %cst_239 : f32 to vector<8x128xf32>
    %537 = arith.addf %536, %535 : vector<8x128xf32>
    %538 = arith.divf %536, %537 : vector<8x128xf32>
    %539 = vector.extract_strided_slice %526 {offsets = [0, 256], sizes = [8, 128], strides = [1, 1]} : vector<8x512xf32> to vector<8x128xf32>
    %540 = math.tanh %539 : vector<8x128xf32>
    %541 = vector.extract_strided_slice %526 {offsets = [0, 384], sizes = [8, 128], strides = [1, 1]} : vector<8x512xf32> to vector<8x128xf32>
    %542 = arith.negf %541 : vector<8x128xf32>
    %543 = math.exp %542 : vector<8x128xf32>
    %cst_240 = arith.constant 1.000000e+00 : f32
    %544 = vector.broadcast %cst_240 : f32 to vector<8x128xf32>
    %545 = arith.addf %544, %543 : vector<8x128xf32>
    %546 = arith.divf %544, %545 : vector<8x128xf32>
    %547 = arith.mulf %538, %520 : vector<8x128xf32>
    %548 = arith.mulf %532, %540 : vector<8x128xf32>
    %549 = arith.addf %547, %548 : vector<8x128xf32>
    %550 = math.tanh %549 : vector<8x128xf32>
    %551 = arith.mulf %546, %550 : vector<8x128xf32>
    %c0_241 = arith.constant 0 : index
    %c0_242 = arith.constant 0 : index
    %552 = vector.load %arg11[%c0_241, %c0_242] : memref<8x128xf32, #tpu.memory_space<vmem>>, vector<8x128xf32>
    tpu.vector_store %arg11[%c0_241, %c0_242], %551 {strides = array<i32>} : memref<8x128xf32, #tpu.memory_space<vmem>>, vector<8x128xf32>,
    %c0_243 = arith.constant 0 : index
    %c0_244 = arith.constant 0 : index
    %553 = vector.load %arg13[%c0_243, %c0_244] : memref<8x128xf32, #tpu.memory_space<vmem>>, vector<8x128xf32>
    tpu.vector_store %arg13[%c0_243, %c0_244], %549 {strides = array<i32>} : memref<8x128xf32, #tpu.memory_space<vmem>>, vector<8x128xf32>,
    %554 = arith.truncf %551 : vector<8x128xf32> to vector<8x128xbf16>
    %555 = arith.index_cast %c4_i32_230 : i32 to index
    %c0_245 = arith.constant 0 : index
    %c0_246 = arith.constant 0 : index
    %556 = vector.load %arg9[%555, %c0_245, %c0_246] : memref<8x8x128xbf16, #tpu.memory_space<vmem>>, vector<1x8x128xbf16>
    %557 = vector.shape_cast %556 : vector<1x8x128xbf16> to vector<8x128xbf16>
    %558 = vector.shape_cast %554 : vector<8x128xbf16> to vector<1x8x128xbf16>
    tpu.vector_store %arg9[%555, %c0_245, %c0_246], %558 {strides = array<i32>} : memref<8x8x128xbf16, #tpu.memory_space<vmem>>, vector<1x8x128xbf16>,
    %c5_i32_247 = arith.constant 5 : i32
    %c0_248 = arith.constant 0 : index
    %c0_249 = arith.constant 0 : index
    %559 = vector.load %arg11[%c0_248, %c0_249] : memref<8x128xf32, #tpu.memory_space<vmem>>, vector<8x128xf32>
    %c0_250 = arith.constant 0 : index
    %c0_251 = arith.constant 0 : index
    %560 = vector.load %arg13[%c0_250, %c0_251] : memref<8x128xf32, #tpu.memory_space<vmem>>, vector<8x128xf32>
    %561 = arith.index_cast %c5_i32_247 : i32 to index
    %c0_252 = arith.constant 0 : index
    %c0_253 = arith.constant 0 : index
    %562 = vector.load %arg15[%561, %c0_252, %c0_253] : memref<8x8x512xf32, #tpu.memory_space<vmem>>, vector<1x8x512xf32>
    %563 = vector.shape_cast %562 : vector<1x8x512xf32> to vector<8x512xf32>
    %564 = arith.truncf %559 : vector<8x128xf32> to vector<8x128xbf16>
    %cst_254 = arith.constant dense<0.000000e+00> : vector<8x512xf32>
    %565 = tpu.matmul %564, %350, %cst_254 {dimension_numbers = #tpu.dot_dimension_numbers<[1], [0], [0], [1], [0, 0, 1, 1], [], []>} : vector<8x128xbf16>, vector<128x512xbf16>, vector<8x512xf32> -> vector<8x512xf32>
    %566 = arith.addf %563, %565 : vector<8x512xf32>
    %567 = vector.extract_strided_slice %566 {offsets = [0, 0], sizes = [8, 128], strides = [1, 1]} : vector<8x512xf32> to vector<8x128xf32>
    %568 = arith.negf %567 : vector<8x128xf32>
    %569 = math.exp %568 : vector<8x128xf32>
    %cst_255 = arith.constant 1.000000e+00 : f32
    %570 = vector.broadcast %cst_255 : f32 to vector<8x128xf32>
    %571 = arith.addf %570, %569 : vector<8x128xf32>
    %572 = arith.divf %570, %571 : vector<8x128xf32>
    %573 = vector.extract_strided_slice %566 {offsets = [0, 128], sizes = [8, 128], strides = [1, 1]} : vector<8x512xf32> to vector<8x128xf32>
    %574 = arith.negf %573 : vector<8x128xf32>
    %575 = math.exp %574 : vector<8x128xf32>
    %cst_256 = arith.constant 1.000000e+00 : f32
    %576 = vector.broadcast %cst_256 : f32 to vector<8x128xf32>
    %577 = arith.addf %576, %575 : vector<8x128xf32>
    %578 = arith.divf %576, %577 : vector<8x128xf32>
    %579 = vector.extract_strided_slice %566 {offsets = [0, 256], sizes = [8, 128], strides = [1, 1]} : vector<8x512xf32> to vector<8x128xf32>
    %580 = math.tanh %579 : vector<8x128xf32>
    %581 = vector.extract_strided_slice %566 {offsets = [0, 384], sizes = [8, 128], strides = [1, 1]} : vector<8x512xf32> to vector<8x128xf32>
    %582 = arith.negf %581 : vector<8x128xf32>
    %583 = math.exp %582 : vector<8x128xf32>
    %cst_257 = arith.constant 1.000000e+00 : f32
    %584 = vector.broadcast %cst_257 : f32 to vector<8x128xf32>
    %585 = arith.addf %584, %583 : vector<8x128xf32>
    %586 = arith.divf %584, %585 : vector<8x128xf32>
    %587 = arith.mulf %578, %560 : vector<8x128xf32>
    %588 = arith.mulf %572, %580 : vector<8x128xf32>
    %589 = arith.addf %587, %588 : vector<8x128xf32>
    %590 = math.tanh %589 : vector<8x128xf32>
    %591 = arith.mulf %586, %590 : vector<8x128xf32>
    %c0_258 = arith.constant 0 : index
    %c0_259 = arith.constant 0 : index
    %592 = vector.load %arg11[%c0_258, %c0_259] : memref<8x128xf32, #tpu.memory_space<vmem>>, vector<8x128xf32>
    tpu.vector_store %arg11[%c0_258, %c0_259], %591 {strides = array<i32>} : memref<8x128xf32, #tpu.memory_space<vmem>>, vector<8x128xf32>,
    %c0_260 = arith.constant 0 : index
    %c0_261 = arith.constant 0 : index
    %593 = vector.load %arg13[%c0_260, %c0_261] : memref<8x128xf32, #tpu.memory_space<vmem>>, vector<8x128xf32>
    tpu.vector_store %arg13[%c0_260, %c0_261], %589 {strides = array<i32>} : memref<8x128xf32, #tpu.memory_space<vmem>>, vector<8x128xf32>,
    %594 = arith.truncf %591 : vector<8x128xf32> to vector<8x128xbf16>
    %595 = arith.index_cast %c5_i32_247 : i32 to index
    %c0_262 = arith.constant 0 : index
    %c0_263 = arith.constant 0 : index
    %596 = vector.load %arg9[%595, %c0_262, %c0_263] : memref<8x8x128xbf16, #tpu.memory_space<vmem>>, vector<1x8x128xbf16>
    %597 = vector.shape_cast %596 : vector<1x8x128xbf16> to vector<8x128xbf16>
    %598 = vector.shape_cast %594 : vector<8x128xbf16> to vector<1x8x128xbf16>
    tpu.vector_store %arg9[%595, %c0_262, %c0_263], %598 {strides = array<i32>} : memref<8x8x128xbf16, #tpu.memory_space<vmem>>, vector<1x8x128xbf16>,
    %c6_i32_264 = arith.constant 6 : i32
    %c0_265 = arith.constant 0 : index
    %c0_266 = arith.constant 0 : index
    %599 = vector.load %arg11[%c0_265, %c0_266] : memref<8x128xf32, #tpu.memory_space<vmem>>, vector<8x128xf32>
    %c0_267 = arith.constant 0 : index
    %c0_268 = arith.constant 0 : index
    %600 = vector.load %arg13[%c0_267, %c0_268] : memref<8x128xf32, #tpu.memory_space<vmem>>, vector<8x128xf32>
    %601 = arith.index_cast %c6_i32_264 : i32 to index
    %c0_269 = arith.constant 0 : index
    %c0_270 = arith.constant 0 : index
    %602 = vector.load %arg15[%601, %c0_269, %c0_270] : memref<8x8x512xf32, #tpu.memory_space<vmem>>, vector<1x8x512xf32>
    %603 = vector.shape_cast %602 : vector<1x8x512xf32> to vector<8x512xf32>
    %604 = arith.truncf %599 : vector<8x128xf32> to vector<8x128xbf16>
    %cst_271 = arith.constant dense<0.000000e+00> : vector<8x512xf32>
    %605 = tpu.matmul %604, %350, %cst_271 {dimension_numbers = #tpu.dot_dimension_numbers<[1], [0], [0], [1], [0, 0, 1, 1], [], []>} : vector<8x128xbf16>, vector<128x512xbf16>, vector<8x512xf32> -> vector<8x512xf32>
    %606 = arith.addf %603, %605 : vector<8x512xf32>
    %607 = vector.extract_strided_slice %606 {offsets = [0, 0], sizes = [8, 128], strides = [1, 1]} : vector<8x512xf32> to vector<8x128xf32>
    %608 = arith.negf %607 : vector<8x128xf32>
    %609 = math.exp %608 : vector<8x128xf32>
    %cst_272 = arith.constant 1.000000e+00 : f32
    %610 = vector.broadcast %cst_272 : f32 to vector<8x128xf32>
    %611 = arith.addf %610, %609 : vector<8x128xf32>
    %612 = arith.divf %610, %611 : vector<8x128xf32>
    %613 = vector.extract_strided_slice %606 {offsets = [0, 128], sizes = [8, 128], strides = [1, 1]} : vector<8x512xf32> to vector<8x128xf32>
    %614 = arith.negf %613 : vector<8x128xf32>
    %615 = math.exp %614 : vector<8x128xf32>
    %cst_273 = arith.constant 1.000000e+00 : f32
    %616 = vector.broadcast %cst_273 : f32 to vector<8x128xf32>
    %617 = arith.addf %616, %615 : vector<8x128xf32>
    %618 = arith.divf %616, %617 : vector<8x128xf32>
    %619 = vector.extract_strided_slice %606 {offsets = [0, 256], sizes = [8, 128], strides = [1, 1]} : vector<8x512xf32> to vector<8x128xf32>
    %620 = math.tanh %619 : vector<8x128xf32>
    %621 = vector.extract_strided_slice %606 {offsets = [0, 384], sizes = [8, 128], strides = [1, 1]} : vector<8x512xf32> to vector<8x128xf32>
    %622 = arith.negf %621 : vector<8x128xf32>
    %623 = math.exp %622 : vector<8x128xf32>
    %cst_274 = arith.constant 1.000000e+00 : f32
    %624 = vector.broadcast %cst_274 : f32 to vector<8x128xf32>
    %625 = arith.addf %624, %623 : vector<8x128xf32>
    %626 = arith.divf %624, %625 : vector<8x128xf32>
    %627 = arith.mulf %618, %600 : vector<8x128xf32>
    %628 = arith.mulf %612, %620 : vector<8x128xf32>
    %629 = arith.addf %627, %628 : vector<8x128xf32>
    %630 = math.tanh %629 : vector<8x128xf32>
    %631 = arith.mulf %626, %630 : vector<8x128xf32>
    %c0_275 = arith.constant 0 : index
    %c0_276 = arith.constant 0 : index
    %632 = vector.load %arg11[%c0_275, %c0_276] : memref<8x128xf32, #tpu.memory_space<vmem>>, vector<8x128xf32>
    tpu.vector_store %arg11[%c0_275, %c0_276], %631 {strides = array<i32>} : memref<8x128xf32, #tpu.memory_space<vmem>>, vector<8x128xf32>,
    %c0_277 = arith.constant 0 : index
    %c0_278 = arith.constant 0 : index
    %633 = vector.load %arg13[%c0_277, %c0_278] : memref<8x128xf32, #tpu.memory_space<vmem>>, vector<8x128xf32>
    tpu.vector_store %arg13[%c0_277, %c0_278], %629 {strides = array<i32>} : memref<8x128xf32, #tpu.memory_space<vmem>>, vector<8x128xf32>,
    %634 = arith.truncf %631 : vector<8x128xf32> to vector<8x128xbf16>
    %635 = arith.index_cast %c6_i32_264 : i32 to index
    %c0_279 = arith.constant 0 : index
    %c0_280 = arith.constant 0 : index
    %636 = vector.load %arg9[%635, %c0_279, %c0_280] : memref<8x8x128xbf16, #tpu.memory_space<vmem>>, vector<1x8x128xbf16>
    %637 = vector.shape_cast %636 : vector<1x8x128xbf16> to vector<8x128xbf16>
    %638 = vector.shape_cast %634 : vector<8x128xbf16> to vector<1x8x128xbf16>
    tpu.vector_store %arg9[%635, %c0_279, %c0_280], %638 {strides = array<i32>} : memref<8x8x128xbf16, #tpu.memory_space<vmem>>, vector<1x8x128xbf16>,
    %c7_i32_281 = arith.constant 7 : i32
    %c0_282 = arith.constant 0 : index
    %c0_283 = arith.constant 0 : index
    %639 = vector.load %arg11[%c0_282, %c0_283] : memref<8x128xf32, #tpu.memory_space<vmem>>, vector<8x128xf32>
    %c0_284 = arith.constant 0 : index
    %c0_285 = arith.constant 0 : index
    %640 = vector.load %arg13[%c0_284, %c0_285] : memref<8x128xf32, #tpu.memory_space<vmem>>, vector<8x128xf32>
    %641 = arith.index_cast %c7_i32_281 : i32 to index
    %c0_286 = arith.constant 0 : index
    %c0_287 = arith.constant 0 : index
    %642 = vector.load %arg15[%641, %c0_286, %c0_287] : memref<8x8x512xf32, #tpu.memory_space<vmem>>, vector<1x8x512xf32>
    %643 = vector.shape_cast %642 : vector<1x8x512xf32> to vector<8x512xf32>
    %644 = arith.truncf %639 : vector<8x128xf32> to vector<8x128xbf16>
    %cst_288 = arith.constant dense<0.000000e+00> : vector<8x512xf32>
    %645 = tpu.matmul %644, %350, %cst_288 {dimension_numbers = #tpu.dot_dimension_numbers<[1], [0], [0], [1], [0, 0, 1, 1], [], []>} : vector<8x128xbf16>, vector<128x512xbf16>, vector<8x512xf32> -> vector<8x512xf32>
    %646 = arith.addf %643, %645 : vector<8x512xf32>
    %647 = vector.extract_strided_slice %646 {offsets = [0, 0], sizes = [8, 128], strides = [1, 1]} : vector<8x512xf32> to vector<8x128xf32>
    %648 = arith.negf %647 : vector<8x128xf32>
    %649 = math.exp %648 : vector<8x128xf32>
    %cst_289 = arith.constant 1.000000e+00 : f32
    %650 = vector.broadcast %cst_289 : f32 to vector<8x128xf32>
    %651 = arith.addf %650, %649 : vector<8x128xf32>
    %652 = arith.divf %650, %651 : vector<8x128xf32>
    %653 = vector.extract_strided_slice %646 {offsets = [0, 128], sizes = [8, 128], strides = [1, 1]} : vector<8x512xf32> to vector<8x128xf32>
    %654 = arith.negf %653 : vector<8x128xf32>
    %655 = math.exp %654 : vector<8x128xf32>
    %cst_290 = arith.constant 1.000000e+00 : f32
    %656 = vector.broadcast %cst_290 : f32 to vector<8x128xf32>
    %657 = arith.addf %656, %655 : vector<8x128xf32>
    %658 = arith.divf %656, %657 : vector<8x128xf32>
    %659 = vector.extract_strided_slice %646 {offsets = [0, 256], sizes = [8, 128], strides = [1, 1]} : vector<8x512xf32> to vector<8x128xf32>
    %660 = math.tanh %659 : vector<8x128xf32>
    %661 = vector.extract_strided_slice %646 {offsets = [0, 384], sizes = [8, 128], strides = [1, 1]} : vector<8x512xf32> to vector<8x128xf32>
    %662 = arith.negf %661 : vector<8x128xf32>
    %663 = math.exp %662 : vector<8x128xf32>
    %cst_291 = arith.constant 1.000000e+00 : f32
    %664 = vector.broadcast %cst_291 : f32 to vector<8x128xf32>
    %665 = arith.addf %664, %663 : vector<8x128xf32>
    %666 = arith.divf %664, %665 : vector<8x128xf32>
    %667 = arith.mulf %658, %640 : vector<8x128xf32>
    %668 = arith.mulf %652, %660 : vector<8x128xf32>
    %669 = arith.addf %667, %668 : vector<8x128xf32>
    %670 = math.tanh %669 : vector<8x128xf32>
    %671 = arith.mulf %666, %670 : vector<8x128xf32>
    %c0_292 = arith.constant 0 : index
    %c0_293 = arith.constant 0 : index
    %672 = vector.load %arg11[%c0_292, %c0_293] : memref<8x128xf32, #tpu.memory_space<vmem>>, vector<8x128xf32>
    tpu.vector_store %arg11[%c0_292, %c0_293], %671 {strides = array<i32>} : memref<8x128xf32, #tpu.memory_space<vmem>>, vector<8x128xf32>,
    %c0_294 = arith.constant 0 : index
    %c0_295 = arith.constant 0 : index
    %673 = vector.load %arg13[%c0_294, %c0_295] : memref<8x128xf32, #tpu.memory_space<vmem>>, vector<8x128xf32>
    tpu.vector_store %arg13[%c0_294, %c0_295], %669 {strides = array<i32>} : memref<8x128xf32, #tpu.memory_space<vmem>>, vector<8x128xf32>,
    %674 = arith.truncf %671 : vector<8x128xf32> to vector<8x128xbf16>
    %675 = arith.index_cast %c7_i32_281 : i32 to index
    %c0_296 = arith.constant 0 : index
    %c0_297 = arith.constant 0 : index
    %676 = vector.load %arg9[%675, %c0_296, %c0_297] : memref<8x8x128xbf16, #tpu.memory_space<vmem>>, vector<1x8x128xbf16>
    %677 = vector.shape_cast %676 : vector<1x8x128xbf16> to vector<8x128xbf16>
    %678 = vector.shape_cast %674 : vector<8x128xbf16> to vector<1x8x128xbf16>
    tpu.vector_store %arg9[%675, %c0_296, %c0_297], %678 {strides = array<i32>} : memref<8x8x128xbf16, #tpu.memory_space<vmem>>, vector<1x8x128xbf16>,
    %c8_i32_298 = arith.constant 8 : i32
    return
  }
  func.func @transform_0(%arg0: i32, %arg1: i32) -> (i32, i32, i32) {
    %c0_i32 = arith.constant 0 : i32
    %c0_i32_0 = arith.constant 0 : i32
    return %arg1, %arg0, %c0_i32 : i32, i32, i32
  }
  func.func @transform_1(%arg0: i32, %arg1: i32) -> (i32, i32) {
    %c0_i32 = arith.constant 0 : i32
    %c0_i32_0 = arith.constant 0 : i32
    %c0_i32_1 = arith.constant 0 : i32
    return %c0_i32, %c0_i32_0 : i32, i32
  }
  func.func @transform_2(%arg0: i32, %arg1: i32) -> (i32, i32) {
    %c0_i32 = arith.constant 0 : i32
    %c0_i32_0 = arith.constant 0 : i32
    %c0_i32_1 = arith.constant 0 : i32
    return %c0_i32, %c0_i32_0 : i32, i32
  }
  func.func @transform_3(%arg0: i32, %arg1: i32) -> (i32, i32) {
    %c0_i32 = arith.constant 0 : i32
    %c0_i32_0 = arith.constant 0 : i32
    %c0_i32_1 = arith.constant 0 : i32
    return %c0_i32, %c0_i32_0 : i32, i32
  }
  func.func @transform_4(%arg0: i32, %arg1: i32) -> (i32, i32) {
    %c0_i32 = arith.constant 0 : i32
    %c0_i32_0 = arith.constant 0 : i32
    %c0_i32_1 = arith.constant 0 : i32
    return %c0_i32, %c0_i32_0 : i32, i32
  }
  func.func @transform_5(%arg0: i32, %arg1: i32) -> (i32, i32) {
    %c0_i32 = arith.constant 0 : i32
    %c0_i32_0 = arith.constant 0 : i32
    %c0_i32_1 = arith.constant 0 : i32
    return %c0_i32, %c0_i32_0 : i32, i32
  }
  func.func @transform_6(%arg0: i32, %arg1: i32) -> (i32, i32) {
    %c0_i32 = arith.constant 0 : i32
    %c0_i32_0 = arith.constant 0 : i32
    %c0_i32_1 = arith.constant 0 : i32
    return %c0_i32, %c0_i32_0 : i32, i32
  }
  func.func @transform_7(%arg0: i32, %arg1: i32) -> (i32, i32, i32) {
    %c0_i32 = arith.constant 0 : i32
    %c0_i32_0 = arith.constant 0 : i32
    return %arg1, %arg0, %c0_i32 : i32, i32, i32
  }
}

</mosaic_0001>

<bundles_post_ra>
// kernel: lstm_ae_forward.1
= control target key start
LH: loop header
LB: loop body
LE: loop exit
PB: predicated region body
PF: predicated region fallthrough
CT: control target
= control target key end

     0   :  { %12 = vsyncpa [#allocation10], 0  ;;  %s5348_s0 = inlined_call_operand.vmem [shape: bf16[8,8,128], index: 0, kind: input, shape index: {}]   ;;  %s5349_s1 = inlined_call_operand.hbm [shape: bf16[128,512], index: 1, kind: input, shape index: {}]   ;;  %s5350_s2 = inlined_call_operand.hbm [shape: bf16[128,512], index: 2, kind: input, shape index: {}]   ;;  %s5351_s3 = inlined_call_operand.vmem [shape: f32[1,512], index: 3, kind: input, shape index: {}]   ;;  %s5352_s4 = inlined_call_operand.hbm [shape: bf16[128,512], index: 4, kind: input, shape index: {}]   ;;  %s5353_s5 = inlined_call_operand.hbm [shape: bf16[128,512], index: 5, kind: input, shape index: {}]   ;;  %s5354_s6 = inlined_call_operand.vmem [shape: f32[1,512], index: 6, kind: input, shape index: {}]   ;;  %s5355_s7 = inlined_call_operand.vmem [shape: bf16[8,8,128], index: 7, kind: output, shape index: {}]  }
   0x1   :  { %13 = vsyncpa [#allocation12], 0 }
   0x2   :  { %14 = vsyncpa [#allocation15], 0  ;;  %s4106_s24 = smov [#allocation11]   ;;  %s4107_s26 = smov [#allocation9]  }
   0x3   :  { %s34_s25 = sshll.u32 %s4106_s24, 4  ;;  %s22_s27 = sshll.u32 %s4107_s26, 4  ;;  %s35_s25 = int_to_ptr.vmem [resolvable:$true] %s34_s25  ;;  %s23_s27 = int_to_ptr.vmem [resolvable:$true] %s22_s27 }
   0x4   :  { %s4028_s28 = scalar_lea.vmem %s35_s25, 4096  ;;  %p4033_p1 = scmp.lt.s32.totalorder %s35_s25, %s35_s25 }
   0x5   :  { %p4029_p0 = scmp.ne.s32.totalorder %s35_s25, %s4028_s28  ;;  %p4034_p2 = scmp.lt.s32.totalorder %s4028_s28, %s4028_s28 }
   0x7   :  { %p4035_p3 = por %p4034_p2, %p4033_p1 }
   0x9   :  { %p4036_p4 = pnand %p4035_p3, %p4029_p0 }
   0xb   :  { %4039 = shalt.err (!%p4036_p4)
}
   0xc   :  { %s4108_s29 = smov 256   ;;  %s4109_s30 = smov 16  }
   0xd   :  { %40 = dma.hbm_to_vmem [thread:$0]  %s5350_s2, 4096, %s35_s25, [#allocation12], %s4108_s29, %s4108_s29, %s4109_s30  }
   0xe   :  { %s4048_s10 = scalar_lea.vmem %s23_s27, 4096  ;;  %p4053_p6 = scmp.lt.s32.totalorder %s23_s27, %s23_s27 }
   0xf   :  { %p4049_p5 = scmp.ne.s32.totalorder %s23_s27, %s4048_s10  ;;  %p4054_p7 = scmp.lt.s32.totalorder %s4048_s10, %s4048_s10 }
  0x11   :  { %p4055_p8 = por %p4054_p7, %p4053_p6 }
  0x13   :  { %p4056_p9 = pnand %p4055_p8, %p4049_p5 }
  0x15   :  { %4059 = shalt.err (!%p4056_p9)
}
  0x16   :  { %28 = dma.hbm_to_vmem [thread:$0]  %s5349_s1, 4096, %s23_s27, [#allocation10], %s4108_s29, %s4108_s29, %s4109_s30  }
  0x17   :  { %s4110_s13 = smov [#allocation13]   ;;  %s4111_s15 = smov [#allocation14]  }
  0x18   :  { %s48_s14 = sshll.u32 %s4110_s13, 4  ;;  %s60_s16 = sshll.u32 %s4111_s15, 4  ;;  %s49_s14 = int_to_ptr.vmem [resolvable:$true] %s48_s14  ;;  %s61_s16 = int_to_ptr.vmem [resolvable:$true] %s60_s16 }
  0x19   :  { %s4068_s2 = scalar_lea.vmem %s49_s14, 4096  ;;  %p4073_p11 = scmp.lt.s32.totalorder %s49_s14, %s49_s14 }
  0x1a   :  { %p4069_p10 = scmp.ne.s32.totalorder %s49_s14, %s4068_s2  ;;  %p4074_p12 = scmp.lt.s32.totalorder %s4068_s2, %s4068_s2 }
  0x1c   :  { %p4075_p13 = por %p4074_p12, %p4073_p11 }
  0x1e   :  { %p4076_p0 = pnand %p4075_p13, %p4069_p10 }
  0x20   :  { %4079 = shalt.err (!%p4076_p0)
}
  0x21   :  { %54 = dma.hbm_to_vmem [thread:$0]  %s5352_s4, 4096, %s49_s14, [#allocation12], %s4108_s29, %s4108_s29, %s4109_s30  }
  0x22   :  { %s4088_s1 = scalar_lea.vmem %s61_s16, 4096  ;;  %p4093_p2 = scmp.lt.s32.totalorder %s61_s16, %s61_s16 }
  0x23   :  { %p4089_p1 = scmp.ne.s32.totalorder %s61_s16, %s4088_s1  ;;  %p4094_p3 = scmp.lt.s32.totalorder %s4088_s1, %s4088_s1 }
  0x25   :  { %p4095_p4 = por %p4094_p3, %p4093_p2 }
  0x27   :  { %p4096_p5 = pnand %p4095_p4, %p4089_p1 }
  0x29   :  { %4099 = shalt.err (!%p4096_p5)
}
  0x2a   :  { %66 = dma.hbm_to_vmem [thread:$0]  %s5353_s5, 4096, %s61_s16, [#allocation15], %s4108_s29, %s4108_s29, %s4109_s30  }
  0x2b   :  { %4100 = dma.done.wait [#allocation10], 4096  }
  0x2c   :  { %4101 = vsyncadd [#allocation10], 4294963200 }
  0x2d   :  { %4102 = dma.done.wait [#allocation12], 8192  }
  0x2e   :  { %4103 = vsyncadd [#allocation12], 4294959104 }
  0x2f   :  { %4104 = dma.done.wait [#allocation15], 4096  }
  0x30   :  { %4105 = vsyncadd [#allocation15], 4294963200  ;;  %v5362_v0 = vmov 0   ;;  %v3500_v1 = vld [vmem:[#allocation9 + $0xe4] ss:$16 sps:$4 sm:$0xff]   ;;  %v3561_v44 = vld [vmem:[%s5348_s0 + $0x8] sm:$0xff]  }
  0x31   :  { %400 = vmatprep.mubr.bf16.mxu0 %v5362_v0  ;;  %473 = vmatprep.mubr.bf16.mxu1 %v5362_v0  ;;  %v3502_v2 = vld [vmem:[#allocation9 + $0xec] ss:$16 sps:$4 sm:$0xff]   ;;  %v3504_v3 = vld [vmem:[#allocation9 + $0xe0] ss:$16 sps:$4 sm:$0xff]   ;;  %v3505_v4 = vld [vmem:[#allocation9 + $0xe8] ss:$16 sps:$4 sm:$0xff]  }
  0x32   :  { %368 = vmatprep.subr.bf16.mxu0 %v3500_v1  ;;  %441 = vmatprep.subr.bf16.mxu1 %v3502_v2  ;;  %v3506_v5 = vld [vmem:[#allocation9 + $0xc4] ss:$16 sps:$4 sm:$0xff]   ;;  %v3508_v6 = vld [vmem:[#allocation9 + $0xcc] ss:$16 sps:$4 sm:$0xff]   ;;  %v3510_v7 = vld [vmem:[#allocation9 + $0xc0] ss:$16 sps:$4 sm:$0xff]  }
  0x33   :  { %369 = vmatpush1.bf16.msra.mxu0 %v3504_v3  ;;  %442 = vmatpush1.bf16.msra.mxu1 %v3505_v4  ;;  %v3511_v8 = vld [vmem:[#allocation9 + $0xc8] ss:$16 sps:$4 sm:$0xff]   ;;  %v3512_v9 = vld [vmem:[#allocation9 + $0xa4] ss:$16 sps:$4 sm:$0xff]   ;;  %v3514_v10 = vld [vmem:[#allocation9 + $0xac] ss:$16 sps:$4 sm:$0xff]  }
  0x34   :  { %370 = vmatprep.subr.bf16.mxu0 %v3506_v5  ;;  %443 = vmatprep.subr.bf16.mxu1 %v3508_v6  ;;  %v3516_v11 = vld [vmem:[#allocation9 + $0xa0] ss:$16 sps:$4 sm:$0xff]   ;;  %v3517_v12 = vld [vmem:[#allocation9 + $0xa8] ss:$16 sps:$4 sm:$0xff]   ;;  %v3518_v13 = vld [vmem:[#allocation9 + $0x84] ss:$16 sps:$4 sm:$0xff]  }
  0x35   :  { %v3520_v14 = vld [vmem:[#allocation9 + $0x8c] ss:$16 sps:$4 sm:$0xff]   ;;  %v3522_v15 = vld [vmem:[#allocation9 + $0x80] ss:$16 sps:$4 sm:$0xff]   ;;  %v3523_v16 = vld [vmem:[#allocation9 + $0x88] ss:$16 sps:$4 sm:$0xff]  }
  0x36   :  { %v3524_v17 = vld [vmem:[#allocation9 + $0x64] ss:$16 sps:$4 sm:$0xff]   ;;  %v3526_v18 = vld [vmem:[#allocation9 + $0x6c] ss:$16 sps:$4 sm:$0xff]   ;;  %v3528_v19 = vld [vmem:[#allocation9 + $0x60] ss:$16 sps:$4 sm:$0xff]  }
  0x37   :  { %371 = vmatpush1.bf16.msra.mxu0 %v3510_v7  ;;  %444 = vmatpush1.bf16.msra.mxu1 %v3511_v8  ;;  %v3529_v20 = vld [vmem:[#allocation9 + $0x68] ss:$16 sps:$4 sm:$0xff]   ;;  %v3530_v21 = vld [vmem:[#allocation9 + $0x44] ss:$16 sps:$4 sm:$0xff]   ;;  %v3532_v22 = vld [vmem:[#allocation9 + $0x4c] ss:$16 sps:$4 sm:$0xff]   ;;  %v164_v7 = vlaneseq }
  0x38   :  { %372 = vmatprep.subr.bf16.mxu0 %v3512_v9  ;;  %445 = vmatprep.subr.bf16.mxu1 %v3514_v10  ;;  %v3534_v23 = vld [vmem:[#allocation9 + $0x40] ss:$16 sps:$4 sm:$0xff]   ;;  %v3535_v24 = vld [vmem:[#allocation9 + $0x48] ss:$16 sps:$4 sm:$0xff]   ;;  %v3536_v25 = vld [vmem:[#allocation9 + $0x24] ss:$16 sps:$4 sm:$0xff]  }
  0x39   :  { %v3538_v26 = vld [vmem:[#allocation9 + $0x2c] ss:$16 sps:$4 sm:$0xff]   ;;  %v3540_v27 = vld [vmem:[#allocation9 + $0x20] ss:$16 sps:$4 sm:$0xff]   ;;  %v3541_v28 = vld [vmem:[#allocation9 + $0x28] ss:$16 sps:$4 sm:$0xff]  }
  0x3a   :  { %v3542_v29 = vld [vmem:[#allocation9 + $0x4] ss:$16 sps:$4 sm:$0xff]   ;;  %v3544_v30 = vld [vmem:[#allocation9 + $0xc] ss:$16 sps:$4 sm:$0xff]   ;;  %v3546_v31 = vld [vmem:[#allocation9] ss:$16 sps:$4 sm:$0xff]  }
  0x3b   :  { %373 = vmatpush1.bf16.msra.mxu0 %v3516_v11  ;;  %446 = vmatpush1.bf16.msra.mxu1 %v3517_v12  ;;  %v3547_v32 = vld [vmem:[#allocation9 + $0x8] ss:$16 sps:$4 sm:$0xff]   ;;  %v4180_v33 = vld [vmem:[#allocation11 + $0xe4] ss:$16 sps:$4 sm:$0xff]   ;;  %v4182_v34 = vld [vmem:[#allocation11 + $0xec] ss:$16 sps:$4 sm:$0xff]  }
  0x3c   :  { %374 = vmatprep.subr.bf16.mxu0 %v3518_v13  ;;  %447 = vmatprep.subr.bf16.mxu1 %v3520_v14  ;;  %v3548_v35 = vld [vmem:[%s5348_s0] sm:$0xff]   ;;  %v4189_v37 = vld [vmem:[#allocation11 + $0xe8] ss:$16 sps:$4 sm:$0xff]   ;;  %v4195_v39 = vld [vmem:[#allocation11 + $0xcc] ss:$16 sps:$4 sm:$0xff]   ;;  %v5360_v6 = vmov 0.0|0.0  }
  0x3d   :  { %v4187_v36 = vld [vmem:[#allocation11 + $0xe0] ss:$16 sps:$4 sm:$0xff]   ;;  %v4193_v38 = vld [vmem:[#allocation11 + $0xc4] ss:$16 sps:$4 sm:$0xff]   ;;  %v4201_v41 = vld [vmem:[#allocation11 + $0xc8] ss:$16 sps:$4 sm:$0xff]  }
  0x3e   :  { %v4197_v40 = vld [vmem:[#allocation11 + $0xc0] ss:$16 sps:$4 sm:$0xff]   ;;  %v4205_v42 = vld [vmem:[#allocation11 + $0xa4] ss:$16 sps:$4 sm:$0xff]   ;;  %v4207_v43 = vld [vmem:[#allocation11 + $0xac] ss:$16 sps:$4 sm:$0xff]  }
  0x3f   :  { %375 = vmatpush1.bf16.msra.mxu0 %v3522_v15  ;;  %448 = vmatpush1.bf16.msra.mxu1 %v3523_v16  ;;  %v4214_v45 = vld [vmem:[#allocation11 + $0xa0] ss:$16 sps:$4 sm:$0xff]   ;;  %v4216_v46 = vld [vmem:[#allocation11 + $0xa8] ss:$16 sps:$4 sm:$0xff]   ;;  %v4220_v47 = vld [vmem:[#allocation11 + $0x84] ss:$16 sps:$4 sm:$0xff]  }
  0x40   :  { %376 = vmatprep.subr.bf16.mxu0 %v3524_v17  ;;  %449 = vmatprep.subr.bf16.mxu1 %v3526_v18  ;;  %v4224_v48 = vld [vmem:[#allocation11 + $0x8c] ss:$16 sps:$4 sm:$0xff]   ;;  %v4226_v49 = vld [vmem:[#allocation11 + $0x80] ss:$16 sps:$4 sm:$0xff]   ;;  %v4228_v50 = vld [vmem:[#allocation11 + $0x88] ss:$16 sps:$4 sm:$0xff]  }
  0x41   :  { %v4232_v51 = vld [vmem:[#allocation11 + $0x64] ss:$16 sps:$4 sm:$0xff]   ;;  %v4236_v52 = vld [vmem:[#allocation11 + $0x6c] ss:$16 sps:$4 sm:$0xff]   ;;  %v4243_v54 = vld [vmem:[#allocation11 + $0x60] ss:$16 sps:$4 sm:$0xff]  }
  0x42   :  { %v3574_v53 = vld [vmem:[%s5348_s0 + $0x10] sm:$0xff]   ;;  %v4245_v55 = vld [vmem:[#allocation11 + $0x68] ss:$16 sps:$4 sm:$0xff]   ;;  %v4249_v57 = vld [vmem:[#allocation11 + $0x4c] ss:$16 sps:$4 sm:$0xff]   ;;  %v4334_v8 = vshrl.u32 %v164_v7, 7 }
  0x43   :  { %377 = vmatpush1.bf16.msra.mxu0 %v3528_v19  ;;  %450 = vmatpush1.bf16.msra.mxu1 %v3529_v20  ;;  %v4247_v56 = vld [vmem:[#allocation11 + $0x44] ss:$16 sps:$4 sm:$0xff]   ;;  %v4255_v58 = vld [vmem:[#allocation11 + $0x40] ss:$16 sps:$4 sm:$0xff]   ;;  %v4257_v59 = vld [vmem:[#allocation11 + $0x48] ss:$16 sps:$4 sm:$0xff]  }
  0x44   :  { %378 = vmatprep.subr.bf16.mxu0 %v3530_v21  ;;  %451 = vmatprep.subr.bf16.mxu1 %v3532_v22  ;;  %v4259_v60 = vld [vmem:[#allocation11 + $0x24] ss:$16 sps:$4 sm:$0xff]   ;;  %v4261_v61 = vld [vmem:[#allocation11 + $0x2c] ss:$16 sps:$4 sm:$0xff]   ;;  %v4272_v63 = vld [vmem:[#allocation11 + $0x20] ss:$16 sps:$4 sm:$0xff]  }
  0x45   :  { %v3587_v62 = vld [vmem:[%s5348_s0 + $0x18] sm:$0xff]   ;;  %v4276_v2 = vld [vmem:[#allocation11 + $0x4] ss:$16 sps:$4 sm:$0xff]   ;;  %v4284_v4 = vld [vmem:[#allocation11] ss:$16 sps:$4 sm:$0xff]   ;;  %5366 = vst [vmem:[#allocation19_spill] sm:$0xff] %v4334_v8 }
  0x46   :  { %v4274_v1 = vld [vmem:[#allocation11 + $0x28] ss:$16 sps:$4 sm:$0xff]   ;;  %v4278_v3 = vld [vmem:[#allocation11 + $0xc] ss:$16 sps:$4 sm:$0xff]   ;;  %v5356_v9 = vsub.s32 2, %v4334_v8  ;;  %v5359_v10 = vsub.s32 0, %v4334_v8 }
  0x47   :  { %379 = vmatpush1.bf16.msra.mxu0 %v3534_v23  ;;  %452 = vmatpush1.bf16.msra.mxu1 %v3535_v24  ;;  %v4286_v5 = vld [vmem:[#allocation11 + $0x8] ss:$16 sps:$4 sm:$0xff]   ;;  %v5357_v11 = vsub.s32 3, %v4334_v8  ;;  %v154_v12 = vld [vmem:[%s5351_s3] sm:$0xf]  ;;  %v5358_v16 = vsub.s32 1, %v4334_v8 }
  0x48   :  { %380 = vmatprep.subr.bf16.mxu0 %v3536_v25  ;;  %453 = vmatprep.subr.bf16.mxu1 %v3538_v26  ;;  %v4348_v15 = vrot.slane %v154_v12, %v5356_v9  ;;  %v167_v19 = vrot.slane %v154_v12, %v5359_v10 }
  0x49   :  { %v4359_v20 = vrot.slane %v154_v12, %v5357_v11  ;;  %v171_v23 = vrot.slane %v154_v12, %v5358_v16 }
  0x4b   :  { %381 = vmatpush1.bf16.msra.mxu0 %v3540_v27  ;;  %454 = vmatpush1.bf16.msra.mxu1 %v3541_v28 }
  0x4c   :  { %382 = vmatprep.subr.bf16.mxu0 %v3542_v29  ;;  %455 = vmatprep.subr.bf16.mxu1 %v3544_v30 }
  0x4f   :  { %383 = vmatpush1.bf16.msra.mxu0 %v3546_v31  ;;  %456 = vmatpush1.bf16.msra.mxu1 %v3547_v32 }
  0x50   :  { %713 = vmatprep.subr.bf16.mxu0 %v4180_v33  ;;  %754 = vmatprep.subr.bf16.mxu1 %v4182_v34 }
  0x52   :  { %401 = vmatmul.mubr.bf16.vlgmr.msra.gmra.mxu0 %v3548_v35  ;;  %474 = vmatmul.mubr.bf16.vlgmr.msra.gmra.mxu1 %v3548_v35 }
  0x53   :  { %714 = vmatpush1.bf16.msra.mxu0 %v4187_v36  ;;  %755 = vmatpush1.bf16.msra.mxu1 %v4189_v37 }
  0x54   :  { %715 = vmatprep.subr.bf16.mxu0 %v4193_v38  ;;  %756 = vmatprep.subr.bf16.mxu1 %v4195_v39 }
  0x55   :  { %410 = vmatprep.mubr.bf16.mxu0 %v5362_v0  ;;  %483 = vmatprep.mubr.bf16.mxu1 %v5362_v0 }
  0x57   :  { %716 = vmatpush1.bf16.msra.mxu0 %v4197_v40  ;;  %757 = vmatpush1.bf16.msra.mxu1 %v4201_v41 }
  0x58   :  { %717 = vmatprep.subr.bf16.mxu0 %v4205_v42  ;;  %758 = vmatprep.subr.bf16.mxu1 %v4207_v43 }
  0x5a   :  { %411 = vmatmul.mubr.bf16.gmra.mxu0 %v3561_v44  ;;  %484 = vmatmul.mubr.bf16.gmra.mxu1 %v3561_v44 }
  0x5b   :  { %718 = vmatpush1.bf16.msra.mxu0 %v4214_v45  ;;  %759 = vmatpush1.bf16.msra.mxu1 %v4216_v46 }
  0x5c   :  { %719 = vmatprep.subr.bf16.mxu0 %v4220_v47  ;;  %760 = vmatprep.subr.bf16.mxu1 %v4224_v48 }
  0x5d   :  { %420 = vmatprep.mubr.bf16.mxu0 %v5362_v0  ;;  %493 = vmatprep.mubr.bf16.mxu1 %v5362_v0 }
  0x5f   :  { %720 = vmatpush1.bf16.msra.mxu0 %v4226_v49  ;;  %761 = vmatpush1.bf16.msra.mxu1 %v4228_v50 }
  0x60   :  { %721 = vmatprep.subr.bf16.mxu0 %v4232_v51  ;;  %762 = vmatprep.subr.bf16.mxu1 %v4236_v52 }
  0x62   :  { %421 = vmatmul.mubr.bf16.gmra.mxu0 %v3574_v53  ;;  %494 = vmatmul.mubr.bf16.gmra.mxu1 %v3574_v53 }
  0x63   :  { %722 = vmatpush1.bf16.msra.mxu0 %v4243_v54  ;;  %763 = vmatpush1.bf16.msra.mxu1 %v4245_v55 }
  0x64   :  { %723 = vmatprep.subr.bf16.mxu0 %v4247_v56  ;;  %764 = vmatprep.subr.bf16.mxu1 %v4249_v57 }
  0x65   :  { %430 = vmatprep.mubr.bf16.mxu0 %v5362_v0  ;;  %503 = vmatprep.mubr.bf16.mxu1 %v5362_v0 }
  0x67   :  { %724 = vmatpush1.bf16.msra.mxu0 %v4255_v58  ;;  %765 = vmatpush1.bf16.msra.mxu1 %v4257_v59 }
  0x68   :  { %725 = vmatprep.subr.bf16.mxu0 %v4259_v60  ;;  %766 = vmatprep.subr.bf16.mxu1 %v4261_v61 }
  0x6a   :  { %431 = vmatmul.mubr.bf16.gmra.mxu0 %v3587_v62  ;;  %504 = vmatmul.mubr.bf16.gmra.mxu1 %v3587_v62 }
  0x6b   :  { %726 = vmatpush1.bf16.msra.mxu0 %v4272_v63  ;;  %767 = vmatpush1.bf16.msra.mxu1 %v4274_v1 }
  0x6c   :  { %727 = vmatprep.subr.bf16.mxu0 %v4276_v2  ;;  %768 = vmatprep.subr.bf16.mxu1 %v4278_v3 }
  0x6d   :  { %745 = vmatprep.mubr.bf16.mxu0 %v5362_v0  ;;  %786 = vmatprep.mubr.bf16.mxu1 %v5362_v0 }
  0x6f   :  { %728 = vmatpush1.bf16.msra.mxu0 %v4284_v4  ;;  %769 = vmatpush1.bf16.msra.mxu1 %v4286_v5 }
  0x70   :  { %836 = vmatprep.subr.bf16.mxu0 %v4180_v33  ;;  %877 = vmatprep.subr.bf16.mxu1 %v4182_v34 }
  0x72   :  { %746 = vmatmul.mubr.bf16.vlgmr.msra.gmra.mxu0 %v5360_v6  ;;  %787 = vmatmul.mubr.bf16.vlgmr.msra.gmra.mxu1 %v5360_v6 }
  0x73   :  { %837 = vmatpush1.bf16.msra.mxu0 %v4187_v36  ;;  %878 = vmatpush1.bf16.msra.mxu1 %v4189_v37 }
  0x74   :  { %838 = vmatprep.subr.bf16.mxu0 %v4193_v38  ;;  %879 = vmatprep.subr.bf16.mxu1 %v4195_v39 }
  0x75   :  { %868 = vmatprep.mubr.bf16.mxu0 %v5362_v0  ;;  %909 = vmatprep.mubr.bf16.mxu1 %v5362_v0 }
  0x77   :  { %839 = vmatpush1.bf16.msra.mxu0 %v4197_v40  ;;  %880 = vmatpush1.bf16.msra.mxu1 %v4201_v41 }
  0x78   :  { %840 = vmatprep.subr.bf16.mxu0 %v4205_v42  ;;  %881 = vmatprep.subr.bf16.mxu1 %v4207_v43 }
  0x7b   :  { %841 = vmatpush1.bf16.msra.mxu0 %v4214_v45  ;;  %882 = vmatpush1.bf16.msra.mxu1 %v4216_v46 }
  0x7c   :  { %842 = vmatprep.subr.bf16.mxu0 %v4220_v47  ;;  %883 = vmatprep.subr.bf16.mxu1 %v4224_v48 }
  0x7f   :  { %843 = vmatpush1.bf16.msra.mxu0 %v4226_v49  ;;  %884 = vmatpush1.bf16.msra.mxu1 %v4228_v50 }
  0x80   :  { %844 = vmatprep.subr.bf16.mxu0 %v4232_v51  ;;  %885 = vmatprep.subr.bf16.mxu1 %v4236_v52 }
  0x83   :  { %845 = vmatpush1.bf16.msra.mxu0 %v4243_v54  ;;  %886 = vmatpush1.bf16.msra.mxu1 %v4245_v55 }
  0x84   :  { %846 = vmatprep.subr.bf16.mxu0 %v4247_v56  ;;  %887 = vmatprep.subr.bf16.mxu1 %v4249_v57 }
  0x87   :  { %847 = vmatpush1.bf16.msra.mxu0 %v4255_v58  ;;  %888 = vmatpush1.bf16.msra.mxu1 %v4257_v59 }
  0x88   :  { %848 = vmatprep.subr.bf16.mxu0 %v4259_v60  ;;  %889 = vmatprep.subr.bf16.mxu1 %v4261_v61 }
  0x8b   :  { %849 = vmatpush1.bf16.msra.mxu0 %v4272_v63  ;;  %890 = vmatpush1.bf16.msra.mxu1 %v4274_v1 }
  0x8c   :  { %850 = vmatprep.subr.bf16.mxu0 %v4276_v2  ;;  %891 = vmatprep.subr.bf16.mxu1 %v4278_v3 }
  0x8f   :  { %851 = vmatpush1.bf16.msra.mxu0 %v4284_v4  ;;  %892 = vmatpush1.bf16.msra.mxu1 %v4286_v5 }
  0x90   :  { %960 = vmatprep.subr.bf16.mxu0 %v4180_v33  ;;  %1001 = vmatprep.subr.bf16.mxu1 %v4182_v34 }
 0x112   :  { %v4342_v13 = vpop.f32.mrf.mxu0  ;;  %v4344_v14 = vpop.f32.mrf.mxu1 }
 0x114   :  { %v4351_v17 = vpop.f32.mrf.mxu0  ;;  %v4353_v18 = vpop.f32.mrf.mxu1 }
 0x116   :  { %v406_v21 = vpop.f32.mrf.mxu0  ;;  %v479_v22 = vpop.f32.mrf.mxu1 }
 0x117   :  { %v4363_v24 = vadd.f32 %v406_v21, %v167_v19  ;;  %v4366_v25 = vadd.f32 %v479_v22, %v4348_v15 }
 0x118   :  { %v408_v26 = vpop.f32.mrf.mxu0  ;;  %v481_v27 = vpop.f32.mrf.mxu1 }
 0x119   :  { %v4368_v28 = vadd.f32 %v408_v26, %v171_v23  ;;  %v4371_v29 = vadd.f32 %v481_v27, %v4359_v20 }
 0x11a   :  { %v412_v30 = vpop.f32.mrf.mxu0  ;;  %v485_v31 = vpop.f32.mrf.mxu1 }
 0x11b   :  { %v4373_v32 = vadd.f32 %v412_v30, %v167_v19  ;;  %v4376_v35 = vadd.f32 %v485_v31, %v4348_v15 }
 0x11c   :  { %v414_v44 = vpop.f32.mrf.mxu0  ;;  %v487_v53 = vpop.f32.mrf.mxu1 }
 0x11d   :  { %5367 = vst [vmem:[#allocation20_spill] sm:$0xff] %v4376_v35  ;;  %v4378_v62 = vadd.f32 %v414_v44, %v171_v23  ;;  %v4381_v7 = vadd.f32 %v487_v53, %v4359_v20 }
 0x11e   :  { %v416_v12 = vpop.f32.mrf.mxu0  ;;  %v489_v21 = vpop.f32.mrf.mxu1 }
 0x11f   :  { %v4383_v22 = vadd.f32 %v416_v12, %v167_v19  ;;  %v4386_v26 = vadd.f32 %v489_v21, %v4348_v15 }
 0x120   :  { %v418_v27 = vpop.f32.mrf.mxu0  ;;  %v491_v30 = vpop.f32.mrf.mxu1 }
 0x121   :  { %5368 = vst [vmem:[#allocation21_spill] sm:$0xff] %v4383_v22  ;;  %5369 = vst [vmem:[#allocation22_spill] sm:$0xff] %v4386_v26  ;;  %v4388_v9 = vadd.f32 %v418_v27, %v171_v23  ;;  %v4391_v31 = vadd.f32 %v491_v30, %v4359_v20 }
 0x122   :  { %v422_v11 = vpop.f32.mrf.mxu0  ;;  %v495_v44 = vpop.f32.mrf.mxu1 }
 0x123   :  { %5370 = vst [vmem:[#allocation23_spill] sm:$0xff] %v4388_v9  ;;  %5371 = vst [vmem:[#allocation24_spill] sm:$0xff] %v4391_v31  ;;  %v4393_v16 = vadd.f32 %v422_v11, %v167_v19  ;;  %v4396_v53 = vadd.f32 %v495_v44, %v4348_v15 }
 0x124   :  { %v424_v10 = vpop.f32.mrf.mxu0  ;;  %v497_v12 = vpop.f32.mrf.mxu1 }
 0x125   :  { %5372 = vst [vmem:[#allocation25_spill] sm:$0xff] %v4393_v16  ;;  %5373 = vst [vmem:[#allocation26_spill] sm:$0xff] %v4396_v53  ;;  %v4398_v6 = vadd.f32 %v424_v10, %v171_v23  ;;  %v4401_v21 = vadd.f32 %v497_v12, %v4359_v20 }
 0x126   :  { %v426_v0 = vpop.f32.mrf.mxu0  ;;  %v499_v27 = vpop.f32.mrf.mxu1 }
 0x127   :  { %5374 = vst [vmem:[#allocation27_spill] sm:$0xff] %v4398_v6  ;;  %5375 = vst [vmem:[#allocation28_spill] sm:$0xff] %v4401_v21  ;;  %v4403_v8 = vadd.f32 %v426_v0, %v167_v19  ;;  %v4406_v30 = vadd.f32 %v499_v27, %v4348_v15 }
 0x128   :  { %v428_v26 = vpop.f32.mrf.mxu0  ;;  %v501_v11 = vpop.f32.mrf.mxu1 }
 0x129   :  { %5376 = vst [vmem:[#allocation29_spill] sm:$0xff] %v4403_v8  ;;  %5377 = vst [vmem:[#allocation30_spill] sm:$0xff] %v4406_v30  ;;  %v4408_v16 = vadd.f32 %v428_v26, %v171_v23  ;;  %v4411_v44 = vadd.f32 %v501_v11, %v4359_v20 }
 0x12a   :  { %v432_v53 = vpop.f32.mrf.mxu0  ;;  %v505_v10 = vpop.f32.mrf.mxu1 }
 0x12b   :  { %5378 = vst [vmem:[#allocation31_spill] sm:$0xff] %v4408_v16  ;;  %5379 = vst [vmem:[#allocation32_spill] sm:$0xff] %v4411_v44  ;;  %v4413_v6 = vadd.f32 %v432_v53, %v167_v19  ;;  %v4416_v12 = vadd.f32 %v505_v10, %v4348_v15 }
 0x12c   :  { %v434_v21 = vpop.f32.mrf.mxu0  ;;  %v507_v0 = vpop.f32.mrf.mxu1 }
 0x12d   :  { %5380 = vst [vmem:[#allocation33_spill] sm:$0xff] %v4413_v6  ;;  %5381 = vst [vmem:[#allocation34_spill] sm:$0xff] %v4416_v12  ;;  %v4418_v8 = vadd.f32 %v434_v21, %v171_v23  ;;  %v4421_v27 = vadd.f32 %v507_v0, %v4359_v20  ;;  %v403_v6 = vadd.f32 %v4342_v13, %v167_v19 }
 0x12e   :  { %v436_v30 = vpop.f32.mrf.mxu0  ;;  %v509_v26 = vpop.f32.mrf.mxu1  ;;  %v405_v0 = vadd.f32 %v4351_v17, %v171_v23 }
 0x12f   :  { %5382 = vst [vmem:[#allocation35_spill] sm:$0xff] %v4418_v8  ;;  %5383 = vst [vmem:[#allocation36_spill] sm:$0xff] %v4421_v27  ;;  %v4423_v16 = vadd.f32 %v436_v30, %v167_v19  ;;  %v4426_v11 = vadd.f32 %v509_v26, %v4348_v15  ;;  %v478_v19 = vadd.f32 %v4353_v18, %v4359_v20 }
 0x130   :  { %v438_v44 = vpop.f32.mrf.mxu0  ;;  %v511_v53 = vpop.f32.mrf.mxu1 }
 0x131   :  { %5384 = vst [vmem:[#allocation37_spill] sm:$0xff] %v4423_v16  ;;  %5385 = vst [vmem:[#allocation38_spill] sm:$0xff] %v4426_v11  ;;  %v4429_v10 = vadd.f32 %v438_v44, %v171_v23  ;;  %v4432_v12 = vadd.f32 %v511_v53, %v4359_v20  ;;  %v476_v53 = vadd.f32 %v4344_v14, %v4348_v15 }
 0x132   :  { %v747_v21 = vpop.f32.mrf.mxu0  ;;  %v788_v8 = vpop.f32.mrf.mxu1 }
 0x133   :  { %v795_v27 = vadd.f32 %v747_v21, %v403_v6  ;;  %v797_v23 = vadd.f32 %v788_v8, %v476_v53 }
 0x134   :  { %v749_v31 = vpop.f32.mrf.mxu0  ;;  %v790_v30 = vpop.f32.mrf.mxu1 }
 0x135   :  { %v3369_v16 = vmul.f32 -1.442695, %v795_v27  ;;  %v796_v9 = vadd.f32 %v749_v31, %v405_v0  ;;  %v798_v44 = vadd.f32 %v790_v30, %v478_v19  ;;  %v5386_v19 = vmov 0  }
 0x136   :  { %v751_v26 = vpop.f32.mrf.mxu0  ;;  %v792_v11 = vpop.f32.mrf.mxu1 }
 0x137   :  { %3700 = vpow2.f32 %v3369_v16  ;;  %v3370_v22 = vmul.f32 -1.442695, %v796_v9  ;;  %v3371_v17 = vmul.f32 -1.442695, %v798_v44 }
 0x138   :  { %v752_v35 = vpop.f32.mrf.mxu0  ;;  %v793_v13 = vpop.f32.mrf.mxu1 }
 0x139   :  { %3702 = vpow2.f32 %v3370_v22 }
 0x13a   :  { %3704 = vpow2.f32 %v3371_v17 }
 0x144   :  { %v3701_v6 = vpop.eup %3700 }
 0x145   :  { %v802_v21 = vadd.f32 1.0, %v3701_v6 }
 0x146   :  { %v3703_v27 = vpop.eup %3702 }
 0x147   :  { %3706 = vrcp.f32 %v802_v21  ;;  %v808_v31 = vadd.f32 1.0, %v3703_v27  ;;  %v3705_v9 = vpop.eup %3704 }
 0x148   :  { %3708 = vtanh.f32 %v797_v23  ;;  %v815_v11 = vadd.f32 1.0, %v3705_v9 }
 0x149   :  { %3710 = vrcp.f32 %v808_v31 }
 0x14a   :  { %3712 = vrcp.f32 %v815_v11 }
 0x154   :  { %v3707_v16 = vpop.eup %3706 }
 0x155   :  { %v3709_v35 = vpop.eup %3708 }
 0x156   :  { %v3711_v22 = vpop.eup %3710  ;;  %v819_v20 = vmul.f32 %v3709_v35, %v3707_v16 }
 0x157   :  { %v818_v18 = vmul.f32 0.0, %v3711_v22  ;;  %v3713_v8 = vpop.eup %3712 }
 0x159   :  { %v4439_v0 = vadd.f32 %v819_v20, %v818_v18 }
 0x15b   :  { %3714 = vtanh.f32 %v4439_v0 }
 0x168   :  { %v3715_v14 = vpop.eup %3714 }
 0x169   :  { %v822_v15 = vmul.f32 %v3715_v14, %v3713_v8 }
 0x16b   :  { %v825_v30 = vmax.f32 %v822_v15, 0.0  ;;  %v835_v26 = vpack.c.bf16 %v822_v15, %v822_v15 }
 0x16d   :  { %v826_v13 = vpack.c.bf16 %v825_v30, %v825_v30  ;;  %869 = vmatmul.mubr.bf16.vlgmr.msra.gmra.mxu0 %v835_v26  ;;  %910 = vmatmul.mubr.bf16.vlgmr.msra.gmra.mxu1 %v835_v26 }
 0x16e   :  { %961 = vmatpush1.bf16.msra.mxu0 %v4187_v36  ;;  %1002 = vmatpush1.bf16.msra.mxu1 %v4189_v37 }
 0x16f   :  { %827 = vst [vmem:[#allocation8] sm:$0xf] %v826_v13  ;;  %962 = vmatprep.subr.bf16.mxu0 %v4193_v38  ;;  %1003 = vmatprep.subr.bf16.mxu1 %v4195_v39 }
 0x170   :  { %992 = vmatprep.mubr.bf16.mxu0 %v5386_v19  ;;  %1033 = vmatprep.mubr.bf16.mxu1 %v5386_v19 }
 0x172   :  { %963 = vmatpush1.bf16.msra.mxu0 %v4197_v40  ;;  %1004 = vmatpush1.bf16.msra.mxu1 %v4201_v41 }
 0x173   :  { %964 = vmatprep.subr.bf16.mxu0 %v4205_v42  ;;  %1005 = vmatprep.subr.bf16.mxu1 %v4207_v43 }
 0x176   :  { %965 = vmatpush1.bf16.msra.mxu0 %v4214_v45  ;;  %1006 = vmatpush1.bf16.msra.mxu1 %v4216_v46 }
 0x177   :  { %966 = vmatprep.subr.bf16.mxu0 %v4220_v47  ;;  %1007 = vmatprep.subr.bf16.mxu1 %v4224_v48 }
 0x17a   :  { %967 = vmatpush1.bf16.msra.mxu0 %v4226_v49  ;;  %1008 = vmatpush1.bf16.msra.mxu1 %v4228_v50 }
 0x17b   :  { %968 = vmatprep.subr.bf16.mxu0 %v4232_v51  ;;  %1009 = vmatprep.subr.bf16.mxu1 %v4236_v52 }
 0x17e   :  { %969 = vmatpush1.bf16.msra.mxu0 %v4243_v54  ;;  %1010 = vmatpush1.bf16.msra.mxu1 %v4245_v55 }
 0x17f   :  { %970 = vmatprep.subr.bf16.mxu0 %v4247_v56  ;;  %1011 = vmatprep.subr.bf16.mxu1 %v4249_v57 }
 0x182   :  { %971 = vmatpush1.bf16.msra.mxu0 %v4255_v58  ;;  %1012 = vmatpush1.bf16.msra.mxu1 %v4257_v59 }
 0x183   :  { %972 = vmatprep.subr.bf16.mxu0 %v4259_v60  ;;  %1013 = vmatprep.subr.bf16.mxu1 %v4261_v61 }
 0x186   :  { %973 = vmatpush1.bf16.msra.mxu0 %v4272_v63  ;;  %1014 = vmatpush1.bf16.msra.mxu1 %v4274_v1 }
 0x187   :  { %974 = vmatprep.subr.bf16.mxu0 %v4276_v2  ;;  %1015 = vmatprep.subr.bf16.mxu1 %v4278_v3 }
 0x18a   :  { %975 = vmatpush1.bf16.msra.mxu0 %v4284_v4  ;;  %1016 = vmatpush1.bf16.msra.mxu1 %v4286_v5 }
 0x18b   :  { %1084 = vmatprep.subr.bf16.mxu0 %v4180_v33  ;;  %1125 = vmatprep.subr.bf16.mxu1 %v4182_v34 }
 0x22d   :  { %v870_v44 = vpop.f32.mrf.mxu0  ;;  %v911_v53 = vpop.f32.mrf.mxu1 }
 0x22e   :  { %v918_v17 = vadd.f32 %v870_v44, %v4363_v24  ;;  %v920_v18 = vadd.f32 %v911_v53, %v4366_v25 }
 0x22f   :  { %v872_v6 = vpop.f32.mrf.mxu0  ;;  %v913_v23 = vpop.f32.mrf.mxu1 }
 0x230   :  { %v3372_v21 = vmul.f32 -1.442695, %v918_v17  ;;  %v919_v27 = vadd.f32 %v872_v6, %v4368_v28  ;;  %v921_v11 = vadd.f32 %v913_v23, %v4371_v29 }
 0x231   :  { %v874_v31 = vpop.f32.mrf.mxu0  ;;  %v915_v9 = vpop.f32.mrf.mxu1 }
 0x232   :  { %3716 = vpow2.f32 %v3372_v21  ;;  %v3373_v16 = vmul.f32 -1.442695, %v919_v27  ;;  %v3374_v20 = vmul.f32 -1.442695, %v921_v11 }
 0x233   :  { %v875_v35 = vpop.f32.mrf.mxu0  ;;  %v916_v22 = vpop.f32.mrf.mxu1 }
 0x234   :  { %3718 = vpow2.f32 %v3373_v16 }
 0x235   :  { %3720 = vtanh.f32 %v920_v18 }
 0x236   :  { %3722 = vpow2.f32 %v3374_v20 }
 0x23f   :  { %v3717_v8 = vpop.eup %3716 }
 0x240   :  { %v925_v14 = vadd.f32 1.0, %v3717_v8 }
 0x241   :  { %v3719_v24 = vpop.eup %3718 }
 0x242   :  { %3724 = vrcp.f32 %v925_v14  ;;  %v931_v15 = vadd.f32 1.0, %v3719_v24  ;;  %v3721_v28 = vpop.eup %3720 }
 0x243   :  { %v3723_v30 = vpop.eup %3722 }
 0x244   :  { %3726 = vrcp.f32 %v931_v15  ;;  %v938_v17 = vadd.f32 1.0, %v3723_v30 }
 0x246   :  { %3728 = vrcp.f32 %v938_v17 }
 0x24f   :  { %v3725_v26 = vpop.eup %3724 }
 0x250   :  { %v942_v13 = vmul.f32 %v3725_v26, %v3721_v28  ;;  %v5387_v28 = vld [vmem:[#allocation20_spill] sm:$0xff] }
 0x251   :  { %v3727_v44 = vpop.eup %3726 }
 0x252   :  { %v941_v6 = vmul.f32 %v3727_v44, %v4439_v0 }
 0x253   :  { %v3729_v25 = vpop.eup %3728 }
 0x254   :  { %v4481_v29 = vadd.f32 %v942_v13, %v941_v6 }
 0x256   :  { %3730 = vtanh.f32 %v4481_v29 }
 0x263   :  { %v3731_v53 = vpop.eup %3730 }
 0x264   :  { %v945_v23 = vmul.f32 %v3731_v53, %v3729_v25 }
 0x266   :  { %v948_v21 = vmax.f32 %v945_v23, 0.0  ;;  %v959_v27 = vpack.c.bf16 %v945_v23, %v945_v23 }
 0x268   :  { %v949_v31 = vpack.c.bf16 %v948_v21, %v948_v21  ;;  %993 = vmatmul.mubr.bf16.vlgmr.msra.gmra.mxu0 %v959_v27  ;;  %1034 = vmatmul.mubr.bf16.vlgmr.msra.gmra.mxu1 %v959_v27 }
 0x269   :  { %1085 = vmatpush1.bf16.msra.mxu0 %v4187_v36  ;;  %1126 = vmatpush1.bf16.msra.mxu1 %v4189_v37 }
 0x26a   :  { %951 = vst [vmem:[#allocation8 + $0x4] sm:$0xf] %v949_v31  ;;  %1086 = vmatprep.subr.bf16.mxu0 %v4193_v38  ;;  %1127 = vmatprep.subr.bf16.mxu1 %v4195_v39 }
 0x26b   :  { %1116 = vmatprep.mubr.bf16.mxu0 %v5386_v19  ;;  %1157 = vmatprep.mubr.bf16.mxu1 %v5386_v19 }
 0x26d   :  { %1087 = vmatpush1.bf16.msra.mxu0 %v4197_v40  ;;  %1128 = vmatpush1.bf16.msra.mxu1 %v4201_v41 }
 0x26e   :  { %1088 = vmatprep.subr.bf16.mxu0 %v4205_v42  ;;  %1129 = vmatprep.subr.bf16.mxu1 %v4207_v43 }
 0x271   :  { %1089 = vmatpush1.bf16.msra.mxu0 %v4214_v45  ;;  %1130 = vmatpush1.bf16.msra.mxu1 %v4216_v46 }
 0x272   :  { %1090 = vmatprep.subr.bf16.mxu0 %v4220_v47  ;;  %1131 = vmatprep.subr.bf16.mxu1 %v4224_v48 }
 0x275   :  { %1091 = vmatpush1.bf16.msra.mxu0 %v4226_v49  ;;  %1132 = vmatpush1.bf16.msra.mxu1 %v4228_v50 }
 0x276   :  { %1092 = vmatprep.subr.bf16.mxu0 %v4232_v51  ;;  %1133 = vmatprep.subr.bf16.mxu1 %v4236_v52 }
 0x279   :  { %1093 = vmatpush1.bf16.msra.mxu0 %v4243_v54  ;;  %1134 = vmatpush1.bf16.msra.mxu1 %v4245_v55 }
 0x27a   :  { %1094 = vmatprep.subr.bf16.mxu0 %v4247_v56  ;;  %1135 = vmatprep.subr.bf16.mxu1 %v4249_v57 }
 0x27d   :  { %1095 = vmatpush1.bf16.msra.mxu0 %v4255_v58  ;;  %1136 = vmatpush1.bf16.msra.mxu1 %v4257_v59 }
 0x27e   :  { %1096 = vmatprep.subr.bf16.mxu0 %v4259_v60  ;;  %1137 = vmatprep.subr.bf16.mxu1 %v4261_v61 }
 0x281   :  { %1097 = vmatpush1.bf16.msra.mxu0 %v4272_v63  ;;  %1138 = vmatpush1.bf16.msra.mxu1 %v4274_v1 }
 0x282   :  { %1098 = vmatprep.subr.bf16.mxu0 %v4276_v2  ;;  %1139 = vmatprep.subr.bf16.mxu1 %v4278_v3 }
 0x285   :  { %1099 = vmatpush1.bf16.msra.mxu0 %v4284_v4  ;;  %1140 = vmatpush1.bf16.msra.mxu1 %v4286_v5 }
 0x286   :  { %1208 = vmatprep.subr.bf16.mxu0 %v4180_v33  ;;  %1249 = vmatprep.subr.bf16.mxu1 %v4182_v34 }
 0x328   :  { %v994_v0 = vpop.f32.mrf.mxu0  ;;  %v1035_v9 = vpop.f32.mrf.mxu1 }
 0x329   :  { %v1042_v16 = vadd.f32 %v994_v0, %v4373_v32  ;;  %v1044_v34 = vadd.f32 %v1035_v9, %v5387_v28 }
 0x32a   :  { %v996_v35 = vpop.f32.mrf.mxu0  ;;  %v1037_v22 = vpop.f32.mrf.mxu1 }
 0x32b   :  { %v3375_v11 = vmul.f32 -1.442695, %v1042_v16  ;;  %v1043_v18 = vadd.f32 %v996_v35, %v4378_v62  ;;  %v1045_v33 = vadd.f32 %v1037_v22, %v4381_v7 }
 0x32c   :  { %v998_v20 = vpop.f32.mrf.mxu0  ;;  %v1039_v8 = vpop.f32.mrf.mxu1 }
 0x32d   :  { %3732 = vpow2.f32 %v3375_v11  ;;  %v3376_v14 = vmul.f32 -1.442695, %v1043_v18  ;;  %v3377_v30 = vmul.f32 -1.442695, %v1045_v33 }
 0x32e   :  { %v999_v24 = vpop.f32.mrf.mxu0  ;;  %v1040_v15 = vpop.f32.mrf.mxu1 }
 0x32f   :  { %3734 = vpow2.f32 %v3376_v14 }
 0x330   :  { %3736 = vtanh.f32 %v1044_v34 }
 0x331   :  { %3738 = vpow2.f32 %v3377_v30 }
 0x33a   :  { %v3733_v26 = vpop.eup %3732 }
 0x33b   :  { %v1049_v13 = vadd.f32 1.0, %v3733_v26 }
 0x33c   :  { %v3735_v32 = vpop.eup %3734 }
 0x33d   :  { %3740 = vrcp.f32 %v1049_v13  ;;  %v1055_v44 = vadd.f32 1.0, %v3735_v32  ;;  %v3737_v62 = vpop.eup %3736 }
 0x33e   :  { %v3739_v17 = vpop.eup %3738 }
 0x33f   :  { %3742 = vrcp.f32 %v1055_v44  ;;  %v1062_v23 = vadd.f32 1.0, %v3739_v17 }
 0x341   :  { %3744 = vrcp.f32 %v1062_v23  ;;  %v4581_v23 = vld [vmem:[#allocation11 + $0xcc] ss:$16 sps:$4 sm:$0xff]  }
 0x34a   :  { %v3741_v6 = vpop.eup %3740 }
 0x34b   :  { %v1066_v25 = vmul.f32 %v3741_v6, %v3737_v62  ;;  %v4572_v6 = vld [vmem:[#allocation11 + $0xe0] ss:$16 sps:$4 sm:$0xff]  }
 0x34c   :  { %v3743_v53 = vpop.eup %3742 }
 0x34d   :  { %v1065_v21 = vmul.f32 %v3743_v53, %v4481_v29  ;;  %v4578_v53 = vld [vmem:[#allocation11 + $0xc4] ss:$16 sps:$4 sm:$0xff]  }
 0x34e   :  { %v3745_v27 = vpop.eup %3744 }
 0x34f   :  { %v4523_v7 = vadd.f32 %v1066_v25, %v1065_v21  ;;  %v4575_v25 = vld [vmem:[#allocation11 + $0xe8] ss:$16 sps:$4 sm:$0xff]   ;;  %v4586_v21 = vld [vmem:[#allocation11 + $0xc0] ss:$16 sps:$4 sm:$0xff]  }
 0x351   :  { %3746 = vtanh.f32 %v4523_v7 }
 0x35e   :  { %v3747_v31 = vpop.eup %3746 }
 0x35f   :  { %v1069_v0 = vmul.f32 %v3747_v31, %v3745_v27  ;;  %v4592_v27 = vld [vmem:[#allocation11 + $0xa4] ss:$16 sps:$4 sm:$0xff]   ;;  %v4595_v31 = vld [vmem:[#allocation11 + $0xac] ss:$16 sps:$4 sm:$0xff]  }
 0x361   :  { %v1072_v9 = vmax.f32 %v1069_v0, 0.0  ;;  %v1083_v16 = vpack.c.bf16 %v1069_v0, %v1069_v0  ;;  %v4598_v0 = vld [vmem:[#allocation11 + $0xa0] ss:$16 sps:$4 sm:$0xff]  }
 0x363   :  { %v1073_v35 = vpack.c.bf16 %v1072_v9, %v1072_v9  ;;  %1117 = vmatmul.mubr.bf16.vlgmr.msra.gmra.mxu0 %v1083_v16  ;;  %1158 = vmatmul.mubr.bf16.vlgmr.msra.gmra.mxu1 %v1083_v16  ;;  %v4601_v9 = vld [vmem:[#allocation11 + $0xa8] ss:$16 sps:$4 sm:$0xff]   ;;  %v4604_v16 = vld [vmem:[#allocation11 + $0x84] ss:$16 sps:$4 sm:$0xff]  }
 0x364   :  { %1209 = vmatpush1.bf16.msra.mxu0 %v4187_v36  ;;  %1250 = vmatpush1.bf16.msra.mxu1 %v4189_v37  ;;  %v4558_v36 = vld [vmem:[#allocation11 + $0xe4] ss:$16 sps:$4 sm:$0xff]   ;;  %v4561_v37 = vld [vmem:[#allocation11 + $0xec] ss:$16 sps:$4 sm:$0xff]  }
 0x365   :  { %1075 = vst [vmem:[#allocation8 + $0x8] sm:$0xf] %v1073_v35  ;;  %1210 = vmatprep.subr.bf16.mxu0 %v4193_v38  ;;  %1251 = vmatprep.subr.bf16.mxu1 %v4195_v39  ;;  %v4607_v35 = vld [vmem:[#allocation11 + $0x8c] ss:$16 sps:$4 sm:$0xff]  }
 0x366   :  { %1240 = vmatprep.mubr.bf16.mxu0 %v5386_v19  ;;  %1281 = vmatprep.mubr.bf16.mxu1 %v5386_v19 }
 0x368   :  { %1211 = vmatpush1.bf16.msra.mxu0 %v4197_v40  ;;  %1252 = vmatpush1.bf16.msra.mxu1 %v4201_v41  ;;  %v5388_v40 = vld [vmem:[#allocation21_spill] sm:$0xff] }
 0x369   :  { %1212 = vmatprep.subr.bf16.mxu0 %v4205_v42  ;;  %1253 = vmatprep.subr.bf16.mxu1 %v4207_v43 }
 0x36c   :  { %1213 = vmatpush1.bf16.msra.mxu0 %v4214_v45  ;;  %1254 = vmatpush1.bf16.msra.mxu1 %v4216_v46  ;;  %v5389_v46 = vld [vmem:[#allocation23_spill] sm:$0xff] }
 0x36d   :  { %1214 = vmatprep.subr.bf16.mxu0 %v4220_v47  ;;  %1255 = vmatprep.subr.bf16.mxu1 %v4224_v48 }
 0x370   :  { %1215 = vmatpush1.bf16.msra.mxu0 %v4226_v49  ;;  %1256 = vmatpush1.bf16.msra.mxu1 %v4228_v50 }
 0x371   :  { %1216 = vmatprep.subr.bf16.mxu0 %v4232_v51  ;;  %1257 = vmatprep.subr.bf16.mxu1 %v4236_v52 }
 0x374   :  { %1217 = vmatpush1.bf16.msra.mxu0 %v4243_v54  ;;  %1258 = vmatpush1.bf16.msra.mxu1 %v4245_v55  ;;  %v5390_v54 = vld [vmem:[#allocation24_spill] sm:$0xff] }
 0x375   :  { %1218 = vmatprep.subr.bf16.mxu0 %v4247_v56  ;;  %1259 = vmatprep.subr.bf16.mxu1 %v4249_v57  ;;  %v5391_v56 = vld [vmem:[#allocation22_spill] sm:$0xff] }
 0x378   :  { %1219 = vmatpush1.bf16.msra.mxu0 %v4255_v58  ;;  %1260 = vmatpush1.bf16.msra.mxu1 %v4257_v59 }
 0x379   :  { %1220 = vmatprep.subr.bf16.mxu0 %v4259_v60  ;;  %1261 = vmatprep.subr.bf16.mxu1 %v4261_v61 }
 0x37c   :  { %1221 = vmatpush1.bf16.msra.mxu0 %v4272_v63  ;;  %1262 = vmatpush1.bf16.msra.mxu1 %v4274_v1 }
 0x37d   :  { %1222 = vmatprep.subr.bf16.mxu0 %v4276_v2  ;;  %1263 = vmatprep.subr.bf16.mxu1 %v4278_v3 }
 0x380   :  { %1223 = vmatpush1.bf16.msra.mxu0 %v4284_v4  ;;  %1264 = vmatpush1.bf16.msra.mxu1 %v4286_v5 }
 0x381   :  { %1332 = vmatprep.subr.bf16.mxu0 %v4558_v36  ;;  %1373 = vmatprep.subr.bf16.mxu1 %v4561_v37 }
 0x423   :  { %v1118_v38 = vpop.f32.mrf.mxu0  ;;  %v1159_v39 = vpop.f32.mrf.mxu1 }
 0x424   :  { %v1166_v41 = vadd.f32 %v1118_v38, %v5388_v40  ;;  %v1168_v57 = vadd.f32 %v1159_v39, %v5391_v56  ;;  %v4610_v38 = vld [vmem:[#allocation11 + $0x80] ss:$16 sps:$4 sm:$0xff]   ;;  %v4613_v39 = vld [vmem:[#allocation11 + $0x88] ss:$16 sps:$4 sm:$0xff]   ;;  %v4616_v40 = vld [vmem:[#allocation11 + $0x64] ss:$16 sps:$4 sm:$0xff]  }
 0x425   :  { %v1120_v42 = vpop.f32.mrf.mxu0  ;;  %v1161_v43 = vpop.f32.mrf.mxu1 }
 0x426   :  { %v3378_v45 = vmul.f32 -1.442695, %v1166_v41  ;;  %v1167_v47 = vadd.f32 %v1120_v42, %v5389_v46  ;;  %v1169_v55 = vadd.f32 %v1161_v43, %v5390_v54  ;;  %v4619_v41 = vld [vmem:[#allocation11 + $0x6c] ss:$16 sps:$4 sm:$0xff]   ;;  %v4622_v42 = vld [vmem:[#allocation11 + $0x60] ss:$16 sps:$4 sm:$0xff]  }
 0x427   :  { %v1122_v48 = vpop.f32.mrf.mxu0  ;;  %v1163_v49 = vpop.f32.mrf.mxu1  ;;  %v4625_v43 = vld [vmem:[#allocation11 + $0x68] ss:$16 sps:$4 sm:$0xff]   ;;  %v4631_v46 = vld [vmem:[#allocation11 + $0x4c] ss:$16 sps:$4 sm:$0xff]  }
 0x428   :  { %3748 = vpow2.f32 %v3378_v45  ;;  %v3379_v50 = vmul.f32 -1.442695, %v1167_v47  ;;  %v3380_v29 = vmul.f32 -1.442695, %v1169_v55  ;;  %v4628_v45 = vld [vmem:[#allocation11 + $0x44] ss:$16 sps:$4 sm:$0xff]  }
 0x429   :  { %v1123_v51 = vpop.f32.mrf.mxu0  ;;  %v1164_v52 = vpop.f32.mrf.mxu1  ;;  %v5395_v54 = vld [vmem:[#allocation26_spill] sm:$0xff] }
 0x42a   :  { %3750 = vpow2.f32 %v3379_v50 }
 0x42b   :  { %3752 = vtanh.f32 %v1168_v57 }
 0x42c   :  { %3754 = vpow2.f32 %v3380_v29 }
 0x435   :  { %v3749_v22 = vpop.eup %3748 }
 0x436   :  { %v1173_v11 = vadd.f32 1.0, %v3749_v22 }
 0x437   :  { %v3751_v18 = vpop.eup %3750 }
 0x438   :  { %3756 = vrcp.f32 %v1173_v11  ;;  %v1179_v20 = vadd.f32 1.0, %v3751_v18  ;;  %v3753_v8 = vpop.eup %3752 }
 0x439   :  { %v3755_v14 = vpop.eup %3754 }
 0x43a   :  { %3758 = vrcp.f32 %v1179_v20  ;;  %v1186_v28 = vadd.f32 1.0, %v3755_v14 }
 0x43c   :  { %3760 = vrcp.f32 %v1186_v28 }
 0x445   :  { %v3757_v24 = vpop.eup %3756 }
 0x446   :  { %v1190_v15 = vmul.f32 %v3757_v24, %v3753_v8 }
 0x447   :  { %v3759_v33 = vpop.eup %3758 }
 0x448   :  { %v1189_v34 = vmul.f32 %v3759_v33, %v4523_v7  ;;  %v4589_v7 = vld [vmem:[#allocation11 + $0xc8] ss:$16 sps:$4 sm:$0xff]  }
 0x449   :  { %v3761_v26 = vpop.eup %3760 }
 0x44a   :  { %v4569_v30 = vadd.f32 %v1190_v15, %v1189_v34 }
 0x44c   :  { %3762 = vtanh.f32 %v4569_v30 }
 0x459   :  { %v3763_v13 = vpop.eup %3762 }
 0x45a   :  { %v1193_v32 = vmul.f32 %v3763_v13, %v3761_v26 }
 0x45c   :  { %v1196_v44 = vmax.f32 %v1193_v32, 0.0  ;;  %v1207_v62 = vpack.c.bf16 %v1193_v32, %v1193_v32 }
 0x45e   :  { %v1197_v17 = vpack.c.bf16 %v1196_v44, %v1196_v44  ;;  %1241 = vmatmul.mubr.bf16.vlgmr.msra.gmra.mxu0 %v1207_v62  ;;  %1282 = vmatmul.mubr.bf16.vlgmr.msra.gmra.mxu1 %v1207_v62 }
 0x45f   :  { %1333 = vmatpush1.bf16.msra.mxu0 %v4572_v6  ;;  %1374 = vmatpush1.bf16.msra.mxu1 %v4575_v25 }
 0x460   :  { %1199 = vst [vmem:[#allocation8 + $0xc] sm:$0xf] %v1197_v17  ;;  %1334 = vmatprep.subr.bf16.mxu0 %v4578_v53  ;;  %1375 = vmatprep.subr.bf16.mxu1 %v4581_v23  ;;  %v4679_v17 = vld [vmem:[#allocation11 + $0x48] ss:$16 sps:$4 sm:$0xff]  }
 0x461   :  { %1364 = vmatprep.mubr.bf16.mxu0 %v5386_v19  ;;  %1405 = vmatprep.mubr.bf16.mxu1 %v5386_v19 }
 0x463   :  { %1335 = vmatpush1.bf16.msra.mxu0 %v4586_v21  ;;  %1376 = vmatpush1.bf16.msra.mxu1 %v4589_v7 }
 0x464   :  { %1336 = vmatprep.subr.bf16.mxu0 %v4592_v27  ;;  %1377 = vmatprep.subr.bf16.mxu1 %v4595_v31 }
 0x467   :  { %1337 = vmatpush1.bf16.msra.mxu0 %v4598_v0  ;;  %1378 = vmatpush1.bf16.msra.mxu1 %v4601_v9 }
 0x468   :  { %1338 = vmatprep.subr.bf16.mxu0 %v4604_v16  ;;  %1379 = vmatprep.subr.bf16.mxu1 %v4607_v35 }
 0x46b   :  { %1339 = vmatpush1.bf16.msra.mxu0 %v4610_v38  ;;  %1380 = vmatpush1.bf16.msra.mxu1 %v4613_v39 }
 0x46c   :  { %1340 = vmatprep.subr.bf16.mxu0 %v4616_v40  ;;  %1381 = vmatprep.subr.bf16.mxu1 %v4619_v41 }
 0x46f   :  { %1341 = vmatpush1.bf16.msra.mxu0 %v4622_v42  ;;  %1382 = vmatpush1.bf16.msra.mxu1 %v4625_v43 }
 0x470   :  { %1342 = vmatprep.subr.bf16.mxu0 %v4628_v45  ;;  %1383 = vmatprep.subr.bf16.mxu1 %v4631_v46 }
 0x473   :  { %1343 = vmatpush1.bf16.msra.mxu0 %v4255_v58  ;;  %1384 = vmatpush1.bf16.msra.mxu1 %v4257_v59 }
 0x474   :  { %1344 = vmatprep.subr.bf16.mxu0 %v4259_v60  ;;  %1385 = vmatprep.subr.bf16.mxu1 %v4261_v61  ;;  %v5392_v60 = vld [vmem:[#allocation25_spill] sm:$0xff] }
 0x477   :  { %1345 = vmatpush1.bf16.msra.mxu0 %v4272_v63  ;;  %1386 = vmatpush1.bf16.msra.mxu1 %v4274_v1  ;;  %v5393_v1 = vld [vmem:[#allocation27_spill] sm:$0xff] }
 0x478   :  { %1346 = vmatprep.subr.bf16.mxu0 %v4276_v2  ;;  %1387 = vmatprep.subr.bf16.mxu1 %v4278_v3 }
 0x47b   :  { %1347 = vmatpush1.bf16.msra.mxu0 %v4284_v4  ;;  %1388 = vmatpush1.bf16.msra.mxu1 %v4286_v5  ;;  %v5394_v5 = vld [vmem:[#allocation28_spill] sm:$0xff] }
 0x47c   :  { %1456 = vmatprep.subr.bf16.mxu0 %v4558_v36  ;;  %1497 = vmatprep.subr.bf16.mxu1 %v4561_v37 }
 0x51e   :  { %v1242_v58 = vpop.f32.mrf.mxu0  ;;  %v1283_v59 = vpop.f32.mrf.mxu1 }
 0x51f   :  { %v1290_v61 = vadd.f32 %v1242_v58, %v5392_v60  ;;  %v1292_v55 = vadd.f32 %v1283_v59, %v5395_v54  ;;  %v4682_v58 = vld [vmem:[#allocation11 + $0x24] ss:$16 sps:$4 sm:$0xff]   ;;  %v4685_v59 = vld [vmem:[#allocation11 + $0x2c] ss:$16 sps:$4 sm:$0xff]   ;;  %v4688_v60 = vld [vmem:[#allocation11 + $0x20] ss:$16 sps:$4 sm:$0xff]  }
 0x520   :  { %v1244_v47 = vpop.f32.mrf.mxu0  ;;  %v1285_v63 = vpop.f32.mrf.mxu1 }
 0x521   :  { %v3381_v48 = vmul.f32 -1.442695, %v1290_v61  ;;  %v1291_v49 = vadd.f32 %v1244_v47, %v5393_v1  ;;  %v1293_v52 = vadd.f32 %v1285_v63, %v5394_v5  ;;  %v4691_v61 = vld [vmem:[#allocation11 + $0x28] ss:$16 sps:$4 sm:$0xff]   ;;  %v4694_v47 = vld [vmem:[#allocation11 + $0x4] ss:$16 sps:$4 sm:$0xff]  }
 0x522   :  { %v1246_v2 = vpop.f32.mrf.mxu0  ;;  %v1287_v50 = vpop.f32.mrf.mxu1  ;;  %v4697_v63 = vld [vmem:[#allocation11 + $0xc] ss:$16 sps:$4 sm:$0xff]   ;;  %v4703_v1 = vld [vmem:[#allocation11 + $0x8] ss:$16 sps:$4 sm:$0xff]  }
 0x523   :  { %3764 = vpow2.f32 %v3381_v48  ;;  %v3382_v3 = vmul.f32 -1.442695, %v1291_v49  ;;  %v3383_v56 = vmul.f32 -1.442695, %v1293_v52  ;;  %v4700_v48 = vld [vmem:[#allocation11] ss:$16 sps:$4 sm:$0xff]  }
 0x524   :  { %v1247_v4 = vpop.f32.mrf.mxu0  ;;  %v1288_v51 = vpop.f32.mrf.mxu1  ;;  %v5396_v50 = vld [vmem:[#allocation29_spill] sm:$0xff]  ;;  %v5397_v52 = vld [vmem:[#allocation31_spill] sm:$0xff] }
 0x525   :  { %3766 = vpow2.f32 %v3382_v3 }
 0x526   :  { %3768 = vtanh.f32 %v1292_v55 }
 0x527   :  { %3770 = vpow2.f32 %v3383_v56 }
 0x530   :  { %v3765_v57 = vpop.eup %3764 }
 0x531   :  { %v1297_v29 = vadd.f32 1.0, %v3765_v57 }
 0x532   :  { %v3767_v22 = vpop.eup %3766 }
 0x533   :  { %3772 = vrcp.f32 %v1297_v29  ;;  %v1303_v11 = vadd.f32 1.0, %v3767_v22  ;;  %v3769_v18 = vpop.eup %3768 }
 0x534   :  { %v3771_v20 = vpop.eup %3770 }
 0x535   :  { %3774 = vrcp.f32 %v1303_v11  ;;  %v1310_v15 = vadd.f32 1.0, %v3771_v20  ;;  %v5398_v11 = vld [vmem:[#allocation32_spill] sm:$0xff] }
 0x537   :  { %3776 = vrcp.f32 %v1310_v15 }
 0x540   :  { %v3773_v8 = vpop.eup %3772 }
 0x541   :  { %v1314_v14 = vmul.f32 %v3773_v8, %v3769_v18  ;;  %v5399_v18 = vld [vmem:[#allocation30_spill] sm:$0xff] }
 0x542   :  { %v3775_v24 = vpop.eup %3774 }
 0x543   :  { %v1313_v33 = vmul.f32 %v3775_v24, %v4569_v30  ;;  %v4676_v30 = vld [vmem:[#allocation11 + $0x40] ss:$16 sps:$4 sm:$0xff]  }
 0x544   :  { %v3777_v34 = vpop.eup %3776 }
 0x545   :  { %v4651_v28 = vadd.f32 %v1314_v14, %v1313_v33 }
 0x547   :  { %3778 = vtanh.f32 %v4651_v28 }
 0x554   :  { %v3779_v26 = vpop.eup %3778 }
 0x555   :  { %v1317_v13 = vmul.f32 %v3779_v26, %v3777_v34 }
 0x557   :  { %v1320_v32 = vmax.f32 %v1317_v13, 0.0  ;;  %v1331_v44 = vpack.c.bf16 %v1317_v13, %v1317_v13 }
 0x559   :  { %v1321_v62 = vpack.c.bf16 %v1320_v32, %v1320_v32  ;;  %1365 = vmatmul.mubr.bf16.vlgmr.msra.gmra.mxu0 %v1331_v44  ;;  %1406 = vmatmul.mubr.bf16.vlgmr.msra.gmra.mxu1 %v1331_v44 }
 0x55a   :  { %1457 = vmatpush1.bf16.msra.mxu0 %v4572_v6  ;;  %1498 = vmatpush1.bf16.msra.mxu1 %v4575_v25 }
 0x55b   :  { %1323 = vst [vmem:[#allocation8 + $0x10] sm:$0xf] %v1321_v62  ;;  %1458 = vmatprep.subr.bf16.mxu0 %v4578_v53  ;;  %1499 = vmatprep.subr.bf16.mxu1 %v4581_v23 }
 0x55c   :  { %1488 = vmatprep.mubr.bf16.mxu0 %v5386_v19  ;;  %1529 = vmatprep.mubr.bf16.mxu1 %v5386_v19 }
 0x55e   :  { %1459 = vmatpush1.bf16.msra.mxu0 %v4586_v21  ;;  %1500 = vmatpush1.bf16.msra.mxu1 %v4589_v7 }
 0x55f   :  { %1460 = vmatprep.subr.bf16.mxu0 %v4592_v27  ;;  %1501 = vmatprep.subr.bf16.mxu1 %v4595_v31 }
 0x562   :  { %1461 = vmatpush1.bf16.msra.mxu0 %v4598_v0  ;;  %1502 = vmatpush1.bf16.msra.mxu1 %v4601_v9 }
 0x563   :  { %1462 = vmatprep.subr.bf16.mxu0 %v4604_v16  ;;  %1503 = vmatprep.subr.bf16.mxu1 %v4607_v35 }
 0x566   :  { %1463 = vmatpush1.bf16.msra.mxu0 %v4610_v38  ;;  %1504 = vmatpush1.bf16.msra.mxu1 %v4613_v39 }
 0x567   :  { %1464 = vmatprep.subr.bf16.mxu0 %v4616_v40  ;;  %1505 = vmatprep.subr.bf16.mxu1 %v4619_v41 }
 0x56a   :  { %1465 = vmatpush1.bf16.msra.mxu0 %v4622_v42  ;;  %1506 = vmatpush1.bf16.msra.mxu1 %v4625_v43 }
 0x56b   :  { %1466 = vmatprep.subr.bf16.mxu0 %v4628_v45  ;;  %1507 = vmatprep.subr.bf16.mxu1 %v4631_v46 }
 0x56e   :  { %1467 = vmatpush1.bf16.msra.mxu0 %v4676_v30  ;;  %1508 = vmatpush1.bf16.msra.mxu1 %v4679_v17 }
 0x56f   :  { %1468 = vmatprep.subr.bf16.mxu0 %v4682_v58  ;;  %1509 = vmatprep.subr.bf16.mxu1 %v4685_v59 }
 0x572   :  { %1469 = vmatpush1.bf16.msra.mxu0 %v4688_v60  ;;  %1510 = vmatpush1.bf16.msra.mxu1 %v4691_v61 }
 0x573   :  { %1470 = vmatprep.subr.bf16.mxu0 %v4694_v47  ;;  %1511 = vmatprep.subr.bf16.mxu1 %v4697_v63 }
 0x576   :  { %1471 = vmatpush1.bf16.msra.mxu0 %v4700_v48  ;;  %1512 = vmatpush1.bf16.msra.mxu1 %v4703_v1 }
 0x577   :  { %1580 = vmatprep.subr.bf16.mxu0 %v4558_v36  ;;  %1621 = vmatprep.subr.bf16.mxu1 %v4561_v37 }
 0x619   :  { %v1366_v49 = vpop.f32.mrf.mxu0  ;;  %v1407_v2 = vpop.f32.mrf.mxu1 }
 0x61a   :  { %v1414_v3 = vadd.f32 %v1366_v49, %v5396_v50  ;;  %v1416_v37 = vadd.f32 %v1407_v2, %v5399_v18  ;;  %v3608_v18 = vld [vmem:[#allocation13 + $0xc4] ss:$16 sps:$4 sm:$0xff]  }
 0x61b   :  { %v1368_v4 = vpop.f32.mrf.mxu0  ;;  %v1409_v51 = vpop.f32.mrf.mxu1 }
 0x61c   :  { %v3384_v5 = vmul.f32 -1.442695, %v1414_v3  ;;  %v1415_v54 = vadd.f32 %v1368_v4, %v5397_v52  ;;  %v1417_v36 = vadd.f32 %v1409_v51, %v5398_v11 }
 0x61d   :  { %v1370_v55 = vpop.f32.mrf.mxu0  ;;  %v1411_v56 = vpop.f32.mrf.mxu1 }
 0x61e   :  { %3780 = vpow2.f32 %v3384_v5  ;;  %v3385_v57 = vmul.f32 -1.442695, %v1415_v54  ;;  %v3386_v20 = vmul.f32 -1.442695, %v1417_v36 }
 0x61f   :  { %v1371_v29 = vpop.f32.mrf.mxu0  ;;  %v1412_v22 = vpop.f32.mrf.mxu1 }
 0x620   :  { %3782 = vpow2.f32 %v3385_v57  ;;  %v3600_v29 = vld [vmem:[#allocation13 + $0xe0] ss:$16 sps:$4 sm:$0xff]   ;;  %v3603_v22 = vld [vmem:[#allocation13 + $0xe8] ss:$16 sps:$4 sm:$0xff]  }
 0x621   :  { %3784 = vtanh.f32 %v1416_v37  ;;  %v3611_v37 = vld [vmem:[#allocation13 + $0xcc] ss:$16 sps:$4 sm:$0xff]  }
 0x622   :  { %3786 = vpow2.f32 %v3386_v20 }
 0x62b   :  { %v3781_v8 = vpop.eup %3780 }
 0x62c   :  { %v1421_v14 = vadd.f32 1.0, %v3781_v8  ;;  %v3606_v8 = vld [vmem:[#allocation13 + $0xc0] ss:$16 sps:$4 sm:$0xff]  }
 0x62d   :  { %v3783_v24 = vpop.eup %3782 }
 0x62e   :  { %3788 = vrcp.f32 %v1421_v14  ;;  %v1427_v15 = vadd.f32 1.0, %v3783_v24  ;;  %v3785_v33 = vpop.eup %3784  ;;  %v3609_v14 = vld [vmem:[#allocation13 + $0xc8] ss:$16 sps:$4 sm:$0xff]   ;;  %v3614_v24 = vld [vmem:[#allocation13 + $0xa4] ss:$16 sps:$4 sm:$0xff]  }
 0x62f   :  { %v3787_v34 = vpop.eup %3786 }
 0x630   :  { %3790 = vrcp.f32 %v1427_v15  ;;  %v1434_v44 = vadd.f32 1.0, %v3787_v34  ;;  %v3617_v15 = vld [vmem:[#allocation13 + $0xac] ss:$16 sps:$4 sm:$0xff]   ;;  %v3615_v34 = vld [vmem:[#allocation13 + $0xa8] ss:$16 sps:$4 sm:$0xff]  }
 0x632   :  { %3792 = vrcp.f32 %v1434_v44  ;;  %v3621_v44 = vld [vmem:[#allocation13 + $0x88] ss:$16 sps:$4 sm:$0xff]  }
 0x63b   :  { %v3789_v26 = vpop.eup %3788 }
 0x63c   :  { %v1438_v13 = vmul.f32 %v3789_v26, %v3785_v33  ;;  %v3612_v33 = vld [vmem:[#allocation13 + $0xa0] ss:$16 sps:$4 sm:$0xff]   ;;  %v3620_v26 = vld [vmem:[#allocation13 + $0x84] ss:$16 sps:$4 sm:$0xff]  }
 0x63d   :  { %v3791_v32 = vpop.eup %3790 }
 0x63e   :  { %v1437_v62 = vmul.f32 %v3791_v32, %v4651_v28  ;;  %v3618_v32 = vld [vmem:[#allocation13 + $0x80] ss:$16 sps:$4 sm:$0xff]  }
 0x63f   :  { %v3793_v2 = vpop.eup %3792 }
 0x640   :  { %v4713_v49 = vadd.f32 %v1438_v13, %v1437_v62  ;;  %v3623_v13 = vld [vmem:[#allocation13 + $0x8c] ss:$16 sps:$4 sm:$0xff]   ;;  %v3626_v62 = vld [vmem:[#allocation13 + $0x64] ss:$16 sps:$4 sm:$0xff]  }
 0x642   :  { %3794 = vtanh.f32 %v4713_v49 }
 0x64f   :  { %v3795_v50 = vpop.eup %3794 }
 0x650   :  { %v1441_v3 = vmul.f32 %v3795_v50, %v3793_v2  ;;  %v3624_v2 = vld [vmem:[#allocation13 + $0x60] ss:$16 sps:$4 sm:$0xff]   ;;  %v3627_v50 = vld [vmem:[#allocation13 + $0x68] ss:$16 sps:$4 sm:$0xff]  }
 0x652   :  { %v1444_v4 = vmax.f32 %v1441_v3, 0.0  ;;  %v1455_v51 = vpack.c.bf16 %v1441_v3, %v1441_v3  ;;  %v3632_v3 = vld [vmem:[#allocation13 + $0x44] ss:$16 sps:$4 sm:$0xff]  }
 0x654   :  { %v1445_v5 = vpack.c.bf16 %v1444_v4, %v1444_v4  ;;  %1489 = vmatmul.mubr.bf16.vlgmr.msra.gmra.mxu0 %v1455_v51  ;;  %1530 = vmatmul.mubr.bf16.vlgmr.msra.gmra.mxu1 %v1455_v51  ;;  %v3635_v4 = vld [vmem:[#allocation13 + $0x4c] ss:$16 sps:$4 sm:$0xff]   ;;  %v3630_v51 = vld [vmem:[#allocation13 + $0x40] ss:$16 sps:$4 sm:$0xff]  }
 0x655   :  { %1581 = vmatpush1.bf16.msra.mxu0 %v4572_v6  ;;  %1622 = vmatpush1.bf16.msra.mxu1 %v4575_v25  ;;  %v3602_v6 = vld [vmem:[#allocation13 + $0xe4] ss:$16 sps:$4 sm:$0xff]   ;;  %v3605_v25 = vld [vmem:[#allocation13 + $0xec] ss:$16 sps:$4 sm:$0xff]  }
 0x656   :  { %1447 = vst [vmem:[#allocation8 + $0x14] sm:$0xf] %v1445_v5  ;;  %1582 = vmatprep.subr.bf16.mxu0 %v4578_v53  ;;  %1623 = vmatprep.subr.bf16.mxu1 %v4581_v23  ;;  %v3633_v5 = vld [vmem:[#allocation13 + $0x48] ss:$16 sps:$4 sm:$0xff]  }
 0x657   :  { %1612 = vmatprep.mubr.bf16.mxu0 %v5386_v19  ;;  %1653 = vmatprep.mubr.bf16.mxu1 %v5386_v19 }
 0x659   :  { %1583 = vmatpush1.bf16.msra.mxu0 %v4586_v21  ;;  %1624 = vmatpush1.bf16.msra.mxu1 %v4589_v7  ;;  %v5400_v21 = vld [vmem:[#allocation33_spill] sm:$0xff] }
 0x65a   :  { %1584 = vmatprep.subr.bf16.mxu0 %v4592_v27  ;;  %1625 = vmatprep.subr.bf16.mxu1 %v4595_v31 }
 0x65d   :  { %1585 = vmatpush1.bf16.msra.mxu0 %v4598_v0  ;;  %1626 = vmatpush1.bf16.msra.mxu1 %v4601_v9  ;;  %v5401_v9 = vld [vmem:[#allocation35_spill] sm:$0xff] }
 0x65e   :  { %1586 = vmatprep.subr.bf16.mxu0 %v4604_v16  ;;  %1627 = vmatprep.subr.bf16.mxu1 %v4607_v35 }
 0x661   :  { %1587 = vmatpush1.bf16.msra.mxu0 %v4610_v38  ;;  %1628 = vmatpush1.bf16.msra.mxu1 %v4613_v39 }
 0x662   :  { %1588 = vmatprep.subr.bf16.mxu0 %v4616_v40  ;;  %1629 = vmatprep.subr.bf16.mxu1 %v4619_v41 }
 0x665   :  { %1589 = vmatpush1.bf16.msra.mxu0 %v4622_v42  ;;  %1630 = vmatpush1.bf16.msra.mxu1 %v4625_v43  ;;  %v5402_v42 = vld [vmem:[#allocation36_spill] sm:$0xff] }
 0x666   :  { %1590 = vmatprep.subr.bf16.mxu0 %v4628_v45  ;;  %1631 = vmatprep.subr.bf16.mxu1 %v4631_v46  ;;  %v5403_v45 = vld [vmem:[#allocation34_spill] sm:$0xff] }
 0x669   :  { %1591 = vmatpush1.bf16.msra.mxu0 %v4676_v30  ;;  %1632 = vmatpush1.bf16.msra.mxu1 %v4679_v17 }
 0x66a   :  { %1592 = vmatprep.subr.bf16.mxu0 %v4682_v58  ;;  %1633 = vmatprep.subr.bf16.mxu1 %v4685_v59 }
 0x66d   :  { %1593 = vmatpush1.bf16.msra.mxu0 %v4688_v60  ;;  %1634 = vmatpush1.bf16.msra.mxu1 %v4691_v61 }
 0x66e   :  { %1594 = vmatprep.subr.bf16.mxu0 %v4694_v47  ;;  %1635 = vmatprep.subr.bf16.mxu1 %v4697_v63 }
 0x671   :  { %1595 = vmatpush1.bf16.msra.mxu0 %v4700_v48  ;;  %1636 = vmatpush1.bf16.msra.mxu1 %v4703_v1 }
 0x672   :  { %1974 = vmatprep.subr.bf16.mxu0 %v3602_v6  ;;  %2047 = vmatprep.subr.bf16.mxu1 %v3605_v25  ;;  %v3638_v6 = vld [vmem:[#allocation13 + $0x24] ss:$16 sps:$4 sm:$0xff]   ;;  %v3641_v25 = vld [vmem:[#allocation13 + $0x2c] ss:$16 sps:$4 sm:$0xff]  }
 0x714   :  { %v1490_v53 = vpop.f32.mrf.mxu0  ;;  %v1531_v23 = vpop.f32.mrf.mxu1 }
 0x715   :  { %v1538_v7 = vadd.f32 %v1490_v53, %v5400_v21  ;;  %v1540_v46 = vadd.f32 %v1531_v23, %v5403_v45  ;;  %v3636_v53 = vld [vmem:[#allocation13 + $0x20] ss:$16 sps:$4 sm:$0xff]   ;;  %v3639_v23 = vld [vmem:[#allocation13 + $0x28] ss:$16 sps:$4 sm:$0xff]   ;;  %v3644_v21 = vld [vmem:[#allocation13 + $0x4] ss:$16 sps:$4 sm:$0xff]  }
 0x716   :  { %v1492_v27 = vpop.f32.mrf.mxu0  ;;  %v1533_v31 = vpop.f32.mrf.mxu1  ;;  %v4782_v45 = vld [vmem:[#allocation14 + $0xc8] ss:$16 sps:$4 sm:$0xff]  }
 0x717   :  { %v3387_v0 = vmul.f32 -1.442695, %v1538_v7  ;;  %v1539_v16 = vadd.f32 %v1492_v27, %v5401_v9  ;;  %v1541_v43 = vadd.f32 %v1533_v31, %v5402_v42  ;;  %v3647_v7 = vld [vmem:[#allocation13 + $0xc] ss:$16 sps:$4 sm:$0xff]   ;;  %v3642_v27 = vld [vmem:[#allocation13] ss:$16 sps:$4 sm:$0xff]  }
 0x718   :  { %v1494_v35 = vpop.f32.mrf.mxu0  ;;  %v1535_v38 = vpop.f32.mrf.mxu1  ;;  %v3645_v31 = vld [vmem:[#allocation13 + $0x8] ss:$16 sps:$4 sm:$0xff]   ;;  %v4778_v42 = vld [vmem:[#allocation14 + $0xcc] ss:$16 sps:$4 sm:$0xff]  }
 0x719   :  { %3796 = vpow2.f32 %v3387_v0  ;;  %v3388_v39 = vmul.f32 -1.442695, %v1539_v16  ;;  %v3389_v28 = vmul.f32 -1.442695, %v1541_v43  ;;  %v3648_v0 = vld [vmem:[#allocation8] sm:$0xff]   ;;  %v3649_v9 = vld [vmem:[#allocation8 + $0x8] sm:$0xff]  }
 0x71a   :  { %v1495_v40 = vpop.f32.mrf.mxu0  ;;  %v1536_v41 = vpop.f32.mrf.mxu1  ;;  %v3650_v16 = vld [vmem:[#allocation8 + $0x10] sm:$0xff]   ;;  %v4766_v38 = vld [vmem:[#allocation14 + $0xec] ss:$16 sps:$4 sm:$0xff]  }
 0x71b   :  { %3798 = vpow2.f32 %v3388_v39  ;;  %v4764_v35 = vld [vmem:[#allocation14 + $0xe4] ss:$16 sps:$4 sm:$0xff]   ;;  %v4768_v39 = vld [vmem:[#allocation14 + $0xe0] ss:$16 sps:$4 sm:$0xff]   ;;  %v4770_v40 = vld [vmem:[#allocation14 + $0xe8] ss:$16 sps:$4 sm:$0xff]  }
 0x71c   :  { %3800 = vtanh.f32 %v1540_v46  ;;  %v4776_v41 = vld [vmem:[#allocation14 + $0xc4] ss:$16 sps:$4 sm:$0xff]   ;;  %v4780_v43 = vld [vmem:[#allocation14 + $0xc0] ss:$16 sps:$4 sm:$0xff]  }
 0x71d   :  { %3802 = vpow2.f32 %v3389_v28  ;;  %v4788_v46 = vld [vmem:[#allocation14 + $0xa4] ss:$16 sps:$4 sm:$0xff]   ;;  %v4790_v28 = vld [vmem:[#allocation14 + $0xac] ss:$16 sps:$4 sm:$0xff]  }
 0x726   :  { %v3797_v30 = vpop.eup %3796 }
 0x727   :  { %v1545_v17 = vadd.f32 1.0, %v3797_v30  ;;  %v4792_v30 = vld [vmem:[#allocation14 + $0xa0] ss:$16 sps:$4 sm:$0xff]  }
 0x728   :  { %v3799_v58 = vpop.eup %3798 }
 0x729   :  { %3804 = vrcp.f32 %v1545_v17  ;;  %v1551_v59 = vadd.f32 1.0, %v3799_v58  ;;  %v3801_v60 = vpop.eup %3800  ;;  %v4794_v17 = vld [vmem:[#allocation14 + $0xa8] ss:$16 sps:$4 sm:$0xff]   ;;  %v4800_v58 = vld [vmem:[#allocation14 + $0x84] ss:$16 sps:$4 sm:$0xff]  }
 0x72a   :  { %v3803_v61 = vpop.eup %3802 }
 0x72b   :  { %3806 = vrcp.f32 %v1551_v59  ;;  %v1558_v1 = vadd.f32 1.0, %v3803_v61  ;;  %v4802_v59 = vld [vmem:[#allocation14 + $0x8c] ss:$16 sps:$4 sm:$0xff]   ;;  %v4806_v61 = vld [vmem:[#allocation14 + $0x88] ss:$16 sps:$4 sm:$0xff]  }
 0x72d   :  { %3808 = vrcp.f32 %v1558_v1  ;;  %v4818_v1 = vld [vmem:[#allocation14 + $0x68] ss:$16 sps:$4 sm:$0xff]  }
 0x736   :  { %v3805_v47 = vpop.eup %3804 }
 0x737   :  { %v1562_v63 = vmul.f32 %v3805_v47, %v3801_v60  ;;  %v4804_v60 = vld [vmem:[#allocation14 + $0x80] ss:$16 sps:$4 sm:$0xff]   ;;  %v4812_v47 = vld [vmem:[#allocation14 + $0x64] ss:$16 sps:$4 sm:$0xff]  }
 0x738   :  { %v3807_v48 = vpop.eup %3806 }
 0x739   :  { %v1561_v52 = vmul.f32 %v3807_v48, %v4713_v49  ;;  %v3629_v49 = vld [vmem:[#allocation13 + $0x6c] ss:$16 sps:$4 sm:$0xff]   ;;  %v4816_v48 = vld [vmem:[#allocation14 + $0x60] ss:$16 sps:$4 sm:$0xff]  }
 0x73a   :  { %v3809_v55 = vpop.eup %3808 }
 0x73b   :  { %v4753_v54 = vadd.f32 %v1562_v63, %v1561_v52  ;;  %v4814_v63 = vld [vmem:[#allocation14 + $0x6c] ss:$16 sps:$4 sm:$0xff]   ;;  %v4820_v52 = vld [vmem:[#allocation14 + $0x44] ss:$16 sps:$4 sm:$0xff]  }
 0x73d   :  { %3810 = vtanh.f32 %v4753_v54 }
 0x74a   :  { %v3811_v56 = vpop.eup %3810 }
 0x74b   :  { %v1565_v57 = vmul.f32 %v3811_v56, %v3809_v55  ;;  %v4822_v55 = vld [vmem:[#allocation14 + $0x4c] ss:$16 sps:$4 sm:$0xff]   ;;  %v4828_v56 = vld [vmem:[#allocation14 + $0x40] ss:$16 sps:$4 sm:$0xff]  }
 0x74d   :  { %v1568_v11 = vmax.f32 %v1565_v57, 0.0  ;;  %v1579_v36 = vpack.c.bf16 %v1565_v57, %v1565_v57  ;;  %v4830_v57 = vld [vmem:[#allocation14 + $0x48] ss:$16 sps:$4 sm:$0xff]  }
 0x74f   :  { %v1569_v20 = vpack.c.bf16 %v1568_v11, %v1568_v11  ;;  %1613 = vmatmul.mubr.bf16.vlgmr.msra.gmra.mxu0 %v1579_v36  ;;  %1654 = vmatmul.mubr.bf16.vlgmr.msra.gmra.mxu1 %v1579_v36  ;;  %v4840_v11 = vld [vmem:[#allocation14 + $0x20] ss:$16 sps:$4 sm:$0xff]   ;;  %v4842_v36 = vld [vmem:[#allocation14 + $0x28] ss:$16 sps:$4 sm:$0xff]  }
 0x750   :  { %1975 = vmatpush1.bf16.msra.mxu0 %v3600_v29  ;;  %2048 = vmatpush1.bf16.msra.mxu1 %v3603_v22  ;;  %v4836_v29 = vld [vmem:[#allocation14 + $0x24] ss:$16 sps:$4 sm:$0xff]   ;;  %v4838_v22 = vld [vmem:[#allocation14 + $0x2c] ss:$16 sps:$4 sm:$0xff]  }
 0x751   :  { %1571 = vst [vmem:[#allocation8 + $0x18] sm:$0xf] %v1569_v20  ;;  %1976 = vmatprep.subr.bf16.mxu0 %v3608_v18  ;;  %2049 = vmatprep.subr.bf16.mxu1 %v3611_v37  ;;  %v4844_v18 = vld [vmem:[#allocation14 + $0x4] ss:$16 sps:$4 sm:$0xff]   ;;  %v4848_v37 = vld [vmem:[#allocation14 + $0xc] ss:$16 sps:$4 sm:$0xff]  }
 0x752   :  { %2006 = vmatprep.mubr.bf16.mxu0 %v5386_v19  ;;  %2079 = vmatprep.mubr.bf16.mxu1 %v5386_v19  ;;  %v4852_v20 = vld [vmem:[#allocation14] ss:$16 sps:$4 sm:$0xff]  }
 0x754   :  { %1977 = vmatpush1.bf16.msra.mxu0 %v3606_v8  ;;  %2050 = vmatpush1.bf16.msra.mxu1 %v3609_v14  ;;  %v4854_v8 = vld [vmem:[#allocation14 + $0x8] ss:$16 sps:$4 sm:$0xff]  }
 0x755   :  { %1978 = vmatprep.subr.bf16.mxu0 %v3614_v24  ;;  %2051 = vmatprep.subr.bf16.mxu1 %v3617_v15  ;;  %v5404_v15 = vld [vmem:[#allocation37_spill] sm:$0xff] }
 0x758   :  { %1979 = vmatpush1.bf16.msra.mxu0 %v3612_v33  ;;  %2052 = vmatpush1.bf16.msra.mxu1 %v3615_v34 }
 0x759   :  { %1980 = vmatprep.subr.bf16.mxu0 %v3620_v26  ;;  %2053 = vmatprep.subr.bf16.mxu1 %v3623_v13 }
 0x75c   :  { %1981 = vmatpush1.bf16.msra.mxu0 %v3618_v32  ;;  %2054 = vmatpush1.bf16.msra.mxu1 %v3621_v44 }
 0x75d   :  { %1982 = vmatprep.subr.bf16.mxu0 %v3626_v62  ;;  %2055 = vmatprep.subr.bf16.mxu1 %v3629_v49 }
 0x760   :  { %1983 = vmatpush1.bf16.msra.mxu0 %v3624_v2  ;;  %2056 = vmatpush1.bf16.msra.mxu1 %v3627_v50 }
 0x761   :  { %1984 = vmatprep.subr.bf16.mxu0 %v3632_v3  ;;  %2057 = vmatprep.subr.bf16.mxu1 %v3635_v4  ;;  %v5405_v4 = vld [vmem:[#allocation38_spill] sm:$0xff] }
 0x764   :  { %1985 = vmatpush1.bf16.msra.mxu0 %v3630_v51  ;;  %2058 = vmatpush1.bf16.msra.mxu1 %v3633_v5 }
 0x765   :  { %1986 = vmatprep.subr.bf16.mxu0 %v3638_v6  ;;  %2059 = vmatprep.subr.bf16.mxu1 %v3641_v25 }
 0x768   :  { %1987 = vmatpush1.bf16.msra.mxu0 %v3636_v53  ;;  %2060 = vmatpush1.bf16.msra.mxu1 %v3639_v23 }
 0x769   :  { %1988 = vmatprep.subr.bf16.mxu0 %v3644_v21  ;;  %2061 = vmatprep.subr.bf16.mxu1 %v3647_v7 }
 0x76c   :  { %1989 = vmatpush1.bf16.msra.mxu0 %v3642_v27  ;;  %2062 = vmatpush1.bf16.msra.mxu1 %v3645_v31 }
 0x76d   :  { %2319 = vmatprep.subr.bf16.mxu0 %v4764_v35  ;;  %2360 = vmatprep.subr.bf16.mxu1 %v4766_v38 }
 0x76f   :  { %2007 = vmatmul.mubr.bf16.vlgmr.msra.gmra.mxu0 %v3648_v0  ;;  %2080 = vmatmul.mubr.bf16.vlgmr.msra.gmra.mxu1 %v3648_v0 }
 0x770   :  { %2016 = vmatprep.mubr.bf16.mxu0 %v5386_v19  ;;  %2089 = vmatprep.mubr.bf16.mxu1 %v5386_v19 }
 0x771   :  { %2320 = vmatpush1.bf16.msra.mxu0 %v4768_v39  ;;  %2361 = vmatpush1.bf16.msra.mxu1 %v4770_v40 }
 0x772   :  { %2321 = vmatprep.subr.bf16.mxu0 %v4776_v41  ;;  %2362 = vmatprep.subr.bf16.mxu1 %v4778_v42 }
 0x775   :  { %2322 = vmatpush1.bf16.msra.mxu0 %v4780_v43  ;;  %2363 = vmatpush1.bf16.msra.mxu1 %v4782_v45 }
 0x776   :  { %2323 = vmatprep.subr.bf16.mxu0 %v4788_v46  ;;  %2364 = vmatprep.subr.bf16.mxu1 %v4790_v28 }
 0x777   :  { %2017 = vmatmul.mubr.bf16.gmra.mxu0 %v3649_v9  ;;  %2090 = vmatmul.mubr.bf16.gmra.mxu1 %v3649_v9 }
 0x778   :  { %2026 = vmatprep.mubr.bf16.mxu0 %v5386_v19  ;;  %2099 = vmatprep.mubr.bf16.mxu1 %v5386_v19 }
 0x779   :  { %2324 = vmatpush1.bf16.msra.mxu0 %v4792_v30  ;;  %2365 = vmatpush1.bf16.msra.mxu1 %v4794_v17 }
 0x77a   :  { %2325 = vmatprep.subr.bf16.mxu0 %v4800_v58  ;;  %2366 = vmatprep.subr.bf16.mxu1 %v4802_v59 }
 0x77d   :  { %2326 = vmatpush1.bf16.msra.mxu0 %v4804_v60  ;;  %2367 = vmatpush1.bf16.msra.mxu1 %v4806_v61 }
 0x77e   :  { %2327 = vmatprep.subr.bf16.mxu0 %v4812_v47  ;;  %2368 = vmatprep.subr.bf16.mxu1 %v4814_v63 }
 0x77f   :  { %2027 = vmatmul.mubr.bf16.gmra.mxu0 %v3650_v16  ;;  %2100 = vmatmul.mubr.bf16.gmra.mxu1 %v3650_v16 }
 0x780   :  { %2036 = vmatprep.mubr.bf16.mxu0 %v5386_v19  ;;  %2109 = vmatprep.mubr.bf16.mxu1 %v5386_v19 }
 0x781   :  { %2328 = vmatpush1.bf16.msra.mxu0 %v4816_v48  ;;  %2369 = vmatpush1.bf16.msra.mxu1 %v4818_v1 }
 0x782   :  { %2329 = vmatprep.subr.bf16.mxu0 %v4820_v52  ;;  %2370 = vmatprep.subr.bf16.mxu1 %v4822_v55 }
 0x785   :  { %2330 = vmatpush1.bf16.msra.mxu0 %v4828_v56  ;;  %2371 = vmatpush1.bf16.msra.mxu1 %v4830_v57 }
 0x786   :  { %2331 = vmatprep.subr.bf16.mxu0 %v4836_v29  ;;  %2372 = vmatprep.subr.bf16.mxu1 %v4838_v22 }
 0x789   :  { %2332 = vmatpush1.bf16.msra.mxu0 %v4840_v11  ;;  %2373 = vmatpush1.bf16.msra.mxu1 %v4842_v36 }
 0x78a   :  { %2333 = vmatprep.subr.bf16.mxu0 %v4844_v18  ;;  %2374 = vmatprep.subr.bf16.mxu1 %v4848_v37 }
 0x78d   :  { %2334 = vmatpush1.bf16.msra.mxu0 %v4852_v20  ;;  %2375 = vmatpush1.bf16.msra.mxu1 %v4854_v8 }
 0x78e   :  { %2441 = vmatprep.subr.bf16.mxu0 %v4764_v35  ;;  %2482 = vmatprep.subr.bf16.mxu1 %v4766_v38 }
 0x80f   :  { %v1614_v14 = vpop.f32.mrf.mxu0  ;;  %v1655_v24 = vpop.f32.mrf.mxu1 }
 0x810   :  { %v1662_v33 = vadd.f32 %v1614_v14, %v5404_v15  ;;  %v1664_v51 = vadd.f32 %v1655_v24, %v5405_v4 }
 0x811   :  { %v1616_v34 = vpop.f32.mrf.mxu0  ;;  %v1657_v26 = vpop.f32.mrf.mxu1 }
 0x812   :  { %v3390_v13 = vmul.f32 -1.442695, %v1662_v33  ;;  %v1663_v32 = vadd.f32 %v1616_v34, %v4429_v10  ;;  %v1665_v3 = vadd.f32 %v1657_v26, %v4432_v12  ;;  %v5406_v26 = vmov 0.0|0.0  }
 0x813   :  { %v1618_v44 = vpop.f32.mrf.mxu0  ;;  %v1659_v62 = vpop.f32.mrf.mxu1 }
 0x814   :  { %3812 = vpow2.f32 %v3390_v13  ;;  %v3391_v49 = vmul.f32 -1.442695, %v1663_v32  ;;  %v3392_v5 = vmul.f32 -1.442695, %v1665_v3 }
 0x815   :  { %v1619_v2 = vpop.f32.mrf.mxu0  ;;  %v1660_v50 = vpop.f32.mrf.mxu1 }
 0x816   :  { %3814 = vpow2.f32 %v3391_v49 }
 0x817   :  { %3816 = vtanh.f32 %v1664_v51 }
 0x818   :  { %3818 = vpow2.f32 %v3392_v5 }
 0x821   :  { %v3813_v6 = vpop.eup %3812 }
 0x822   :  { %v1669_v25 = vadd.f32 1.0, %v3813_v6 }
 0x823   :  { %v3815_v53 = vpop.eup %3814 }
 0x824   :  { %3820 = vrcp.f32 %v1669_v25  ;;  %v1675_v23 = vadd.f32 1.0, %v3815_v53  ;;  %v3817_v10 = vpop.eup %3816 }
 0x825   :  { %v3819_v21 = vpop.eup %3818 }
 0x826   :  { %3822 = vrcp.f32 %v1675_v23  ;;  %v1682_v0 = vadd.f32 1.0, %v3819_v21 }
 0x828   :  { %3824 = vrcp.f32 %v1682_v0 }
 0x82f   :  { %v2081_v13 = vpop.f32.mrf.mxu1 }
 0x831   :  { %v3821_v7 = vpop.eup %3820  ;;  %v2083_v44 = vpop.f32.mrf.mxu1 }
 0x832   :  { %v1686_v27 = vmul.f32 %v3821_v7, %v3817_v10 }
 0x833   :  { %v3823_v31 = vpop.eup %3822  ;;  %v4907_v49 = vpop.f32.mrf.mxu1 }
 0x834   :  { %v1685_v9 = vmul.f32 %v3823_v31, %v4753_v54  ;;  %v2008_v54 = vpop.f32.mrf.mxu0 }
 0x835   :  { %v3825_v16 = vpop.eup %3824  ;;  %v4911_v50 = vpop.f32.mrf.mxu1 }
 0x836   :  { %v1687_v12 = vadd.f32 %v1686_v27, %v1685_v9  ;;  %v2010_v32 = vpop.f32.mrf.mxu0 }
 0x837   :  { %v4915_v4 = vpop.f32.mrf.mxu1 }
 0x838   :  { %3826 = vtanh.f32 %v1687_v12  ;;  %v4905_v62 = vpop.f32.mrf.mxu0  ;;  %5407 = vst [vmem:[#allocation20_spill] sm:$0xff] %v4915_v4 }
 0x839   :  { %v4919_v5 = vpop.f32.mrf.mxu1 }
 0x83a   :  { %v4909_v2 = vpop.f32.mrf.mxu0 }
 0x83b   :  { %v4923_v25 = vpop.f32.mrf.mxu1 }
 0x83c   :  { %v4913_v3 = vpop.f32.mrf.mxu0  ;;  %5409 = vst [vmem:[#allocation23_spill] sm:$0xff] %v4923_v25 }
 0x83d   :  { %v4927_v23 = vpop.f32.mrf.mxu1 }
 0x83e   :  { %v4917_v51 = vpop.f32.mrf.mxu0  ;;  %5411 = vst [vmem:[#allocation22_spill] sm:$0xff] %v4927_v23 }
 0x83f   :  { %v4931_v21 = vpop.f32.mrf.mxu1 }
 0x840   :  { %v4921_v6 = vpop.f32.mrf.mxu0  ;;  %5413 = vst [vmem:[#allocation27_spill] sm:$0xff] %v4931_v21 }
 0x841   :  { %5408 = vst [vmem:[#allocation21_spill] sm:$0xff] %v4921_v6  ;;  %v4935_v27 = vpop.f32.mrf.mxu1 }
 0x842   :  { %v4925_v53 = vpop.f32.mrf.mxu0  ;;  %5415 = vst [vmem:[#allocation26_spill] sm:$0xff] %v4935_v27 }
 0x843   :  { %5410 = vst [vmem:[#allocation24_spill] sm:$0xff] %v4925_v53  ;;  %v4939_v0 = vpop.f32.mrf.mxu1 }
 0x844   :  { %v4929_v10 = vpop.f32.mrf.mxu0  ;;  %5417 = vst [vmem:[#allocation31_spill] sm:$0xff] %v4939_v0 }
 0x845   :  { %v3827_v14 = vpop.eup %3826  ;;  %5412 = vst [vmem:[#allocation25_spill] sm:$0xff] %v4929_v10  ;;  %v4943_v12 = vpop.f32.mrf.mxu1 }
 0x846   :  { %v1689_v24 = vmul.f32 %v3827_v14, %v3825_v16  ;;  %v4933_v7 = vpop.f32.mrf.mxu0  ;;  %5419 = vst [vmem:[#allocation30_spill] sm:$0xff] %v4943_v12  ;;  %v1760_v16 = vld [vmem:[%s5354_s6] sm:$0xf] }
 0x847   :  { %5414 = vst [vmem:[#allocation28_spill] sm:$0xff] %v4933_v7 }
 0x848   :  { %v1692_v15 = vmax.f32 %v1689_v24, 0.0  ;;  %v4937_v31 = vpop.f32.mrf.mxu0 }
 0x849   :  { %5416 = vst [vmem:[#allocation29_spill] sm:$0xff] %v4937_v31 }
 0x84a   :  { %v1693_v33 = vpack.c.bf16 %v1692_v15, %v1692_v15  ;;  %v4941_v9 = vpop.f32.mrf.mxu0 }
 0x84b   :  { %5418 = vst [vmem:[#allocation32_spill] sm:$0xff] %v4941_v9 }
 0x84c   :  { %1695 = vst [vmem:[#allocation8 + $0x1c] sm:$0xf] %v1693_v33 }
 0x853   :  { %v3687_v34 = vld [vmem:[#allocation8 + $0x18] sm:$0xff]  }
 0x854   :  { %2037 = vmatmul.mubr.bf16.gmra.mxu0 %v3687_v34  ;;  %2110 = vmatmul.mubr.bf16.gmra.mxu1 %v3687_v34  ;;  %v5424_v34 = vld [vmem:[#allocation19_spill] sm:$0xff] }
 0x855   :  { %2351 = vmatprep.mubr.bf16.mxu0 %v5386_v19  ;;  %2392 = vmatprep.mubr.bf16.mxu1 %v5386_v19  ;;  %v5428_v12 = vsub.s32 1, %v5424_v34  ;;  %v5431_v6 = vsub.s32 3, %v5424_v34 }
 0x857   :  { %v4966_v21 = vrot.slane %v1760_v16, %v5428_v12 }
 0x859   :  { %v2011_v7 = vadd.f32 %v2010_v32, %v4966_v21  ;;  %v5432_v32 = vsub.s32 2, %v5424_v34 }
 0x85c   :  { %2352 = vmatmul.mubr.bf16.vlgmr.msra.gmra.mxu0 %v5406_v26  ;;  %2393 = vmatmul.mubr.bf16.vlgmr.msra.gmra.mxu1 %v5406_v26  ;;  %v5425_v26 = vsub.s32 0, %v5424_v34 }
 0x85d   :  { %2442 = vmatpush1.bf16.msra.mxu0 %v4768_v39  ;;  %2483 = vmatpush1.bf16.msra.mxu1 %v4770_v40 }
 0x85e   :  { %2443 = vmatprep.subr.bf16.mxu0 %v4776_v41  ;;  %2484 = vmatprep.subr.bf16.mxu1 %v4778_v42  ;;  %v4958_v31 = vrot.slane %v1760_v16, %v5425_v26 }
 0x85f   :  { %2473 = vmatprep.mubr.bf16.mxu0 %v5386_v19  ;;  %2514 = vmatprep.mubr.bf16.mxu1 %v5386_v19 }
 0x861   :  { %2444 = vmatpush1.bf16.msra.mxu0 %v4780_v43  ;;  %2485 = vmatpush1.bf16.msra.mxu1 %v4782_v45 }
 0x862   :  { %2445 = vmatprep.subr.bf16.mxu0 %v4788_v46  ;;  %2486 = vmatprep.subr.bf16.mxu1 %v4790_v28 }
 0x865   :  { %2446 = vmatpush1.bf16.msra.mxu0 %v4792_v30  ;;  %2487 = vmatpush1.bf16.msra.mxu1 %v4794_v17 }
 0x866   :  { %2447 = vmatprep.subr.bf16.mxu0 %v4800_v58  ;;  %2488 = vmatprep.subr.bf16.mxu1 %v4802_v59 }
 0x869   :  { %2448 = vmatpush1.bf16.msra.mxu0 %v4804_v60  ;;  %2489 = vmatpush1.bf16.msra.mxu1 %v4806_v61 }
 0x86a   :  { %2449 = vmatprep.subr.bf16.mxu0 %v4812_v47  ;;  %2490 = vmatprep.subr.bf16.mxu1 %v4814_v63 }
 0x86d   :  { %2450 = vmatpush1.bf16.msra.mxu0 %v4816_v48  ;;  %2491 = vmatpush1.bf16.msra.mxu1 %v4818_v1 }
 0x86e   :  { %2451 = vmatprep.subr.bf16.mxu0 %v4820_v52  ;;  %2492 = vmatprep.subr.bf16.mxu1 %v4822_v55 }
 0x871   :  { %2452 = vmatpush1.bf16.msra.mxu0 %v4828_v56  ;;  %2493 = vmatpush1.bf16.msra.mxu1 %v4830_v57 }
 0x872   :  { %2453 = vmatprep.subr.bf16.mxu0 %v4836_v29  ;;  %2494 = vmatprep.subr.bf16.mxu1 %v4838_v22 }
 0x875   :  { %2454 = vmatpush1.bf16.msra.mxu0 %v4840_v11  ;;  %2495 = vmatpush1.bf16.msra.mxu1 %v4842_v36 }
 0x876   :  { %2455 = vmatprep.subr.bf16.mxu0 %v4844_v18  ;;  %2496 = vmatprep.subr.bf16.mxu1 %v4848_v37 }
 0x879   :  { %2456 = vmatpush1.bf16.msra.mxu0 %v4852_v20  ;;  %2497 = vmatpush1.bf16.msra.mxu1 %v4854_v8 }
 0x87a   :  { %2564 = vmatprep.subr.bf16.mxu0 %v4764_v35  ;;  %2605 = vmatprep.subr.bf16.mxu1 %v4766_v38 }
 0x914   :  { %v4948_v14 = vpop.f32.mrf.mxu0  ;;  %v4950_v24 = vpop.f32.mrf.mxu1 }
 0x915   :  { %5420 = vst [vmem:[#allocation33_spill] sm:$0xff] %v4948_v14  ;;  %5421 = vst [vmem:[#allocation35_spill] sm:$0xff] %v4950_v24  ;;  %v2009_v24 = vadd.f32 %v2008_v54, %v4958_v31 }
 0x916   :  { %v4952_v15 = vpop.f32.mrf.mxu0  ;;  %v4954_v33 = vpop.f32.mrf.mxu1 }
 0x917   :  { %5422 = vst [vmem:[#allocation36_spill] sm:$0xff] %v4952_v15  ;;  %5423 = vst [vmem:[#allocation34_spill] sm:$0xff] %v4954_v33 }
 0x918   :  { %v4960_v0 = vpop.f32.mrf.mxu0  ;;  %v4962_v9 = vpop.f32.mrf.mxu1 }
 0x919   :  { %5426 = vst [vmem:[#allocation37_spill] sm:$0xff] %v4960_v0  ;;  %5427 = vst [vmem:[#allocation38_spill] sm:$0xff] %v4962_v9 }
 0x91a   :  { %v4968_v27 = vpop.f32.mrf.mxu0  ;;  %v4970_v14 = vpop.f32.mrf.mxu1 }
 0x91b   :  { %5429 = vst [vmem:[#allocation19_spill] sm:$0xff] %v4968_v27  ;;  %5430 = vst [vmem:[#allocation39_spill] sm:$0xff] %v4970_v14  ;;  %v4976_v27 = vrot.slane %v1760_v16, %v5431_v6 }
 0x91c   :  { %v2353_v15 = vpop.f32.mrf.mxu0  ;;  %v2394_v33 = vpop.f32.mrf.mxu1 }
 0x91d   :  { %v2401_v26 = vadd.f32 %v2353_v15, %v2009_v24  ;;  %v2084_v54 = vadd.f32 %v2083_v44, %v4976_v27  ;;  %v4981_v24 = vrot.slane %v1760_v16, %v5432_v32 }
 0x91e   :  { %v2355_v10 = vpop.f32.mrf.mxu0  ;;  %v2396_v25 = vpop.f32.mrf.mxu1 }
 0x91f   :  { %v3461_v0 = vmul.f32 -1.442695, %v2401_v26  ;;  %v2402_v23 = vadd.f32 %v2355_v10, %v2011_v7  ;;  %v2404_v15 = vadd.f32 %v2396_v25, %v2084_v54  ;;  %v2082_v10 = vadd.f32 %v2081_v13, %v4981_v24 }
 0x920   :  { %v2357_v9 = vpop.f32.mrf.mxu0  ;;  %v2398_v53 = vpop.f32.mrf.mxu1 }
 0x921   :  { %3828 = vpow2.f32 %v3461_v0  ;;  %v3462_v12 = vmul.f32 -1.442695, %v2402_v23  ;;  %v3463_v7 = vmul.f32 -1.442695, %v2404_v15  ;;  %v2403_v0 = vadd.f32 %v2394_v33, %v2082_v10 }
 0x922   :  { %v2358_v14 = vpop.f32.mrf.mxu0  ;;  %v2399_v4 = vpop.f32.mrf.mxu1  ;;  %v2013_v15 = vadd.f32 %v4905_v62, %v4958_v31  ;;  %v2088_v62 = vadd.f32 %v4911_v50, %v4976_v27 }
 0x923   :  { %3830 = vpow2.f32 %v3462_v12 }
 0x924   :  { %3832 = vpow2.f32 %v3463_v7 }
 0x92e   :  { %v3829_v53 = vpop.eup %3828 }
 0x92f   :  { %v2408_v23 = vadd.f32 1.0, %v3829_v53  ;;  %v2015_v53 = vadd.f32 %v4909_v2, %v4966_v21 }
 0x930   :  { %v3831_v9 = vpop.eup %3830 }
 0x931   :  { %3834 = vrcp.f32 %v2408_v23  ;;  %v2414_v6 = vadd.f32 1.0, %v3831_v9  ;;  %v3833_v4 = vpop.eup %3832 }
 0x932   :  { %3836 = vtanh.f32 %v2403_v0  ;;  %v2421_v34 = vadd.f32 1.0, %v3833_v4 }
 0x933   :  { %3838 = vrcp.f32 %v2414_v6 }
 0x934   :  { %3840 = vrcp.f32 %v2421_v34 }
 0x93e   :  { %v3835_v14 = vpop.eup %3834 }
 0x93f   :  { %v3837_v44 = vpop.eup %3836 }
 0x940   :  { %v3839_v26 = vpop.eup %3838  ;;  %v2425_v12 = vmul.f32 %v3837_v44, %v3835_v14 }
 0x941   :  { %v2424_v16 = vmul.f32 0.0, %v3839_v26  ;;  %v3841_v13 = vpop.eup %3840 }
 0x943   :  { %v4984_v25 = vadd.f32 %v2425_v12, %v2424_v16 }
 0x945   :  { %3842 = vtanh.f32 %v4984_v25 }
 0x952   :  { %v3843_v33 = vpop.eup %3842 }
 0x953   :  { %v2428_v54 = vmul.f32 %v3843_v33, %v3841_v13  ;;  %v2086_v13 = vadd.f32 %v4907_v49, %v4981_v24 }
 0x955   :  { %v2431_v32 = vpack.c.bf16 %v2428_v54, %v2428_v54 }
 0x957   :  { %2432 = vst [vmem:[%s5355_s7] sm:$0xf] %v2431_v32  ;;  %2474 = vmatmul.mubr.bf16.vlgmr.msra.gmra.mxu0 %v2431_v32  ;;  %2515 = vmatmul.mubr.bf16.vlgmr.msra.gmra.mxu1 %v2431_v32 }
 0x958   :  { %2565 = vmatpush1.bf16.msra.mxu0 %v4768_v39  ;;  %2606 = vmatpush1.bf16.msra.mxu1 %v4770_v40 }
 0x959   :  { %2566 = vmatprep.subr.bf16.mxu0 %v4776_v41  ;;  %2607 = vmatprep.subr.bf16.mxu1 %v4778_v42 }
 0x95a   :  { %2596 = vmatprep.mubr.bf16.mxu0 %v5386_v19  ;;  %2637 = vmatprep.mubr.bf16.mxu1 %v5386_v19 }
 0x95c   :  { %2567 = vmatpush1.bf16.msra.mxu0 %v4780_v43  ;;  %2608 = vmatpush1.bf16.msra.mxu1 %v4782_v45 }
 0x95d   :  { %2568 = vmatprep.subr.bf16.mxu0 %v4788_v46  ;;  %2609 = vmatprep.subr.bf16.mxu1 %v4790_v28 }
 0x960   :  { %2569 = vmatpush1.bf16.msra.mxu0 %v4792_v30  ;;  %2610 = vmatpush1.bf16.msra.mxu1 %v4794_v17 }
 0x961   :  { %2570 = vmatprep.subr.bf16.mxu0 %v4800_v58  ;;  %2611 = vmatprep.subr.bf16.mxu1 %v4802_v59 }
 0x964   :  { %2571 = vmatpush1.bf16.msra.mxu0 %v4804_v60  ;;  %2612 = vmatpush1.bf16.msra.mxu1 %v4806_v61 }
 0x965   :  { %2572 = vmatprep.subr.bf16.mxu0 %v4812_v47  ;;  %2613 = vmatprep.subr.bf16.mxu1 %v4814_v63 }
 0x968   :  { %2573 = vmatpush1.bf16.msra.mxu0 %v4816_v48  ;;  %2614 = vmatpush1.bf16.msra.mxu1 %v4818_v1 }
 0x969   :  { %2574 = vmatprep.subr.bf16.mxu0 %v4820_v52  ;;  %2615 = vmatprep.subr.bf16.mxu1 %v4822_v55 }
 0x96c   :  { %2575 = vmatpush1.bf16.msra.mxu0 %v4828_v56  ;;  %2616 = vmatpush1.bf16.msra.mxu1 %v4830_v57 }
 0x96d   :  { %2576 = vmatprep.subr.bf16.mxu0 %v4836_v29  ;;  %2617 = vmatprep.subr.bf16.mxu1 %v4838_v22 }
 0x970   :  { %2577 = vmatpush1.bf16.msra.mxu0 %v4840_v11  ;;  %2618 = vmatpush1.bf16.msra.mxu1 %v4842_v36 }
 0x971   :  { %2578 = vmatprep.subr.bf16.mxu0 %v4844_v18  ;;  %2619 = vmatprep.subr.bf16.mxu1 %v4848_v37 }
 0x974   :  { %2579 = vmatpush1.bf16.msra.mxu0 %v4852_v20  ;;  %2620 = vmatpush1.bf16.msra.mxu1 %v4854_v8 }
 0x975   :  { %2687 = vmatprep.subr.bf16.mxu0 %v4764_v35  ;;  %2728 = vmatprep.subr.bf16.mxu1 %v4766_v38 }
 0xa17   :  { %v2475_v10 = vpop.f32.mrf.mxu0  ;;  %v2516_v7 = vpop.f32.mrf.mxu1 }
 0xa18   :  { %v2523_v0 = vadd.f32 %v2475_v10, %v2013_v15  ;;  %v2525_v2 = vadd.f32 %v2516_v7, %v2086_v13 }
 0xa19   :  { %v2477_v23 = vpop.f32.mrf.mxu0  ;;  %v2518_v9 = vpop.f32.mrf.mxu1 }
 0xa1a   :  { %v3464_v6 = vmul.f32 -1.442695, %v2523_v0  ;;  %v2524_v4 = vadd.f32 %v2477_v23, %v2015_v53  ;;  %v2526_v12 = vadd.f32 %v2518_v9, %v2088_v62  ;;  %v2021_v62 = vadd.f32 %v4917_v51, %v4966_v21 }
 0xa1b   :  { %v2479_v14 = vpop.f32.mrf.mxu0  ;;  %v2520_v44 = vpop.f32.mrf.mxu1 }
 0xa1c   :  { %3844 = vpow2.f32 %v3464_v6  ;;  %v3465_v26 = vmul.f32 -1.442695, %v2524_v4  ;;  %v3466_v33 = vmul.f32 -1.442695, %v2526_v12 }
 0xa1d   :  { %v2480_v34 = vpop.f32.mrf.mxu0  ;;  %v2521_v16 = vpop.f32.mrf.mxu1 }
 0xa1e   :  { %3846 = vpow2.f32 %v3465_v26 }
 0xa1f   :  { %3848 = vtanh.f32 %v2525_v2 }
 0xa20   :  { %3850 = vpow2.f32 %v3466_v33 }
 0xa29   :  { %v3845_v54 = vpop.eup %3844 }
 0xa2a   :  { %v2530_v32 = vadd.f32 1.0, %v3845_v54 }
 0xa2b   :  { %v3847_v15 = vpop.eup %3846 }
 0xa2c   :  { %3852 = vrcp.f32 %v2530_v32  ;;  %v2536_v10 = vadd.f32 1.0, %v3847_v15  ;;  %v3849_v53 = vpop.eup %3848 }
 0xa2d   :  { %v3851_v0 = vpop.eup %3850 }
 0xa2e   :  { %3854 = vrcp.f32 %v2536_v10  ;;  %v2543_v50 = vadd.f32 1.0, %v3851_v0 }
 0xa30   :  { %3856 = vrcp.f32 %v2543_v50 }
 0xa39   :  { %v3853_v23 = vpop.eup %3852 }
 0xa3a   :  { %v2547_v6 = vmul.f32 %v3853_v23, %v3849_v53 }
 0xa3b   :  { %v3855_v4 = vpop.eup %3854 }
 0xa3c   :  { %v2546_v9 = vmul.f32 %v3855_v4, %v4984_v25  ;;  %v2019_v25 = vadd.f32 %v4913_v3, %v4958_v31  ;;  %v2094_v3 = vadd.f32 %v4919_v5, %v4976_v27 }
 0xa3d   :  { %v3857_v49 = vpop.eup %3856 }
 0xa3e   :  { %v5033_v14 = vadd.f32 %v2547_v6, %v2546_v9  ;;  %v5433_v6 = vld [vmem:[#allocation20_spill] sm:$0xff] }
 0xa3f   :  { %v2092_v4 = vadd.f32 %v5433_v6, %v4981_v24 }
 0xa40   :  { %3858 = vtanh.f32 %v5033_v14 }
 0xa4d   :  { %v3859_v7 = vpop.eup %3858 }
 0xa4e   :  { %v2550_v44 = vmul.f32 %v3859_v7, %v3857_v49 }
 0xa50   :  { %v2553_v26 = vpack.c.bf16 %v2550_v44, %v2550_v44 }
 0xa52   :  { %3467 = vst [vmem:[%s5355_s7 + $0x4] sm:$0xf] %v2553_v26  ;;  %2597 = vmatmul.mubr.bf16.vlgmr.msra.gmra.mxu0 %v2553_v26  ;;  %2638 = vmatmul.mubr.bf16.vlgmr.msra.gmra.mxu1 %v2553_v26 }
 0xa53   :  { %2688 = vmatpush1.bf16.msra.mxu0 %v4768_v39  ;;  %2729 = vmatpush1.bf16.msra.mxu1 %v4770_v40 }
 0xa54   :  { %2689 = vmatprep.subr.bf16.mxu0 %v4776_v41  ;;  %2730 = vmatprep.subr.bf16.mxu1 %v4778_v42 }
 0xa55   :  { %2719 = vmatprep.mubr.bf16.mxu0 %v5386_v19  ;;  %2760 = vmatprep.mubr.bf16.mxu1 %v5386_v19 }
 0xa57   :  { %2690 = vmatpush1.bf16.msra.mxu0 %v4780_v43  ;;  %2731 = vmatpush1.bf16.msra.mxu1 %v4782_v45 }
 0xa58   :  { %2691 = vmatprep.subr.bf16.mxu0 %v4788_v46  ;;  %2732 = vmatprep.subr.bf16.mxu1 %v4790_v28 }
 0xa5b   :  { %2692 = vmatpush1.bf16.msra.mxu0 %v4792_v30  ;;  %2733 = vmatpush1.bf16.msra.mxu1 %v4794_v17 }
 0xa5c   :  { %2693 = vmatprep.subr.bf16.mxu0 %v4800_v58  ;;  %2734 = vmatprep.subr.bf16.mxu1 %v4802_v59 }
 0xa5f   :  { %2694 = vmatpush1.bf16.msra.mxu0 %v4804_v60  ;;  %2735 = vmatpush1.bf16.msra.mxu1 %v4806_v61 }
 0xa60   :  { %2695 = vmatprep.subr.bf16.mxu0 %v4812_v47  ;;  %2736 = vmatprep.subr.bf16.mxu1 %v4814_v63 }
 0xa63   :  { %2696 = vmatpush1.bf16.msra.mxu0 %v4816_v48  ;;  %2737 = vmatpush1.bf16.msra.mxu1 %v4818_v1 }
 0xa64   :  { %2697 = vmatprep.subr.bf16.mxu0 %v4820_v52  ;;  %2738 = vmatprep.subr.bf16.mxu1 %v4822_v55 }
 0xa67   :  { %2698 = vmatpush1.bf16.msra.mxu0 %v4828_v56  ;;  %2739 = vmatpush1.bf16.msra.mxu1 %v4830_v57 }
 0xa68   :  { %2699 = vmatprep.subr.bf16.mxu0 %v4836_v29  ;;  %2740 = vmatprep.subr.bf16.mxu1 %v4838_v22 }
 0xa6b   :  { %2700 = vmatpush1.bf16.msra.mxu0 %v4840_v11  ;;  %2741 = vmatpush1.bf16.msra.mxu1 %v4842_v36 }
 0xa6c   :  { %2701 = vmatprep.subr.bf16.mxu0 %v4844_v18  ;;  %2742 = vmatprep.subr.bf16.mxu1 %v4848_v37 }
 0xa6f   :  { %2702 = vmatpush1.bf16.msra.mxu0 %v4852_v20  ;;  %2743 = vmatpush1.bf16.msra.mxu1 %v4854_v8 }
 0xa70   :  { %2810 = vmatprep.subr.bf16.mxu0 %v4764_v35  ;;  %2851 = vmatprep.subr.bf16.mxu1 %v4766_v38 }
 0xb12   :  { %v2598_v34 = vpop.f32.mrf.mxu0  ;;  %v2639_v16 = vpop.f32.mrf.mxu1 }
 0xb13   :  { %v2646_v12 = vadd.f32 %v2598_v34, %v2019_v25  ;;  %v2648_v51 = vadd.f32 %v2639_v16, %v2092_v4 }
 0xb14   :  { %v2600_v13 = vpop.f32.mrf.mxu0  ;;  %v2641_v2 = vpop.f32.mrf.mxu1 }
 0xb15   :  { %v3468_v33 = vmul.f32 -1.442695, %v2646_v12  ;;  %v2647_v54 = vadd.f32 %v2600_v13, %v2021_v62  ;;  %v2649_v23 = vadd.f32 %v2641_v2, %v2094_v3 }
 0xb16   :  { %v2602_v32 = vpop.f32.mrf.mxu0  ;;  %v2643_v15 = vpop.f32.mrf.mxu1 }
 0xb17   :  { %3860 = vpow2.f32 %v3468_v33  ;;  %v3469_v10 = vmul.f32 -1.442695, %v2647_v54  ;;  %v3470_v50 = vmul.f32 -1.442695, %v2649_v23 }
 0xb18   :  { %v2603_v53 = vpop.f32.mrf.mxu0  ;;  %v2644_v0 = vpop.f32.mrf.mxu1 }
 0xb19   :  { %3862 = vpow2.f32 %v3469_v10  ;;  %v5435_v0 = vld [vmem:[#allocation24_spill] sm:$0xff] }
 0xb1a   :  { %3864 = vtanh.f32 %v2648_v51  ;;  %v2025_v3 = vadd.f32 %v5435_v0, %v4966_v21 }
 0xb1b   :  { %3866 = vpow2.f32 %v3470_v50 }
 0xb24   :  { %v3861_v9 = vpop.eup %3860 }
 0xb25   :  { %v2653_v49 = vadd.f32 1.0, %v3861_v9 }
 0xb26   :  { %v3863_v7 = vpop.eup %3862 }
 0xb27   :  { %3868 = vrcp.f32 %v2653_v49  ;;  %v2659_v44 = vadd.f32 1.0, %v3863_v7  ;;  %v3865_v26 = vpop.eup %3864 }
 0xb28   :  { %v3867_v25 = vpop.eup %3866 }
 0xb29   :  { %3870 = vrcp.f32 %v2659_v44  ;;  %v2666_v5 = vadd.f32 1.0, %v3867_v25  ;;  %v5436_v25 = vld [vmem:[#allocation22_spill] sm:$0xff] }
 0xb2b   :  { %3872 = vrcp.f32 %v2666_v5 }
 0xb34   :  { %v3869_v34 = vpop.eup %3868 }
 0xb35   :  { %v2670_v62 = vmul.f32 %v3869_v34, %v3865_v26  ;;  %v2098_v34 = vadd.f32 %v5436_v25, %v4976_v27 }
 0xb36   :  { %v3871_v12 = vpop.eup %3870 }
 0xb37   :  { %v2669_v13 = vmul.f32 %v3871_v12, %v5033_v14  ;;  %v5434_v14 = vld [vmem:[#allocation21_spill] sm:$0xff]  ;;  %v5437_v12 = vld [vmem:[#allocation23_spill] sm:$0xff] }
 0xb38   :  { %v3873_v16 = vpop.eup %3872  ;;  %v2023_v15 = vadd.f32 %v5434_v14, %v4958_v31  ;;  %v2096_v5 = vadd.f32 %v5437_v12, %v4981_v24  ;;  %v5186_v12 = vld [vmem:[#allocation14 + $0xe0] ss:$16 sps:$4 sm:$0xff]  }
 0xb39   :  { %v5082_v2 = vadd.f32 %v2670_v62, %v2669_v13 }
 0xb3b   :  { %3874 = vtanh.f32 %v5082_v2 }
 0xb48   :  { %v3875_v33 = vpop.eup %3874 }
 0xb49   :  { %v2673_v54 = vmul.f32 %v3875_v33, %v3873_v16 }
 0xb4b   :  { %v2676_v32 = vpack.c.bf16 %v2673_v54, %v2673_v54 }
 0xb4d   :  { %3471 = vst [vmem:[%s5355_s7 + $0x8] sm:$0xf] %v2676_v32  ;;  %2720 = vmatmul.mubr.bf16.vlgmr.msra.gmra.mxu0 %v2676_v32  ;;  %2761 = vmatmul.mubr.bf16.vlgmr.msra.gmra.mxu1 %v2676_v32 }
 0xb4e   :  { %2811 = vmatpush1.bf16.msra.mxu0 %v4768_v39  ;;  %2852 = vmatpush1.bf16.msra.mxu1 %v4770_v40 }
 0xb4f   :  { %2812 = vmatprep.subr.bf16.mxu0 %v4776_v41  ;;  %2853 = vmatprep.subr.bf16.mxu1 %v4778_v42 }
 0xb50   :  { %2842 = vmatprep.mubr.bf16.mxu0 %v5386_v19  ;;  %2883 = vmatprep.mubr.bf16.mxu1 %v5386_v19 }
 0xb52   :  { %2813 = vmatpush1.bf16.msra.mxu0 %v4780_v43  ;;  %2854 = vmatpush1.bf16.msra.mxu1 %v4782_v45 }
 0xb53   :  { %2814 = vmatprep.subr.bf16.mxu0 %v4788_v46  ;;  %2855 = vmatprep.subr.bf16.mxu1 %v4790_v28 }
 0xb56   :  { %2815 = vmatpush1.bf16.msra.mxu0 %v4792_v30  ;;  %2856 = vmatpush1.bf16.msra.mxu1 %v4794_v17 }
 0xb57   :  { %2816 = vmatprep.subr.bf16.mxu0 %v4800_v58  ;;  %2857 = vmatprep.subr.bf16.mxu1 %v4802_v59 }
 0xb5a   :  { %2817 = vmatpush1.bf16.msra.mxu0 %v4804_v60  ;;  %2858 = vmatpush1.bf16.msra.mxu1 %v4806_v61 }
 0xb5b   :  { %2818 = vmatprep.subr.bf16.mxu0 %v4812_v47  ;;  %2859 = vmatprep.subr.bf16.mxu1 %v4814_v63 }
 0xb5e   :  { %2819 = vmatpush1.bf16.msra.mxu0 %v4816_v48  ;;  %2860 = vmatpush1.bf16.msra.mxu1 %v4818_v1 }
 0xb5f   :  { %2820 = vmatprep.subr.bf16.mxu0 %v4820_v52  ;;  %2861 = vmatprep.subr.bf16.mxu1 %v4822_v55 }
 0xb62   :  { %2821 = vmatpush1.bf16.msra.mxu0 %v4828_v56  ;;  %2862 = vmatpush1.bf16.msra.mxu1 %v4830_v57 }
 0xb63   :  { %2822 = vmatprep.subr.bf16.mxu0 %v4836_v29  ;;  %2863 = vmatprep.subr.bf16.mxu1 %v4838_v22 }
 0xb66   :  { %2823 = vmatpush1.bf16.msra.mxu0 %v4840_v11  ;;  %2864 = vmatpush1.bf16.msra.mxu1 %v4842_v36 }
 0xb67   :  { %2824 = vmatprep.subr.bf16.mxu0 %v4844_v18  ;;  %2865 = vmatprep.subr.bf16.mxu1 %v4848_v37 }
 0xb6a   :  { %2825 = vmatpush1.bf16.msra.mxu0 %v4852_v20  ;;  %2866 = vmatpush1.bf16.msra.mxu1 %v4854_v8 }
 0xb6b   :  { %2933 = vmatprep.subr.bf16.mxu0 %v4764_v35  ;;  %2974 = vmatprep.subr.bf16.mxu1 %v4766_v38 }
 0xc0d   :  { %v2721_v10 = vpop.f32.mrf.mxu0  ;;  %v2762_v53 = vpop.f32.mrf.mxu1 }
 0xc0e   :  { %v2769_v23 = vadd.f32 %v2721_v10, %v2023_v15  ;;  %v2771_v13 = vadd.f32 %v2762_v53, %v2096_v5  ;;  %v5189_v5 = vld [vmem:[#allocation14 + $0xe8] ss:$16 sps:$4 sm:$0xff]  }
 0xc0f   :  { %v2723_v6 = vpop.f32.mrf.mxu0  ;;  %v2764_v4 = vpop.f32.mrf.mxu1 }
 0xc10   :  { %v3472_v51 = vmul.f32 -1.442695, %v2769_v23  ;;  %v2770_v50 = vadd.f32 %v2723_v6, %v2025_v3  ;;  %v2772_v62 = vadd.f32 %v2764_v4, %v2098_v34 }
 0xc11   :  { %v2725_v9 = vpop.f32.mrf.mxu0  ;;  %v2766_v49 = vpop.f32.mrf.mxu1 }
 0xc12   :  { %3876 = vpow2.f32 %v3472_v51  ;;  %v3473_v7 = vmul.f32 -1.442695, %v2770_v50  ;;  %v3474_v16 = vmul.f32 -1.442695, %v2772_v62 }
 0xc13   :  { %v2726_v44 = vpop.f32.mrf.mxu0  ;;  %v2767_v26 = vpop.f32.mrf.mxu1 }
 0xc14   :  { %3878 = vpow2.f32 %v3473_v7 }
 0xc15   :  { %3880 = vtanh.f32 %v2771_v13  ;;  %v5192_v13 = vld [vmem:[#allocation14 + $0xc4] ss:$16 sps:$4 sm:$0xff]  }
 0xc16   :  { %3882 = vpow2.f32 %v3474_v16  ;;  %v5195_v16 = vld [vmem:[#allocation14 + $0xcc] ss:$16 sps:$4 sm:$0xff]  }
 0xc1f   :  { %v3877_v33 = vpop.eup %3876 }
 0xc20   :  { %v2776_v54 = vadd.f32 1.0, %v3877_v33  ;;  %v5200_v33 = vld [vmem:[#allocation14 + $0xc0] ss:$16 sps:$4 sm:$0xff]  }
 0xc21   :  { %v3879_v32 = vpop.eup %3878 }
 0xc22   :  { %3884 = vrcp.f32 %v2776_v54  ;;  %v2782_v14 = vadd.f32 1.0, %v3879_v32  ;;  %v3881_v15 = vpop.eup %3880  ;;  %v5203_v54 = vld [vmem:[#allocation14 + $0xc8] ss:$16 sps:$4 sm:$0xff]   ;;  %v5206_v32 = vld [vmem:[#allocation14 + $0xa4] ss:$16 sps:$4 sm:$0xff]  }
 0xc23   :  { %v3883_v10 = vpop.eup %3882 }
 0xc24   :  { %3886 = vrcp.f32 %v2782_v14  ;;  %v2789_v6 = vadd.f32 1.0, %v3883_v10  ;;  %v5209_v14 = vld [vmem:[#allocation14 + $0xac] ss:$16 sps:$4 sm:$0xff]   ;;  %v5215_v10 = vld [vmem:[#allocation14 + $0xa8] ss:$16 sps:$4 sm:$0xff]  }
 0xc26   :  { %3888 = vrcp.f32 %v2789_v6  ;;  %v5227_v6 = vld [vmem:[#allocation14 + $0x88] ss:$16 sps:$4 sm:$0xff]  }
 0xc2f   :  { %v3885_v0 = vpop.eup %3884 }
 0xc30   :  { %v2793_v3 = vmul.f32 %v3885_v0, %v3881_v15  ;;  %v5212_v15 = vld [vmem:[#allocation14 + $0xa0] ss:$16 sps:$4 sm:$0xff]   ;;  %v5218_v0 = vld [vmem:[#allocation14 + $0x84] ss:$16 sps:$4 sm:$0xff]  }
 0xc31   :  { %v3887_v23 = vpop.eup %3886 }
 0xc32   :  { %v2792_v4 = vmul.f32 %v3887_v23, %v5082_v2  ;;  %v5224_v23 = vld [vmem:[#allocation14 + $0x80] ss:$16 sps:$4 sm:$0xff]  }
 0xc33   :  { %v3889_v53 = vpop.eup %3888 }
 0xc34   :  { %v5131_v51 = vadd.f32 %v2793_v3, %v2792_v4  ;;  %v5221_v3 = vld [vmem:[#allocation14 + $0x8c] ss:$16 sps:$4 sm:$0xff]   ;;  %v5230_v4 = vld [vmem:[#allocation14 + $0x64] ss:$16 sps:$4 sm:$0xff]  }
 0xc36   :  { %3890 = vtanh.f32 %v5131_v51 }
 0xc43   :  { %v3891_v50 = vpop.eup %3890 }
 0xc44   :  { %v2796_v9 = vmul.f32 %v3891_v50, %v3889_v53  ;;  %v5236_v53 = vld [vmem:[#allocation14 + $0x60] ss:$16 sps:$4 sm:$0xff]   ;;  %v5239_v50 = vld [vmem:[#allocation14 + $0x68] ss:$16 sps:$4 sm:$0xff]  }
 0xc46   :  { %v2799_v49 = vpack.c.bf16 %v2796_v9, %v2796_v9  ;;  %v5242_v9 = vld [vmem:[#allocation14 + $0x44] ss:$16 sps:$4 sm:$0xff]  }
 0xc48   :  { %3475 = vst [vmem:[%s5355_s7 + $0xc] sm:$0xf] %v2799_v49  ;;  %2843 = vmatmul.mubr.bf16.vlgmr.msra.gmra.mxu0 %v2799_v49  ;;  %2884 = vmatmul.mubr.bf16.vlgmr.msra.gmra.mxu1 %v2799_v49  ;;  %v5245_v49 = vld [vmem:[#allocation14 + $0x4c] ss:$16 sps:$4 sm:$0xff]  }
 0xc49   :  { %2934 = vmatpush1.bf16.msra.mxu0 %v4768_v39  ;;  %2975 = vmatpush1.bf16.msra.mxu1 %v4770_v40  ;;  %v5438_v39 = vld [vmem:[#allocation25_spill] sm:$0xff] }
 0xc4a   :  { %2935 = vmatprep.subr.bf16.mxu0 %v4776_v41  ;;  %2976 = vmatprep.subr.bf16.mxu1 %v4778_v42  ;;  %v2029_v40 = vadd.f32 %v5438_v39, %v4958_v31  ;;  %v5248_v39 = vld [vmem:[#allocation14 + $0x40] ss:$16 sps:$4 sm:$0xff]  }
 0xc4b   :  { %2965 = vmatprep.mubr.bf16.mxu0 %v5386_v19  ;;  %3006 = vmatprep.mubr.bf16.mxu1 %v5386_v19 }
 0xc4d   :  { %2936 = vmatpush1.bf16.msra.mxu0 %v4780_v43  ;;  %2977 = vmatpush1.bf16.msra.mxu1 %v4782_v45  ;;  %v5439_v43 = vld [vmem:[#allocation28_spill] sm:$0xff] }
 0xc4e   :  { %2937 = vmatprep.subr.bf16.mxu0 %v4788_v46  ;;  %2978 = vmatprep.subr.bf16.mxu1 %v4790_v28  ;;  %v2031_v45 = vadd.f32 %v5439_v43, %v4966_v21  ;;  %v5260_v43 = vld [vmem:[#allocation14 + $0x20] ss:$16 sps:$4 sm:$0xff]  }
 0xc51   :  { %2938 = vmatpush1.bf16.msra.mxu0 %v4792_v30  ;;  %2979 = vmatpush1.bf16.msra.mxu1 %v4794_v17 }
 0xc52   :  { %2939 = vmatprep.subr.bf16.mxu0 %v4800_v58  ;;  %2980 = vmatprep.subr.bf16.mxu1 %v4802_v59 }
 0xc55   :  { %2940 = vmatpush1.bf16.msra.mxu0 %v4804_v60  ;;  %2981 = vmatpush1.bf16.msra.mxu1 %v4806_v61 }
 0xc56   :  { %2941 = vmatprep.subr.bf16.mxu0 %v4812_v47  ;;  %2982 = vmatprep.subr.bf16.mxu1 %v4814_v63 }
 0xc59   :  { %2942 = vmatpush1.bf16.msra.mxu0 %v4816_v48  ;;  %2983 = vmatpush1.bf16.msra.mxu1 %v4818_v1  ;;  %v5441_v1 = vld [vmem:[#allocation27_spill] sm:$0xff] }
 0xc5a   :  { %2943 = vmatprep.subr.bf16.mxu0 %v4820_v52  ;;  %2984 = vmatprep.subr.bf16.mxu1 %v4822_v55  ;;  %v2102_v52 = vadd.f32 %v5441_v1, %v4981_v24 }
 0xc5d   :  { %2944 = vmatpush1.bf16.msra.mxu0 %v4828_v56  ;;  %2985 = vmatpush1.bf16.msra.mxu1 %v4830_v57 }
 0xc5e   :  { %2945 = vmatprep.subr.bf16.mxu0 %v4836_v29  ;;  %2986 = vmatprep.subr.bf16.mxu1 %v4838_v22 }
 0xc61   :  { %2946 = vmatpush1.bf16.msra.mxu0 %v4840_v11  ;;  %2987 = vmatpush1.bf16.msra.mxu1 %v4842_v36 }
 0xc62   :  { %2947 = vmatprep.subr.bf16.mxu0 %v4844_v18  ;;  %2988 = vmatprep.subr.bf16.mxu1 %v4848_v37 }
 0xc65   :  { %2948 = vmatpush1.bf16.msra.mxu0 %v4852_v20  ;;  %2989 = vmatpush1.bf16.msra.mxu1 %v4854_v8 }
 0xc66   :  { %3056 = vmatprep.subr.bf16.mxu0 %v4764_v35  ;;  %3097 = vmatprep.subr.bf16.mxu1 %v4766_v38  ;;  %v5440_v38 = vld [vmem:[#allocation26_spill] sm:$0xff] }
 0xc67   :  { %v2104_v63 = vadd.f32 %v5440_v38, %v4976_v27  ;;  %v5443_v38 = vld [vmem:[#allocation32_spill] sm:$0xff] }
 0xd08   :  { %v2844_v41 = vpop.f32.mrf.mxu0  ;;  %v2885_v42 = vpop.f32.mrf.mxu1 }
 0xd09   :  { %v2892_v46 = vadd.f32 %v2844_v41, %v2029_v40  ;;  %v2894_v55 = vadd.f32 %v2885_v42, %v2102_v52  ;;  %v5251_v40 = vld [vmem:[#allocation14 + $0x48] ss:$16 sps:$4 sm:$0xff]   ;;  %v5254_v41 = vld [vmem:[#allocation14 + $0x24] ss:$16 sps:$4 sm:$0xff]   ;;  %v5257_v42 = vld [vmem:[#allocation14 + $0x2c] ss:$16 sps:$4 sm:$0xff]  }
 0xd0a   :  { %v2846_v28 = vpop.f32.mrf.mxu0  ;;  %v2887_v30 = vpop.f32.mrf.mxu1 }
 0xd0b   :  { %v3476_v17 = vmul.f32 -1.442695, %v2892_v46  ;;  %v2893_v58 = vadd.f32 %v2846_v28, %v2031_v45  ;;  %v2895_v48 = vadd.f32 %v2887_v30, %v2104_v63  ;;  %v5263_v45 = vld [vmem:[#allocation14 + $0x28] ss:$16 sps:$4 sm:$0xff]   ;;  %v5266_v46 = vld [vmem:[#allocation14 + $0x4] ss:$16 sps:$4 sm:$0xff]   ;;  %v2035_v63 = vadd.f32 %v5443_v38, %v4966_v21 }
 0xd0c   :  { %v2848_v59 = vpop.f32.mrf.mxu0  ;;  %v2889_v60 = vpop.f32.mrf.mxu1  ;;  %v5269_v28 = vld [vmem:[#allocation14 + $0xc] ss:$16 sps:$4 sm:$0xff]   ;;  %v5272_v30 = vld [vmem:[#allocation14] ss:$16 sps:$4 sm:$0xff]  }
 0xd0d   :  { %3892 = vpow2.f32 %v3476_v17  ;;  %v3477_v61 = vmul.f32 -1.442695, %v2893_v58  ;;  %v3478_v56 = vmul.f32 -1.442695, %v2895_v48  ;;  %v5275_v17 = vld [vmem:[#allocation14 + $0x8] ss:$16 sps:$4 sm:$0xff]  }
 0xd0e   :  { %v2849_v35 = vpop.f32.mrf.mxu0  ;;  %v2890_v47 = vpop.f32.mrf.mxu1  ;;  %v4018_v58 = vld [vmem:[#allocation14 + $0xe4] ss:$16 sps:$4 sm:$0xff]   ;;  %v4019_v59 = vld [vmem:[#allocation14 + $0xec] ss:$16 sps:$4 sm:$0xff]  }
 0xd0f   :  { %3894 = vpow2.f32 %v3477_v61  ;;  %v5442_v60 = vld [vmem:[#allocation29_spill] sm:$0xff] }
 0xd10   :  { %3896 = vtanh.f32 %v2894_v55  ;;  %v2033_v61 = vadd.f32 %v5442_v60, %v4958_v31 }
 0xd11   :  { %3898 = vpow2.f32 %v3478_v56 }
 0xd1a   :  { %v3893_v57 = vpop.eup %3892 }
 0xd1b   :  { %v2899_v29 = vadd.f32 1.0, %v3893_v57 }
 0xd1c   :  { %v3895_v22 = vpop.eup %3894 }
 0xd1d   :  { %3900 = vrcp.f32 %v2899_v29  ;;  %v2905_v11 = vadd.f32 1.0, %v3895_v22  ;;  %v3897_v36 = vpop.eup %3896 }
 0xd1e   :  { %v3899_v18 = vpop.eup %3898 }
 0xd1f   :  { %3902 = vrcp.f32 %v2905_v11  ;;  %v2912_v2 = vadd.f32 1.0, %v3899_v18  ;;  %v5444_v18 = vld [vmem:[#allocation30_spill] sm:$0xff] }
 0xd21   :  { %3904 = vrcp.f32 %v2912_v2 }
 0xd2a   :  { %v3901_v37 = vpop.eup %3900 }
 0xd2b   :  { %v2916_v20 = vmul.f32 %v3901_v37, %v3897_v36  ;;  %v2108_v37 = vadd.f32 %v5444_v18, %v4976_v27 }
 0xd2c   :  { %v3903_v8 = vpop.eup %3902 }
 0xd2d   :  { %v2915_v7 = vmul.f32 %v3903_v8, %v5131_v51  ;;  %v5233_v51 = vld [vmem:[#allocation14 + $0x6c] ss:$16 sps:$4 sm:$0xff]   ;;  %v5445_v8 = vld [vmem:[#allocation31_spill] sm:$0xff] }
 0xd2e   :  { %v3905_v26 = vpop.eup %3904  ;;  %v2106_v2 = vadd.f32 %v5445_v8, %v4981_v24 }
 0xd2f   :  { %v5180_v44 = vadd.f32 %v2916_v20, %v2915_v7 }
 0xd31   :  { %3906 = vtanh.f32 %v5180_v44 }
 0xd3e   :  { %v3907_v25 = vpop.eup %3906 }
 0xd3f   :  { %v2919_v34 = vmul.f32 %v3907_v25, %v3905_v26 }
 0xd41   :  { %v2922_v62 = vpack.c.bf16 %v2919_v34, %v2919_v34 }
 0xd43   :  { %3479 = vst [vmem:[%s5355_s7 + $0x10] sm:$0xf] %v2922_v62  ;;  %2966 = vmatmul.mubr.bf16.vlgmr.msra.gmra.mxu0 %v2922_v62  ;;  %3007 = vmatmul.mubr.bf16.vlgmr.msra.gmra.mxu1 %v2922_v62 }
 0xd44   :  { %3057 = vmatpush1.bf16.msra.mxu0 %v5186_v12  ;;  %3098 = vmatpush1.bf16.msra.mxu1 %v5189_v5 }
 0xd45   :  { %3058 = vmatprep.subr.bf16.mxu0 %v5192_v13  ;;  %3099 = vmatprep.subr.bf16.mxu1 %v5195_v16 }
 0xd46   :  { %3088 = vmatprep.mubr.bf16.mxu0 %v5386_v19  ;;  %3129 = vmatprep.mubr.bf16.mxu1 %v5386_v19 }
 0xd48   :  { %3059 = vmatpush1.bf16.msra.mxu0 %v5200_v33  ;;  %3100 = vmatpush1.bf16.msra.mxu1 %v5203_v54 }
 0xd49   :  { %3060 = vmatprep.subr.bf16.mxu0 %v5206_v32  ;;  %3101 = vmatprep.subr.bf16.mxu1 %v5209_v14 }
 0xd4c   :  { %3061 = vmatpush1.bf16.msra.mxu0 %v5212_v15  ;;  %3102 = vmatpush1.bf16.msra.mxu1 %v5215_v10 }
 0xd4d   :  { %3062 = vmatprep.subr.bf16.mxu0 %v5218_v0  ;;  %3103 = vmatprep.subr.bf16.mxu1 %v5221_v3 }
 0xd50   :  { %3063 = vmatpush1.bf16.msra.mxu0 %v5224_v23  ;;  %3104 = vmatpush1.bf16.msra.mxu1 %v5227_v6 }
 0xd51   :  { %3064 = vmatprep.subr.bf16.mxu0 %v5230_v4  ;;  %3105 = vmatprep.subr.bf16.mxu1 %v5233_v51 }
 0xd54   :  { %3065 = vmatpush1.bf16.msra.mxu0 %v5236_v53  ;;  %3106 = vmatpush1.bf16.msra.mxu1 %v5239_v50 }
 0xd55   :  { %3066 = vmatprep.subr.bf16.mxu0 %v5242_v9  ;;  %3107 = vmatprep.subr.bf16.mxu1 %v5245_v49 }
 0xd58   :  { %3067 = vmatpush1.bf16.msra.mxu0 %v5248_v39  ;;  %3108 = vmatpush1.bf16.msra.mxu1 %v5251_v40 }
 0xd59   :  { %3068 = vmatprep.subr.bf16.mxu0 %v5254_v41  ;;  %3109 = vmatprep.subr.bf16.mxu1 %v5257_v42 }
 0xd5c   :  { %3069 = vmatpush1.bf16.msra.mxu0 %v5260_v43  ;;  %3110 = vmatpush1.bf16.msra.mxu1 %v5263_v45 }
 0xd5d   :  { %3070 = vmatprep.subr.bf16.mxu0 %v5266_v46  ;;  %3111 = vmatprep.subr.bf16.mxu1 %v5269_v28 }
 0xd60   :  { %3071 = vmatpush1.bf16.msra.mxu0 %v5272_v30  ;;  %3112 = vmatpush1.bf16.msra.mxu1 %v5275_v17 }
 0xd61   :  { %3179 = vmatprep.subr.bf16.mxu0 %v4018_v58  ;;  %3220 = vmatprep.subr.bf16.mxu1 %v4019_v59 }
 0xe03   :  { %v2967_v35 = vpop.f32.mrf.mxu0  ;;  %v3008_v47 = vpop.f32.mrf.mxu1 }
 0xe04   :  { %v3015_v48 = vadd.f32 %v2967_v35, %v2033_v61  ;;  %v3017_v7 = vadd.f32 %v3008_v47, %v2106_v2 }
 0xe05   :  { %v2969_v1 = vpop.f32.mrf.mxu0  ;;  %v3010_v52 = vpop.f32.mrf.mxu1 }
 0xe06   :  { %v3480_v55 = vmul.f32 -1.442695, %v3015_v48  ;;  %v3016_v56 = vadd.f32 %v2969_v1, %v2035_v63  ;;  %v3018_v20 = vadd.f32 %v3010_v52, %v2108_v37 }
 0xe07   :  { %v2971_v57 = vpop.f32.mrf.mxu0  ;;  %v3012_v29 = vpop.f32.mrf.mxu1 }
 0xe08   :  { %3908 = vpow2.f32 %v3480_v55  ;;  %v3481_v22 = vmul.f32 -1.442695, %v3016_v56  ;;  %v3482_v26 = vmul.f32 -1.442695, %v3018_v20  ;;  %v5450_v20 = vld [vmem:[#allocation37_spill] sm:$0xff] }
 0xe09   :  { %v2972_v11 = vpop.f32.mrf.mxu0  ;;  %v3013_v36 = vpop.f32.mrf.mxu1  ;;  %v2043_v8 = vadd.f32 %v5450_v20, %v4958_v31 }
 0xe0a   :  { %3910 = vpow2.f32 %v3481_v22 }
 0xe0b   :  { %3912 = vtanh.f32 %v3017_v7 }
 0xe0c   :  { %3914 = vpow2.f32 %v3482_v26  ;;  %v5451_v26 = vld [vmem:[#allocation19_spill] sm:$0xff] }
 0xe15   :  { %v3909_v25 = vpop.eup %3908 }
 0xe16   :  { %v3022_v34 = vadd.f32 1.0, %v3909_v25  ;;  %v2045_v25 = vadd.f32 %v5451_v26, %v4966_v21 }
 0xe17   :  { %v3911_v62 = vpop.eup %3910 }
 0xe18   :  { %3916 = vrcp.f32 %v3022_v34  ;;  %v3028_v58 = vadd.f32 1.0, %v3911_v62  ;;  %v3913_v59 = vpop.eup %3912 }
 0xe19   :  { %v3915_v60 = vpop.eup %3914 }
 0xe1a   :  { %3918 = vrcp.f32 %v3028_v58  ;;  %v3035_v63 = vadd.f32 1.0, %v3915_v60 }
 0xe1c   :  { %3920 = vrcp.f32 %v3035_v63 }
 0xe25   :  { %v3917_v61 = vpop.eup %3916 }
 0xe26   :  { %v3039_v35 = vmul.f32 %v3917_v61, %v3913_v59 }
 0xe27   :  { %v3919_v38 = vpop.eup %3918 }
 0xe28   :  { %v3038_v48 = vmul.f32 %v3919_v38, %v5180_v44 }
 0xe29   :  { %v3921_v47 = vpop.eup %3920 }
 0xe2a   :  { %v5287_v1 = vadd.f32 %v3039_v35, %v3038_v48 }
 0xe2c   :  { %3922 = vtanh.f32 %v5287_v1 }
 0xe39   :  { %v3923_v52 = vpop.eup %3922 }
 0xe3a   :  { %v3042_v55 = vmul.f32 %v3923_v52, %v3921_v47  ;;  %v5453_v52 = vld [vmem:[#allocation38_spill] sm:$0xff] }
 0xe3c   :  { %v3045_v56 = vpack.c.bf16 %v3042_v55, %v3042_v55  ;;  %v2116_v55 = vadd.f32 %v5453_v52, %v4981_v24 }
 0xe3e   :  { %3483 = vst [vmem:[%s5355_s7 + $0x14] sm:$0xf] %v3045_v56  ;;  %3089 = vmatmul.mubr.bf16.vlgmr.msra.gmra.mxu0 %v3045_v56  ;;  %3130 = vmatmul.mubr.bf16.vlgmr.msra.gmra.mxu1 %v3045_v56 }
 0xe3f   :  { %3180 = vmatpush1.bf16.msra.mxu0 %v5186_v12  ;;  %3221 = vmatpush1.bf16.msra.mxu1 %v5189_v5 }
 0xe40   :  { %3181 = vmatprep.subr.bf16.mxu0 %v5192_v13  ;;  %3222 = vmatprep.subr.bf16.mxu1 %v5195_v16  ;;  %v5447_v13 = vld [vmem:[#allocation36_spill] sm:$0xff] }
 0xe41   :  { %3211 = vmatprep.mubr.bf16.mxu0 %v5386_v19  ;;  %3252 = vmatprep.mubr.bf16.mxu1 %v5386_v19  ;;  %v5446_v19 = vld [vmem:[#allocation33_spill] sm:$0xff]  ;;  %v2041_v16 = vadd.f32 %v5447_v13, %v4966_v21 }
 0xe42   :  { %v2039_v44 = vadd.f32 %v5446_v19, %v4958_v31 }
 0xe43   :  { %3182 = vmatpush1.bf16.msra.mxu0 %v5200_v33  ;;  %3223 = vmatpush1.bf16.msra.mxu1 %v5203_v54 }
 0xe44   :  { %3183 = vmatprep.subr.bf16.mxu0 %v5206_v32  ;;  %3224 = vmatprep.subr.bf16.mxu1 %v5209_v14 }
 0xe47   :  { %3184 = vmatpush1.bf16.msra.mxu0 %v5212_v15  ;;  %3225 = vmatpush1.bf16.msra.mxu1 %v5215_v10 }
 0xe48   :  { %3185 = vmatprep.subr.bf16.mxu0 %v5218_v0  ;;  %3226 = vmatprep.subr.bf16.mxu1 %v5221_v3 }
 0xe4b   :  { %3186 = vmatpush1.bf16.msra.mxu0 %v5224_v23  ;;  %3227 = vmatpush1.bf16.msra.mxu1 %v5227_v6 }
 0xe4c   :  { %3187 = vmatprep.subr.bf16.mxu0 %v5230_v4  ;;  %3228 = vmatprep.subr.bf16.mxu1 %v5233_v51  ;;  %v5448_v4 = vld [vmem:[#allocation34_spill] sm:$0xff] }
 0xe4d   :  { %v2114_v51 = vadd.f32 %v5448_v4, %v4976_v27 }
 0xe4f   :  { %3188 = vmatpush1.bf16.msra.mxu0 %v5236_v53  ;;  %3229 = vmatpush1.bf16.msra.mxu1 %v5239_v50  ;;  %v5449_v50 = vld [vmem:[#allocation35_spill] sm:$0xff] }
 0xe50   :  { %3189 = vmatprep.subr.bf16.mxu0 %v5242_v9  ;;  %3230 = vmatprep.subr.bf16.mxu1 %v5245_v49  ;;  %v2112_v9 = vadd.f32 %v5449_v50, %v4981_v24 }
 0xe53   :  { %3190 = vmatpush1.bf16.msra.mxu0 %v5248_v39  ;;  %3231 = vmatpush1.bf16.msra.mxu1 %v5251_v40 }
 0xe54   :  { %3191 = vmatprep.subr.bf16.mxu0 %v5254_v41  ;;  %3232 = vmatprep.subr.bf16.mxu1 %v5257_v42 }
 0xe57   :  { %3192 = vmatpush1.bf16.msra.mxu0 %v5260_v43  ;;  %3233 = vmatpush1.bf16.msra.mxu1 %v5263_v45 }
 0xe58   :  { %3193 = vmatprep.subr.bf16.mxu0 %v5266_v46  ;;  %3234 = vmatprep.subr.bf16.mxu1 %v5269_v28 }
 0xe5b   :  { %3194 = vmatpush1.bf16.msra.mxu0 %v5272_v30  ;;  %3235 = vmatpush1.bf16.msra.mxu1 %v5275_v17 }
 0xefe   :  { %v3090_v12 = vpop.f32.mrf.mxu0  ;;  %v3131_v5 = vpop.f32.mrf.mxu1 }
 0xeff   :  { %v3138_v33 = vadd.f32 %v3090_v12, %v2039_v44  ;;  %v3140_v49 = vadd.f32 %v3131_v5, %v2112_v9 }
 0xf00   :  { %v3092_v54 = vpop.f32.mrf.mxu0  ;;  %v3133_v32 = vpop.f32.mrf.mxu1 }
 0xf01   :  { %v3484_v14 = vmul.f32 -1.442695, %v3138_v33  ;;  %v3139_v15 = vadd.f32 %v3092_v54, %v2041_v16  ;;  %v3141_v53 = vadd.f32 %v3133_v32, %v2114_v51 }
 0xf02   :  { %v3094_v10 = vpop.f32.mrf.mxu0  ;;  %v3135_v0 = vpop.f32.mrf.mxu1 }
 0xf03   :  { %3924 = vpow2.f32 %v3484_v14  ;;  %v3485_v3 = vmul.f32 -1.442695, %v3139_v15  ;;  %v3486_v39 = vmul.f32 -1.442695, %v3141_v53 }
 0xf04   :  { %v3095_v23 = vpop.f32.mrf.mxu0  ;;  %v3136_v6 = vpop.f32.mrf.mxu1 }
 0xf05   :  { %3926 = vpow2.f32 %v3485_v3 }
 0xf06   :  { %3928 = vtanh.f32 %v3140_v49 }
 0xf07   :  { %3930 = vpow2.f32 %v3486_v39 }
 0xf10   :  { %v3925_v40 = vpop.eup %3924 }
 0xf11   :  { %v3145_v41 = vadd.f32 1.0, %v3925_v40 }
 0xf12   :  { %v3927_v42 = vpop.eup %3926 }
 0xf13   :  { %3932 = vrcp.f32 %v3145_v41  ;;  %v3151_v43 = vadd.f32 1.0, %v3927_v42  ;;  %v3929_v45 = vpop.eup %3928 }
 0xf14   :  { %v3931_v46 = vpop.eup %3930 }
 0xf15   :  { %3934 = vrcp.f32 %v3151_v43  ;;  %v3158_v57 = vadd.f32 1.0, %v3931_v46 }
 0xf17   :  { %3936 = vrcp.f32 %v3158_v57 }
 0xf20   :  { %v3933_v28 = vpop.eup %3932 }
 0xf21   :  { %v3162_v30 = vmul.f32 %v3933_v28, %v3929_v45 }
 0xf22   :  { %v3935_v17 = vpop.eup %3934 }
 0xf23   :  { %v3161_v29 = vmul.f32 %v3935_v17, %v5287_v1  ;;  %v5452_v1 = vld [vmem:[#allocation39_spill] sm:$0xff] }
 0xf24   :  { %v3937_v11 = vpop.eup %3936  ;;  %v2118_v31 = vadd.f32 %v5452_v1, %v4976_v27 }
 0xf25   :  { %v3163_v22 = vadd.f32 %v3162_v30, %v3161_v29 }
 0xf27   :  { %3938 = vtanh.f32 %v3163_v22 }
 0xf34   :  { %v3939_v36 = vpop.eup %3938 }
 0xf35   :  { %v3165_v18 = vmul.f32 %v3939_v36, %v3937_v11 }
 0xf37   :  { %v3168_v37 = vpack.c.bf16 %v3165_v18, %v3165_v18 }
 0xf39   :  { %3487 = vst [vmem:[%s5355_s7 + $0x18] sm:$0xf] %v3168_v37  ;;  %3212 = vmatmul.mubr.bf16.vlgmr.msra.gmra.mxu0 %v3168_v37  ;;  %3253 = vmatmul.mubr.bf16.vlgmr.msra.gmra.mxu1 %v3168_v37 }
 0xff9   :  { %v3213_v2 = vpop.f32.mrf.mxu0  ;;  %v3254_v7 = vpop.f32.mrf.mxu1 }
 0xffa   :  { %v3261_v34 = vadd.f32 %v3213_v2, %v2043_v8  ;;  %v3263_v21 = vadd.f32 %v3254_v7, %v2116_v55 }
 0xffb   :  { %v3215_v62 = vpop.f32.mrf.mxu0  ;;  %v3256_v58 = vpop.f32.mrf.mxu1 }
 0xffc   :  { %v3488_v59 = vmul.f32 -1.442695, %v3261_v34  ;;  %v3262_v60 = vadd.f32 %v3215_v62, %v2045_v25  ;;  %v3264_v47 = vadd.f32 %v3256_v58, %v2118_v31 }
 0xffd   :  { %v3217_v61 = vpop.f32.mrf.mxu0  ;;  %v3258_v35 = vpop.f32.mrf.mxu1 }
 0xffe   :  { %3940 = vpow2.f32 %v3488_v59  ;;  %v3489_v38 = vmul.f32 -1.442695, %v3262_v60  ;;  %v3490_v56 = vmul.f32 -1.442695, %v3264_v47 }
 0xfff   :  { %v3218_v63 = vpop.f32.mrf.mxu0  ;;  %v3259_v48 = vpop.f32.mrf.mxu1 }
0x1000   :  { %3942 = vpow2.f32 %v3489_v38 }
0x1001   :  { %3944 = vtanh.f32 %v3263_v21 }
0x1002   :  { %3946 = vpow2.f32 %v3490_v56 }
0x100b   :  { %v3941_v19 = vpop.eup %3940 }
0x100c   :  { %v3268_v44 = vadd.f32 1.0, %v3941_v19 }
0x100d   :  { %v3943_v12 = vpop.eup %3942 }
0x100e   :  { %3948 = vrcp.f32 %v3268_v44  ;;  %v3274_v5 = vadd.f32 1.0, %v3943_v12  ;;  %v3945_v13 = vpop.eup %3944 }
0x100f   :  { %v3947_v16 = vpop.eup %3946 }
0x1010   :  { %3950 = vrcp.f32 %v3274_v5  ;;  %v3281_v27 = vadd.f32 1.0, %v3947_v16 }
0x1012   :  { %3952 = vrcp.f32 %v3281_v27 }
0x101b   :  { %v3949_v33 = vpop.eup %3948 }
0x101c   :  { %v3285_v54 = vmul.f32 %v3949_v33, %v3945_v13 }
0x101d   :  { %v3951_v32 = vpop.eup %3950 }
0x101e   :  { %v3284_v14 = vmul.f32 %v3951_v32, %v3163_v22 }
0x101f   :  { %v3953_v24 = vpop.eup %3952 }
0x1020   :  { %v3286_v15 = vadd.f32 %v3285_v54, %v3284_v14 }
0x1022   :  { %3954 = vtanh.f32 %v3286_v15 }
0x102f   :  { %v3955_v10 = vpop.eup %3954 }
0x1030   :  { %v3288_v0 = vmul.f32 %v3955_v10, %v3953_v24 }
0x1032   :  { %v3291_v3 = vpack.c.bf16 %v3288_v0, %v3288_v0 }
0x1034   :  { %3491 = vst [vmem:[%s5355_s7 + $0x1c] sm:$0xf] %v3291_v3 }
0x1035   :  { %3298 = vsyncpa [#allocation10], 1 }
0x1036   :  { %3299 = vsyncpa [#allocation12], 1 }
0x1037   :  { %3300 = vsyncpa [#allocation15], 1 }

</bundles_post_ra>
